<compile_context>
chip_gen: v5e
topology: v5e:2x2
jax: 0.10.0
libtpu: 0.0.40
codegen_flags: <defaults>
</compile_context>

<pallas_src>
import jax
import jax.numpy as jnp
from jax.experimental import pallas as pl
from jax.experimental.pallas import tpu as pltpu  # noqa: F401  (kept for completeness)

# ---- model dims (small, consistent with the module's forward) ----
B = 2          # batch
N = 8          # frames per clip
K = 6          # 1 full-frame + 5 object boxes
D = 64         # img_dim (flattened input feature)
D_I = 32       # img_feat_dim
D_O = 32       # obj_feat_dim  (== img_feat_dim so the original LSTM input dim is consistent)
H = 64         # lstm_hidden_dim (== 2*D_I so both LSTM layers share one input width)
L = 2          # n_hidden_layers
BK = B * (K - 1)
assert D_O == D_I and 2 * D_I == H and L >= 2


def _accident_kernel(x_img_ref, x_obj_ref, sel_ref, selt_ref, grp_ref,
                     w_objf_ref, b_objf_ref, b_obj2_ref,
                     w_imgg_ref, b_imgg_ref, w_attng_ref,
                     w_hid_ref, w_comb_ref,
                     w_ihr_ref, w_hh_ref, b_g_ref,
                     w_out_ref, b_out_ref,
                     alphas_ref, preds_ref):
    """Single invocation: batched bf16 precompute + unrolled N-frame recurrence."""
    f32, bf16 = jnp.float32, jnp.bfloat16

    # ---- hoisted small loads / broadcasts (reused every frame, never re-materialized) ----
    S = sel_ref[...]          # (B, BK)  bf16 — selects the K-1 rows of each batch entry
    St = selt_ref[...]        # (BK, B)  f32  — row -> batch broadcast
    G = grp_ref[...]          # (BK, BK) f32  — block-diag ones: per-batch group sums
    w_hid = w_hid_ref[...]    # (H, D_I) f32
    w_comb = w_comb_ref[...]  # (D_I, 1) f32
    w_out = w_out_ref[...]    # (H, 2)   bf16
    b_out_b = jnp.broadcast_to(b_out_ref[...], (B, 2))
    bg = [jnp.broadcast_to(b_g_ref[l], (B, 4 * H)) for l in range(L)]

    # ---- frame-independent precompute, batched across all N frames / K-1 objects ----
    # x slabs arrive in f32 so the presence mask is bit-exact; cast to bf16 at the MXU.
    x_obj = x_obj_ref[...]                                               # (N*BK, D) f32
    msum = jnp.sum(x_obj, axis=-1, keepdims=True)                        # (N*BK, 1)
    mask_all = (jnp.abs(msum) > 1e-6).astype(f32)                        # "object present"
    # folded obj linear:  of2 = mask*(x @ Wobj@Wobj2 + b_obj@Wobj2) + b_obj2
    of2_all = (mask_all * (jnp.dot(x_obj.astype(bf16), w_objf_ref[...],
                                   preferred_element_type=f32) + b_objf_ref[...])
               + b_obj2_ref[...])                                        # (N*BK, D_I) f32
    # object half of the layer-0 gate pre-activation, batched over frames
    aW2_all = jnp.dot(of2_all.astype(bf16), w_attng_ref[...],
                      preferred_element_type=f32)                        # (N*BK, 4H)
    # image half of the layer-0 gate pre-activation, batched over frames (folded W_img)
    img_gate_all = (jnp.dot(x_img_ref[...].astype(bf16), w_imgg_ref[...],
                            preferred_element_type=f32) + b_imgg_ref[...])  # (N*B, 4H)

    # lane-dense alphas accumulator: one column of lanes per frame, stored once after the loop
    lane = jax.lax.broadcasted_iota(jnp.int32, (BK, N), 1)
    alphas_mat = jnp.zeros((BK, N), f32)

    # ---- recurrence, fully unrolled over the N frames (state carried in SSA values) ----
    h = [jnp.zeros((B, H), f32) for _ in range(L)]
    c = [jnp.zeros((B, H), f32) for _ in range(L)]
    h_last = []

    for fi in range(N):
        a_f = of2_all[fi * BK:(fi + 1) * BK, :]                          # (BK, D_I)
        aW2_f = aW2_all[fi * BK:(fi + 1) * BK, :]                        # (BK, 4H)
        m_f = mask_all[fi * BK:(fi + 1) * BK, :]                         # (BK, 1)
        img_gate_f = img_gate_all[fi * B:(fi + 1) * B, :]                # (B, 4H)

        # ---- Fattn: alpha = softmax_k( combined(tanh(hidden(h_prev) + a)) * mask ) ----
        # (kept f32: tiny matmuls, full accuracy for the softmax weights)
        hprime = jnp.dot(h[L - 1], w_hid, preferred_element_type=f32)    # (B, D_I)
        hprime_rep = jnp.dot(St, hprime, preferred_element_type=f32)     # (BK, D_I)
        e = jnp.tanh(hprime_rep + a_f)
        sc = jnp.dot(e, w_comb, preferred_element_type=f32) * m_f        # (BK, 1)
        ex = jnp.exp(sc)                       # |sc| <= sum|w_comb|  -> no max-sub needed
        denom = jnp.dot(G, ex, preferred_element_type=f32)               # per-batch group sum
        alphas = ex / denom                                              # (BK, 1)
        alphas_mat = jnp.where(lane == fi, alphas, alphas_mat)           # place frame column

        # attended-object half of the layer-0 gates: ONE matmul (alpha is a per-row scalar)
        attn_gate = jnp.dot(S, (alphas * aW2_f).astype(bf16),
                            preferred_element_type=f32)                  # (B, 4H)

        # ---- stacked LSTM, fused gates (PyTorch order i|f|g|o along the 4H lanes) ----
        inp = None
        for l in range(L):
            if l == 0:
                x_part = img_gate_f + attn_gate                          # fully precomputed
            else:
                x_part = jnp.dot(inp.astype(bf16), w_ihr_ref[l - 1],
                                 preferred_element_type=f32)
            g = (x_part
                 + jnp.dot(h[l].astype(bf16), w_hh_ref[l], preferred_element_type=f32)
                 + bg[l])                                                # (B, 4H)
            i_g = jax.nn.sigmoid(g[:, 0:H])
            f_g = jax.nn.sigmoid(g[:, H:2 * H])
            z_g = jnp.tanh(g[:, 2 * H:3 * H])
            o_g = jax.nn.sigmoid(g[:, 3 * H:4 * H])
            c[l] = f_g * c[l] + i_g * z_g
            h[l] = o_g * jnp.tanh(c[l])
            inp = h[l]
        h_last.append(inp)

    # ---- single-shot output writes (one store + one writeback DMA per output) ----
    alphas_ref[...] = alphas_mat                                         # (BK, N)
    pred_rows = [jnp.dot(hf.astype(bf16), w_out, preferred_element_type=f32) + b_out_b
                 for hf in h_last]                                       # N x (B, 2), post-loop
    preds_ref[...] = jnp.stack(pred_rows, axis=0)                        # (N, B, 2)


def accident_detection_forward(x, params):
    """Returns (all_alphas: (N, B, K-1, 1), all_predictions: (B, N, 2)) like the PyTorch module."""
    (w_img, b_img, w_obj, b_obj, w_obj2, b_obj2,
     w_hid, w_comb, w_ih, w_hh, b_g, w_out, b_out) = params
    Bx, Nx, Kx, Dx = x.shape
    assert (Bx, Nx, Kx, Dx) == (B, N, K, D)
    f32, bf16 = jnp.float32, jnp.bfloat16

    # Wrapper-side layout plumbing: frame-major, lane-dense 2-D slabs (kept f32 for the mask).
    x_img = jnp.transpose(x[:, :, 0, :], (1, 0, 2)).reshape(Nx * Bx, Dx)                 # (N*B, D)
    x_obj = jnp.transpose(x[:, :, 1:, :], (1, 0, 2, 3)).reshape(Nx * Bx * (Kx - 1), Dx)  # (N*BK, D)

    # Host-built constant selection matrices (avoid in-kernel reshape/repeat of the BK rows).
    sel = jnp.repeat(jnp.eye(Bx, dtype=f32), Kx - 1, axis=1)   # (B, BK)
    sel_t = sel.T                                              # (BK, B)
    grp = sel_t @ sel                                          # (BK, BK)

    # ---- host-side algebraic folds (exact in f32; MXU weights then quantized to bf16) ----
    w_obj_fused = w_obj @ w_obj2                 # (D, D_I)
    b_obj_fused = b_obj @ w_obj2                 # (1, D_I)
    w_ih0a = w_ih[0, 0:D_I, :]                   # image half of layer-0 input weights
    w_ih0b = w_ih[0, D_I:2 * D_I, :]             # attended-object half
    w_img_gate = w_img @ w_ih0a                  # (D, 4H)
    b_img_gate = b_img @ w_ih0a                  # (1, 4H)
    w_ih_rest = w_ih[1:]                         # (L-1, H, 4H) — layer-0 is fully folded away

    alphas_kn, preds = pl.pallas_call(
        _accident_kernel,
        out_shape=(jax.ShapeDtypeStruct((Bx * (Kx - 1), Nx), f32),   # lane-dense, written once
                   jax.ShapeDtypeStruct((Nx, Bx, 2), f32)),          # written once
    )(x_img, x_obj, sel.astype(bf16), sel_t, grp,
      w_obj_fused.astype(bf16), b_obj_fused, b_obj2,
      w_img_gate.astype(bf16), b_img_gate, w_ih0b.astype(bf16),
      w_hid, w_comb,
      w_ih_rest.astype(bf16), w_hh.astype(bf16), b_g,
      w_out.astype(bf16), b_out)

    all_alphas = alphas_kn.T.reshape(Nx, Bx, Kx - 1, 1)   # stacked per-frame (B, K-1, 1) alphas
    all_predictions = jnp.transpose(preds, (1, 0, 2))     # (B, N, 2)
    return all_alphas, all_predictions


def init_params(key):
    """Deterministic synthetic parameters (PyTorch-style uniform(-1/sqrt(fan_in), +))."""
    ks = jax.random.split(key, 14)

    def unif(k, shape, fan_in):
        b = 1.0 / jnp.sqrt(jnp.asarray(fan_in, jnp.float32))
        return jax.random.uniform(k, shape, jnp.float32, -b, b)

    w_img = unif(ks[0], (D, D_I), D)           # _img_to_feat.weight^T
    b_img = unif(ks[1], (1, D_I), D)
    w_obj = unif(ks[2], (D, D_O), D)           # _obj_to_feat.weight^T
    b_obj = unif(ks[3], (1, D_O), D)
    w_obj2 = unif(ks[4], (D_O, D_I), D_O)      # _obj_to_feat2.weight^T
    b_obj2 = unif(ks[5], (1, D_I), D_O)
    w_hid = unif(ks[6], (H, D_I), H)           # Fattn.hidden_linear.weight^T (no bias)
    w_comb = unif(ks[7], (D_I, 1), D_I)        # Fattn.combined_linear.weight^T (no bias)
    w_ih = unif(ks[8], (L, H, 4 * H), H)       # LSTM input weights, gates fused i|f|g|o
    w_hh = unif(ks[9], (L, H, 4 * H), H)       # LSTM recurrent weights, gates fused
    b_ih = unif(ks[10], (L, 1, 4 * H), H)
    b_hh = unif(ks[11], (L, 1, 4 * H), H)
    b_g = b_ih + b_hh                          # biases always appear summed in the cell
    w_out = unif(ks[12], (H, 2), H)            # _out_to_pred.weight^T
    b_out = unif(ks[13], (1, 2), H)
    return (w_img, b_img, w_obj, b_obj, w_obj2, b_obj2,
            w_hid, w_comb, w_ih, w_hh, b_g, w_out, b_out)


def reference_forward(x, params):
    """Plain-JAX (all-f32, unfolded) mirror of the PyTorch forward, for correctness checking."""
    (w_img, b_img, w_obj, b_obj, w_obj2, b_obj2,
     w_hid, w_comb, w_ih, w_hh, b_g, w_out, b_out) = params
    Bx, Nx, Kx, Dx = x.shape
    obj = x[:, :, 1:, :]
    ssum = jnp.sum(obj, axis=-1, keepdims=True)
    mask = (jnp.abs(ssum) > 1e-6).astype(jnp.float32)              # (B, N, K-1, 1)
    img_feat = x[:, :, 0, :] @ w_img + b_img                       # (B, N, D_I)
    of = jnp.einsum('bnkd,df->bnkf', obj, w_obj) + b_obj
    of = of * mask
    of2 = jnp.einsum('bnkf,fg->bnkg', of, w_obj2) + b_obj2         # (B, N, K-1, D_I)

    h = jnp.zeros((L, Bx, H)); c = jnp.zeros((L, Bx, H))
    prev = jnp.zeros((Bx, H))
    alphas_all, preds_all = [], []
    for fi in range(Nx):
        a_ = of2[:, fi]
        m_ = mask[:, fi]
        hprime = prev @ w_hid
        e = jnp.tanh(hprime[:, None, :] + a_)
        sc = jnp.einsum('bkf,fo->bko', e, w_comb) * m_
        al = jax.nn.softmax(sc, axis=1)
        w_of = jnp.sum(a_ * al, axis=1)
        inp = jnp.concatenate([img_feat[:, fi], w_of], axis=1)
        new_h, new_c = [], []
        for l in range(L):
            g = inp @ w_ih[l] + h[l] @ w_hh[l] + b_g[l]
            i_g = jax.nn.sigmoid(g[:, 0:H]); f_g = jax.nn.sigmoid(g[:, H:2 * H])
            g_g = jnp.tanh(g[:, 2 * H:3 * H]); o_g = jax.nn.sigmoid(g[:, 3 * H:4 * H])
            cc = f_g * c[l] + i_g * g_g
            hh = o_g * jnp.tanh(cc)
            new_h.append(hh); new_c.append(cc)
            inp = hh
        h = jnp.stack(new_h); c = jnp.stack(new_c)
        prev = inp
        alphas_all.append(al)
        preds_all.append(inp @ w_out + b_out)
    return jnp.stack(alphas_all), jnp.stack(preds_all).transpose(1, 0, 2)


if __name__ == "__main__":
    key = jax.random.PRNGKey(0)
    kx, kp = jax.random.split(key)
    x = jax.random.normal(kx, (B, N, K, D), jnp.float32)
    # zero some object slots so the "missing object" mask path is exercised
    x = x.at[1, :, 4:, :].set(0.0)
    x = x.at[0, 2:5, 3:, :].set(0.0)

    params = init_params(kp)

    all_alphas, all_preds = accident_detection_forward(x, params)
    jax.block_until_ready((all_alphas, all_preds))

    ref_alphas, ref_preds = reference_forward(x, params)
    assert all_alphas.shape == (N, B, K - 1, 1)
    assert all_preds.shape == (B, N, 2)
    # Tolerances account for bf16 MXU operands (f32 accumulation) in the kernel vs the
    # all-f32 reference; the f32-only kernel variant matches at 5e-3.
    assert jnp.allclose(all_alphas[..., 0], ref_alphas[..., 0], atol=1e-2, rtol=1e-2)
    assert jnp.allclose(all_preds, ref_preds, atol=2e-2, rtol=2e-2)

    print("KERNEL_OK")
</pallas_src>

<mosaic_0001>
module attributes {stable_mosaic.version = 11 : i64} {
  func.func @_accident_kernel(%arg0: memref<16x64xf32, #tpu.memory_space<vmem>>, %arg1: memref<80x64xf32, #tpu.memory_space<vmem>>, %arg2: memref<2x10xbf16, #tpu.memory_space<vmem>>, %arg3: memref<10x2xf32, #tpu.memory_space<vmem>>, %arg4: memref<10x10xf32, #tpu.memory_space<vmem>>, %arg5: memref<64x32xbf16, #tpu.memory_space<vmem>>, %arg6: memref<1x32xf32, #tpu.memory_space<vmem>>, %arg7: memref<1x32xf32, #tpu.memory_space<vmem>>, %arg8: memref<64x256xbf16, #tpu.memory_space<vmem>>, %arg9: memref<1x256xf32, #tpu.memory_space<vmem>>, %arg10: memref<32x256xbf16, #tpu.memory_space<vmem>>, %arg11: memref<64x32xf32, #tpu.memory_space<vmem>>, %arg12: memref<32x1xf32, #tpu.memory_space<vmem>>, %arg13: memref<1x64x256xbf16, #tpu.memory_space<vmem>>, %arg14: memref<2x64x256xbf16, #tpu.memory_space<vmem>>, %arg15: memref<2x1x256xf32, #tpu.memory_space<vmem>>, %arg16: memref<64x2xbf16, #tpu.memory_space<vmem>>, %arg17: memref<1x2xf32, #tpu.memory_space<vmem>>, %arg18: memref<10x8xf32, #tpu.memory_space<vmem>>, %arg19: memref<8x2x2xf32, #tpu.memory_space<vmem>>) attributes {dimension_semantics = [], scalar_prefetch = 0 : i64, scratch_operands = 0 : i64, tpu.core_type = #tpu.core_type<tc>} {
    %c0 = arith.constant 0 : index
    %c0_0 = arith.constant 0 : index
    %0 = vector.load %arg2[%c0, %c0_0] : memref<2x10xbf16, #tpu.memory_space<vmem>>, vector<2x10xbf16>
    %c0_1 = arith.constant 0 : index
    %c0_2 = arith.constant 0 : index
    %1 = vector.load %arg3[%c0_1, %c0_2] : memref<10x2xf32, #tpu.memory_space<vmem>>, vector<10x2xf32>
    %c0_3 = arith.constant 0 : index
    %c0_4 = arith.constant 0 : index
    %2 = vector.load %arg4[%c0_3, %c0_4] : memref<10x10xf32, #tpu.memory_space<vmem>>, vector<10x10xf32>
    %c0_5 = arith.constant 0 : index
    %c0_6 = arith.constant 0 : index
    %3 = vector.load %arg11[%c0_5, %c0_6] : memref<64x32xf32, #tpu.memory_space<vmem>>, vector<64x32xf32>
    %c0_7 = arith.constant 0 : index
    %c0_8 = arith.constant 0 : index
    %4 = vector.load %arg12[%c0_7, %c0_8] : memref<32x1xf32, #tpu.memory_space<vmem>>, vector<32x1xf32>
    %c0_9 = arith.constant 0 : index
    %c0_10 = arith.constant 0 : index
    %5 = vector.load %arg16[%c0_9, %c0_10] : memref<64x2xbf16, #tpu.memory_space<vmem>>, vector<64x2xbf16>
    %c0_11 = arith.constant 0 : index
    %c0_12 = arith.constant 0 : index
    %6 = vector.load %arg17[%c0_11, %c0_12] : memref<1x2xf32, #tpu.memory_space<vmem>>, vector<1x2xf32>
    %7 = vector.shape_cast %6 : vector<1x2xf32> to vector<1x2xf32>
    %8 = vector.broadcast %7 : vector<1x2xf32> to vector<2x2xf32>
    %c0_13 = arith.constant 0 : index
    %c0_14 = arith.constant 0 : index
    %c0_15 = arith.constant 0 : index
    %9 = vector.load %arg15[%c0_13, %c0_14, %c0_15] : memref<2x1x256xf32, #tpu.memory_space<vmem>>, vector<1x1x256xf32>
    %10 = vector.shape_cast %9 : vector<1x1x256xf32> to vector<1x256xf32>
    %11 = vector.shape_cast %10 : vector<1x256xf32> to vector<1x256xf32>
    %12 = vector.broadcast %11 : vector<1x256xf32> to vector<2x256xf32>
    %c1 = arith.constant 1 : index
    %c0_16 = arith.constant 0 : index
    %c0_17 = arith.constant 0 : index
    %13 = vector.load %arg15[%c1, %c0_16, %c0_17] : memref<2x1x256xf32, #tpu.memory_space<vmem>>, vector<1x1x256xf32>
    %14 = vector.shape_cast %13 : vector<1x1x256xf32> to vector<1x256xf32>
    %15 = vector.shape_cast %14 : vector<1x256xf32> to vector<1x256xf32>
    %16 = vector.broadcast %15 : vector<1x256xf32> to vector<2x256xf32>
    %c0_18 = arith.constant 0 : index
    %c0_19 = arith.constant 0 : index
    %17 = vector.load %arg1[%c0_18, %c0_19] : memref<80x64xf32, #tpu.memory_space<vmem>>, vector<80x64xf32>
    %cst = arith.constant dense<0.000000e+00> : vector<80xf32>
    %18 = vector.multi_reduction <add>, %17, %cst [1] : vector<80x64xf32> to vector<80xf32>
    %19 = vector.shape_cast %18 : vector<80xf32> to vector<80x1xf32>
    %20 = math.absf %19 : vector<80x1xf32>
    %cst_20 = arith.constant 9.99999997E-7 : f32
    %21 = vector.broadcast %cst_20 : f32 to vector<80x1xf32>
    %22 = arith.cmpf ogt, %20, %21 : vector<80x1xf32>
    %23 = arith.extui %22 : vector<80x1xi1> to vector<80x1xi32>
    %24 = arith.sitofp %23 : vector<80x1xi32> to vector<80x1xf32>
    %25 = arith.truncf %17 : vector<80x64xf32> to vector<80x64xbf16>
    %c0_21 = arith.constant 0 : index
    %c0_22 = arith.constant 0 : index
    %26 = vector.load %arg5[%c0_21, %c0_22] : memref<64x32xbf16, #tpu.memory_space<vmem>>, vector<64x32xbf16>
    %cst_23 = arith.constant dense<0.000000e+00> : vector<80x32xf32>
    %27 = tpu.matmul %25, %26, %cst_23 {dimension_numbers = #tpu.dot_dimension_numbers<[1], [0], [0], [1], [0, 0, 1, 1], [], []>} : vector<80x64xbf16>, vector<64x32xbf16>, vector<80x32xf32> -> vector<80x32xf32>
    %c0_24 = arith.constant 0 : index
    %c0_25 = arith.constant 0 : index
    %28 = vector.load %arg6[%c0_24, %c0_25] : memref<1x32xf32, #tpu.memory_space<vmem>>, vector<1x32xf32>
    %29 = vector.broadcast %28 : vector<1x32xf32> to vector<80x32xf32>
    %30 = arith.addf %27, %29 : vector<80x32xf32>
    %31 = vector.broadcast %24 : vector<80x1xf32> to vector<80x32xf32>
    %32 = arith.mulf %31, %30 : vector<80x32xf32>
    %c0_26 = arith.constant 0 : index
    %c0_27 = arith.constant 0 : index
    %33 = vector.load %arg7[%c0_26, %c0_27] : memref<1x32xf32, #tpu.memory_space<vmem>>, vector<1x32xf32>
    %34 = vector.broadcast %33 : vector<1x32xf32> to vector<80x32xf32>
    %35 = arith.addf %32, %34 : vector<80x32xf32>
    %36 = arith.truncf %35 : vector<80x32xf32> to vector<80x32xbf16>
    %c0_28 = arith.constant 0 : index
    %c0_29 = arith.constant 0 : index
    %37 = vector.load %arg10[%c0_28, %c0_29] : memref<32x256xbf16, #tpu.memory_space<vmem>>, vector<32x256xbf16>
    %cst_30 = arith.constant dense<0.000000e+00> : vector<80x256xf32>
    %38 = tpu.matmul %36, %37, %cst_30 {dimension_numbers = #tpu.dot_dimension_numbers<[1], [0], [0], [1], [0, 0, 1, 1], [], []>} : vector<80x32xbf16>, vector<32x256xbf16>, vector<80x256xf32> -> vector<80x256xf32>
    %c0_31 = arith.constant 0 : index
    %c0_32 = arith.constant 0 : index
    %39 = vector.load %arg0[%c0_31, %c0_32] : memref<16x64xf32, #tpu.memory_space<vmem>>, vector<16x64xf32>
    %40 = arith.truncf %39 : vector<16x64xf32> to vector<16x64xbf16>
    %c0_33 = arith.constant 0 : index
    %c0_34 = arith.constant 0 : index
    %41 = vector.load %arg8[%c0_33, %c0_34] : memref<64x256xbf16, #tpu.memory_space<vmem>>, vector<64x256xbf16>
    %cst_35 = arith.constant dense<0.000000e+00> : vector<16x256xf32>
    %42 = tpu.matmul %40, %41, %cst_35 {dimension_numbers = #tpu.dot_dimension_numbers<[1], [0], [0], [1], [0, 0, 1, 1], [], []>} : vector<16x64xbf16>, vector<64x256xbf16>, vector<16x256xf32> -> vector<16x256xf32>
    %c0_36 = arith.constant 0 : index
    %c0_37 = arith.constant 0 : index
    %43 = vector.load %arg9[%c0_36, %c0_37] : memref<1x256xf32, #tpu.memory_space<vmem>>, vector<1x256xf32>
    %44 = vector.broadcast %43 : vector<1x256xf32> to vector<16x256xf32>
    %45 = arith.addf %42, %44 : vector<16x256xf32>
    %46 = tpu.iota {dimensions = array<i32: 1>} : vector<10x8xi32>
    %cst_38 = arith.constant 0.000000e+00 : f32
    %47 = vector.broadcast %cst_38 : f32 to vector<10x8xf32>
    %cst_39 = arith.constant 0.000000e+00 : f32
    %48 = vector.broadcast %cst_39 : f32 to vector<2x64xf32>
    %cst_40 = arith.constant 0.000000e+00 : f32
    %49 = vector.broadcast %cst_40 : f32 to vector<2x64xf32>
    %cst_41 = arith.constant 0.000000e+00 : f32
    %50 = vector.broadcast %cst_41 : f32 to vector<2x64xf32>
    %cst_42 = arith.constant 0.000000e+00 : f32
    %51 = vector.broadcast %cst_42 : f32 to vector<2x64xf32>
    %52 = vector.extract_strided_slice %35 {offsets = [0, 0], sizes = [10, 32], strides = [1, 1]} : vector<80x32xf32> to vector<10x32xf32>
    %53 = vector.extract_strided_slice %38 {offsets = [0, 0], sizes = [10, 256], strides = [1, 1]} : vector<80x256xf32> to vector<10x256xf32>
    %54 = vector.extract_strided_slice %24 {offsets = [0, 0], sizes = [10, 1], strides = [1, 1]} : vector<80x1xf32> to vector<10x1xf32>
    %55 = vector.extract_strided_slice %45 {offsets = [0, 0], sizes = [2, 256], strides = [1, 1]} : vector<16x256xf32> to vector<2x256xf32>
    %cst_43 = arith.constant dense<0.000000e+00> : vector<2x32xf32>
    %56 = tpu.matmul %49, %3, %cst_43 {dimension_numbers = #tpu.dot_dimension_numbers<[1], [0], [0], [1], [0, 0, 1, 1], [], []>} : vector<2x64xf32>, vector<64x32xf32>, vector<2x32xf32> -> vector<2x32xf32>
    %cst_44 = arith.constant dense<0.000000e+00> : vector<10x32xf32>
    %57 = tpu.matmul %1, %56, %cst_44 {dimension_numbers = #tpu.dot_dimension_numbers<[1], [0], [0], [1], [0, 0, 1, 1], [], []>} : vector<10x2xf32>, vector<2x32xf32>, vector<10x32xf32> -> vector<10x32xf32>
    %58 = arith.addf %57, %52 : vector<10x32xf32>
    %59 = math.tanh %58 : vector<10x32xf32>
    %cst_45 = arith.constant dense<0.000000e+00> : vector<10x1xf32>
    %60 = tpu.matmul %59, %4, %cst_45 {dimension_numbers = #tpu.dot_dimension_numbers<[1], [0], [0], [1], [0, 0, 1, 1], [], []>} : vector<10x32xf32>, vector<32x1xf32>, vector<10x1xf32> -> vector<10x1xf32>
    %61 = arith.mulf %60, %54 : vector<10x1xf32>
    %62 = math.exp %61 : vector<10x1xf32>
    %cst_46 = arith.constant dense<0.000000e+00> : vector<10x1xf32>
    %63 = tpu.matmul %2, %62, %cst_46 {dimension_numbers = #tpu.dot_dimension_numbers<[1], [0], [0], [1], [0, 0, 1, 1], [], []>} : vector<10x10xf32>, vector<10x1xf32>, vector<10x1xf32> -> vector<10x1xf32>
    %64 = arith.divf %62, %63 : vector<10x1xf32>
    %c0_i32 = arith.constant 0 : i32
    %65 = vector.broadcast %c0_i32 : i32 to vector<10x8xi32>
    %66 = arith.cmpi eq, %46, %65 : vector<10x8xi32>
    %67 = vector.shape_cast %64 : vector<10x1xf32> to vector<10x1xf32>
    %68 = vector.broadcast %67 : vector<10x1xf32> to vector<10x8xf32>
    %69 = arith.select %66, %68, %47 : vector<10x8xi1>, vector<10x8xf32>
    %70 = vector.broadcast %64 : vector<10x1xf32> to vector<10x256xf32>
    %71 = arith.mulf %70, %53 : vector<10x256xf32>
    %72 = arith.truncf %71 : vector<10x256xf32> to vector<10x256xbf16>
    %cst_47 = arith.constant dense<0.000000e+00> : vector<2x256xf32>
    %73 = tpu.matmul %0, %72, %cst_47 {dimension_numbers = #tpu.dot_dimension_numbers<[1], [0], [0], [1], [0, 0, 1, 1], [], []>} : vector<2x10xbf16>, vector<10x256xbf16>, vector<2x256xf32> -> vector<2x256xf32>
    %74 = arith.addf %55, %73 : vector<2x256xf32>
    %75 = arith.truncf %48 : vector<2x64xf32> to vector<2x64xbf16>
    %c0_48 = arith.constant 0 : index
    %c0_49 = arith.constant 0 : index
    %c0_50 = arith.constant 0 : index
    %76 = vector.load %arg14[%c0_48, %c0_49, %c0_50] : memref<2x64x256xbf16, #tpu.memory_space<vmem>>, vector<1x64x256xbf16>
    %77 = vector.shape_cast %76 : vector<1x64x256xbf16> to vector<64x256xbf16>
    %cst_51 = arith.constant dense<0.000000e+00> : vector<2x256xf32>
    %78 = tpu.matmul %75, %77, %cst_51 {dimension_numbers = #tpu.dot_dimension_numbers<[1], [0], [0], [1], [0, 0, 1, 1], [], []>} : vector<2x64xbf16>, vector<64x256xbf16>, vector<2x256xf32> -> vector<2x256xf32>
    %79 = arith.addf %74, %78 : vector<2x256xf32>
    %80 = arith.addf %79, %12 : vector<2x256xf32>
    %81 = vector.extract_strided_slice %80 {offsets = [0, 0], sizes = [2, 64], strides = [1, 1]} : vector<2x256xf32> to vector<2x64xf32>
    %82 = arith.negf %81 : vector<2x64xf32>
    %83 = math.exp %82 : vector<2x64xf32>
    %cst_52 = arith.constant 1.000000e+00 : f32
    %84 = vector.broadcast %cst_52 : f32 to vector<2x64xf32>
    %85 = arith.addf %84, %83 : vector<2x64xf32>
    %86 = arith.divf %84, %85 : vector<2x64xf32>
    %87 = vector.extract_strided_slice %80 {offsets = [0, 64], sizes = [2, 64], strides = [1, 1]} : vector<2x256xf32> to vector<2x64xf32>
    %88 = arith.negf %87 : vector<2x64xf32>
    %89 = math.exp %88 : vector<2x64xf32>
    %cst_53 = arith.constant 1.000000e+00 : f32
    %90 = vector.broadcast %cst_53 : f32 to vector<2x64xf32>
    %91 = arith.addf %90, %89 : vector<2x64xf32>
    %92 = arith.divf %90, %91 : vector<2x64xf32>
    %93 = vector.extract_strided_slice %80 {offsets = [0, 128], sizes = [2, 64], strides = [1, 1]} : vector<2x256xf32> to vector<2x64xf32>
    %94 = math.tanh %93 : vector<2x64xf32>
    %95 = vector.extract_strided_slice %80 {offsets = [0, 192], sizes = [2, 64], strides = [1, 1]} : vector<2x256xf32> to vector<2x64xf32>
    %96 = arith.negf %95 : vector<2x64xf32>
    %97 = math.exp %96 : vector<2x64xf32>
    %cst_54 = arith.constant 1.000000e+00 : f32
    %98 = vector.broadcast %cst_54 : f32 to vector<2x64xf32>
    %99 = arith.addf %98, %97 : vector<2x64xf32>
    %100 = arith.divf %98, %99 : vector<2x64xf32>
    %101 = arith.mulf %92, %50 : vector<2x64xf32>
    %102 = arith.mulf %86, %94 : vector<2x64xf32>
    %103 = arith.addf %101, %102 : vector<2x64xf32>
    %104 = math.tanh %103 : vector<2x64xf32>
    %105 = arith.mulf %100, %104 : vector<2x64xf32>
    %106 = arith.truncf %105 : vector<2x64xf32> to vector<2x64xbf16>
    %c0_55 = arith.constant 0 : index
    %c0_56 = arith.constant 0 : index
    %c0_57 = arith.constant 0 : index
    %107 = vector.load %arg13[%c0_55, %c0_56, %c0_57] : memref<1x64x256xbf16, #tpu.memory_space<vmem>>, vector<1x64x256xbf16>
    %108 = vector.shape_cast %107 : vector<1x64x256xbf16> to vector<64x256xbf16>
    %cst_58 = arith.constant dense<0.000000e+00> : vector<2x256xf32>
    %109 = tpu.matmul %106, %108, %cst_58 {dimension_numbers = #tpu.dot_dimension_numbers<[1], [0], [0], [1], [0, 0, 1, 1], [], []>} : vector<2x64xbf16>, vector<64x256xbf16>, vector<2x256xf32> -> vector<2x256xf32>
    %110 = arith.truncf %49 : vector<2x64xf32> to vector<2x64xbf16>
    %c1_59 = arith.constant 1 : index
    %c0_60 = arith.constant 0 : index
    %c0_61 = arith.constant 0 : index
    %111 = vector.load %arg14[%c1_59, %c0_60, %c0_61] : memref<2x64x256xbf16, #tpu.memory_space<vmem>>, vector<1x64x256xbf16>
    %112 = vector.shape_cast %111 : vector<1x64x256xbf16> to vector<64x256xbf16>
    %cst_62 = arith.constant dense<0.000000e+00> : vector<2x256xf32>
    %113 = tpu.matmul %110, %112, %cst_62 {dimension_numbers = #tpu.dot_dimension_numbers<[1], [0], [0], [1], [0, 0, 1, 1], [], []>} : vector<2x64xbf16>, vector<64x256xbf16>, vector<2x256xf32> -> vector<2x256xf32>
    %114 = arith.addf %109, %113 : vector<2x256xf32>
    %115 = arith.addf %114, %16 : vector<2x256xf32>
    %116 = vector.extract_strided_slice %115 {offsets = [0, 0], sizes = [2, 64], strides = [1, 1]} : vector<2x256xf32> to vector<2x64xf32>
    %117 = arith.negf %116 : vector<2x64xf32>
    %118 = math.exp %117 : vector<2x64xf32>
    %cst_63 = arith.constant 1.000000e+00 : f32
    %119 = vector.broadcast %cst_63 : f32 to vector<2x64xf32>
    %120 = arith.addf %119, %118 : vector<2x64xf32>
    %121 = arith.divf %119, %120 : vector<2x64xf32>
    %122 = vector.extract_strided_slice %115 {offsets = [0, 64], sizes = [2, 64], strides = [1, 1]} : vector<2x256xf32> to vector<2x64xf32>
    %123 = arith.negf %122 : vector<2x64xf32>
    %124 = math.exp %123 : vector<2x64xf32>
    %cst_64 = arith.constant 1.000000e+00 : f32
    %125 = vector.broadcast %cst_64 : f32 to vector<2x64xf32>
    %126 = arith.addf %125, %124 : vector<2x64xf32>
    %127 = arith.divf %125, %126 : vector<2x64xf32>
    %128 = vector.extract_strided_slice %115 {offsets = [0, 128], sizes = [2, 64], strides = [1, 1]} : vector<2x256xf32> to vector<2x64xf32>
    %129 = math.tanh %128 : vector<2x64xf32>
    %130 = vector.extract_strided_slice %115 {offsets = [0, 192], sizes = [2, 64], strides = [1, 1]} : vector<2x256xf32> to vector<2x64xf32>
    %131 = arith.negf %130 : vector<2x64xf32>
    %132 = math.exp %131 : vector<2x64xf32>
    %cst_65 = arith.constant 1.000000e+00 : f32
    %133 = vector.broadcast %cst_65 : f32 to vector<2x64xf32>
    %134 = arith.addf %133, %132 : vector<2x64xf32>
    %135 = arith.divf %133, %134 : vector<2x64xf32>
    %136 = arith.mulf %127, %51 : vector<2x64xf32>
    %137 = arith.mulf %121, %129 : vector<2x64xf32>
    %138 = arith.addf %136, %137 : vector<2x64xf32>
    %139 = math.tanh %138 : vector<2x64xf32>
    %140 = arith.mulf %135, %139 : vector<2x64xf32>
    %141 = vector.extract_strided_slice %35 {offsets = [10, 0], sizes = [10, 32], strides = [1, 1]} : vector<80x32xf32> to vector<10x32xf32>
    %142 = vector.extract_strided_slice %38 {offsets = [10, 0], sizes = [10, 256], strides = [1, 1]} : vector<80x256xf32> to vector<10x256xf32>
    %143 = vector.extract_strided_slice %24 {offsets = [10, 0], sizes = [10, 1], strides = [1, 1]} : vector<80x1xf32> to vector<10x1xf32>
    %144 = vector.extract_strided_slice %45 {offsets = [2, 0], sizes = [2, 256], strides = [1, 1]} : vector<16x256xf32> to vector<2x256xf32>
    %cst_66 = arith.constant dense<0.000000e+00> : vector<2x32xf32>
    %145 = tpu.matmul %140, %3, %cst_66 {dimension_numbers = #tpu.dot_dimension_numbers<[1], [0], [0], [1], [0, 0, 1, 1], [], []>} : vector<2x64xf32>, vector<64x32xf32>, vector<2x32xf32> -> vector<2x32xf32>
    %cst_67 = arith.constant dense<0.000000e+00> : vector<10x32xf32>
    %146 = tpu.matmul %1, %145, %cst_67 {dimension_numbers = #tpu.dot_dimension_numbers<[1], [0], [0], [1], [0, 0, 1, 1], [], []>} : vector<10x2xf32>, vector<2x32xf32>, vector<10x32xf32> -> vector<10x32xf32>
    %147 = arith.addf %146, %141 : vector<10x32xf32>
    %148 = math.tanh %147 : vector<10x32xf32>
    %cst_68 = arith.constant dense<0.000000e+00> : vector<10x1xf32>
    %149 = tpu.matmul %148, %4, %cst_68 {dimension_numbers = #tpu.dot_dimension_numbers<[1], [0], [0], [1], [0, 0, 1, 1], [], []>} : vector<10x32xf32>, vector<32x1xf32>, vector<10x1xf32> -> vector<10x1xf32>
    %150 = arith.mulf %149, %143 : vector<10x1xf32>
    %151 = math.exp %150 : vector<10x1xf32>
    %cst_69 = arith.constant dense<0.000000e+00> : vector<10x1xf32>
    %152 = tpu.matmul %2, %151, %cst_69 {dimension_numbers = #tpu.dot_dimension_numbers<[1], [0], [0], [1], [0, 0, 1, 1], [], []>} : vector<10x10xf32>, vector<10x1xf32>, vector<10x1xf32> -> vector<10x1xf32>
    %153 = arith.divf %151, %152 : vector<10x1xf32>
    %c1_i32 = arith.constant 1 : i32
    %154 = vector.broadcast %c1_i32 : i32 to vector<10x8xi32>
    %155 = arith.cmpi eq, %46, %154 : vector<10x8xi32>
    %156 = vector.shape_cast %153 : vector<10x1xf32> to vector<10x1xf32>
    %157 = vector.broadcast %156 : vector<10x1xf32> to vector<10x8xf32>
    %158 = arith.select %155, %157, %69 : vector<10x8xi1>, vector<10x8xf32>
    %159 = vector.broadcast %153 : vector<10x1xf32> to vector<10x256xf32>
    %160 = arith.mulf %159, %142 : vector<10x256xf32>
    %161 = arith.truncf %160 : vector<10x256xf32> to vector<10x256xbf16>
    %cst_70 = arith.constant dense<0.000000e+00> : vector<2x256xf32>
    %162 = tpu.matmul %0, %161, %cst_70 {dimension_numbers = #tpu.dot_dimension_numbers<[1], [0], [0], [1], [0, 0, 1, 1], [], []>} : vector<2x10xbf16>, vector<10x256xbf16>, vector<2x256xf32> -> vector<2x256xf32>
    %163 = arith.addf %144, %162 : vector<2x256xf32>
    %164 = arith.truncf %105 : vector<2x64xf32> to vector<2x64xbf16>
    %c0_71 = arith.constant 0 : index
    %c0_72 = arith.constant 0 : index
    %c0_73 = arith.constant 0 : index
    %165 = vector.load %arg14[%c0_71, %c0_72, %c0_73] : memref<2x64x256xbf16, #tpu.memory_space<vmem>>, vector<1x64x256xbf16>
    %166 = vector.shape_cast %165 : vector<1x64x256xbf16> to vector<64x256xbf16>
    %cst_74 = arith.constant dense<0.000000e+00> : vector<2x256xf32>
    %167 = tpu.matmul %164, %166, %cst_74 {dimension_numbers = #tpu.dot_dimension_numbers<[1], [0], [0], [1], [0, 0, 1, 1], [], []>} : vector<2x64xbf16>, vector<64x256xbf16>, vector<2x256xf32> -> vector<2x256xf32>
    %168 = arith.addf %163, %167 : vector<2x256xf32>
    %169 = arith.addf %168, %12 : vector<2x256xf32>
    %170 = vector.extract_strided_slice %169 {offsets = [0, 0], sizes = [2, 64], strides = [1, 1]} : vector<2x256xf32> to vector<2x64xf32>
    %171 = arith.negf %170 : vector<2x64xf32>
    %172 = math.exp %171 : vector<2x64xf32>
    %cst_75 = arith.constant 1.000000e+00 : f32
    %173 = vector.broadcast %cst_75 : f32 to vector<2x64xf32>
    %174 = arith.addf %173, %172 : vector<2x64xf32>
    %175 = arith.divf %173, %174 : vector<2x64xf32>
    %176 = vector.extract_strided_slice %169 {offsets = [0, 64], sizes = [2, 64], strides = [1, 1]} : vector<2x256xf32> to vector<2x64xf32>
    %177 = arith.negf %176 : vector<2x64xf32>
    %178 = math.exp %177 : vector<2x64xf32>
    %cst_76 = arith.constant 1.000000e+00 : f32
    %179 = vector.broadcast %cst_76 : f32 to vector<2x64xf32>
    %180 = arith.addf %179, %178 : vector<2x64xf32>
    %181 = arith.divf %179, %180 : vector<2x64xf32>
    %182 = vector.extract_strided_slice %169 {offsets = [0, 128], sizes = [2, 64], strides = [1, 1]} : vector<2x256xf32> to vector<2x64xf32>
    %183 = math.tanh %182 : vector<2x64xf32>
    %184 = vector.extract_strided_slice %169 {offsets = [0, 192], sizes = [2, 64], strides = [1, 1]} : vector<2x256xf32> to vector<2x64xf32>
    %185 = arith.negf %184 : vector<2x64xf32>
    %186 = math.exp %185 : vector<2x64xf32>
    %cst_77 = arith.constant 1.000000e+00 : f32
    %187 = vector.broadcast %cst_77 : f32 to vector<2x64xf32>
    %188 = arith.addf %187, %186 : vector<2x64xf32>
    %189 = arith.divf %187, %188 : vector<2x64xf32>
    %190 = arith.mulf %181, %103 : vector<2x64xf32>
    %191 = arith.mulf %175, %183 : vector<2x64xf32>
    %192 = arith.addf %190, %191 : vector<2x64xf32>
    %193 = math.tanh %192 : vector<2x64xf32>
    %194 = arith.mulf %189, %193 : vector<2x64xf32>
    %195 = arith.truncf %194 : vector<2x64xf32> to vector<2x64xbf16>
    %c0_78 = arith.constant 0 : index
    %c0_79 = arith.constant 0 : index
    %c0_80 = arith.constant 0 : index
    %196 = vector.load %arg13[%c0_78, %c0_79, %c0_80] : memref<1x64x256xbf16, #tpu.memory_space<vmem>>, vector<1x64x256xbf16>
    %197 = vector.shape_cast %196 : vector<1x64x256xbf16> to vector<64x256xbf16>
    %cst_81 = arith.constant dense<0.000000e+00> : vector<2x256xf32>
    %198 = tpu.matmul %195, %197, %cst_81 {dimension_numbers = #tpu.dot_dimension_numbers<[1], [0], [0], [1], [0, 0, 1, 1], [], []>} : vector<2x64xbf16>, vector<64x256xbf16>, vector<2x256xf32> -> vector<2x256xf32>
    %199 = arith.truncf %140 : vector<2x64xf32> to vector<2x64xbf16>
    %c1_82 = arith.constant 1 : index
    %c0_83 = arith.constant 0 : index
    %c0_84 = arith.constant 0 : index
    %200 = vector.load %arg14[%c1_82, %c0_83, %c0_84] : memref<2x64x256xbf16, #tpu.memory_space<vmem>>, vector<1x64x256xbf16>
    %201 = vector.shape_cast %200 : vector<1x64x256xbf16> to vector<64x256xbf16>
    %cst_85 = arith.constant dense<0.000000e+00> : vector<2x256xf32>
    %202 = tpu.matmul %199, %201, %cst_85 {dimension_numbers = #tpu.dot_dimension_numbers<[1], [0], [0], [1], [0, 0, 1, 1], [], []>} : vector<2x64xbf16>, vector<64x256xbf16>, vector<2x256xf32> -> vector<2x256xf32>
    %203 = arith.addf %198, %202 : vector<2x256xf32>
    %204 = arith.addf %203, %16 : vector<2x256xf32>
    %205 = vector.extract_strided_slice %204 {offsets = [0, 0], sizes = [2, 64], strides = [1, 1]} : vector<2x256xf32> to vector<2x64xf32>
    %206 = arith.negf %205 : vector<2x64xf32>
    %207 = math.exp %206 : vector<2x64xf32>
    %cst_86 = arith.constant 1.000000e+00 : f32
    %208 = vector.broadcast %cst_86 : f32 to vector<2x64xf32>
    %209 = arith.addf %208, %207 : vector<2x64xf32>
    %210 = arith.divf %208, %209 : vector<2x64xf32>
    %211 = vector.extract_strided_slice %204 {offsets = [0, 64], sizes = [2, 64], strides = [1, 1]} : vector<2x256xf32> to vector<2x64xf32>
    %212 = arith.negf %211 : vector<2x64xf32>
    %213 = math.exp %212 : vector<2x64xf32>
    %cst_87 = arith.constant 1.000000e+00 : f32
    %214 = vector.broadcast %cst_87 : f32 to vector<2x64xf32>
    %215 = arith.addf %214, %213 : vector<2x64xf32>
    %216 = arith.divf %214, %215 : vector<2x64xf32>
    %217 = vector.extract_strided_slice %204 {offsets = [0, 128], sizes = [2, 64], strides = [1, 1]} : vector<2x256xf32> to vector<2x64xf32>
    %218 = math.tanh %217 : vector<2x64xf32>
    %219 = vector.extract_strided_slice %204 {offsets = [0, 192], sizes = [2, 64], strides = [1, 1]} : vector<2x256xf32> to vector<2x64xf32>
    %220 = arith.negf %219 : vector<2x64xf32>
    %221 = math.exp %220 : vector<2x64xf32>
    %cst_88 = arith.constant 1.000000e+00 : f32
    %222 = vector.broadcast %cst_88 : f32 to vector<2x64xf32>
    %223 = arith.addf %222, %221 : vector<2x64xf32>
    %224 = arith.divf %222, %223 : vector<2x64xf32>
    %225 = arith.mulf %216, %138 : vector<2x64xf32>
    %226 = arith.mulf %210, %218 : vector<2x64xf32>
    %227 = arith.addf %225, %226 : vector<2x64xf32>
    %228 = math.tanh %227 : vector<2x64xf32>
    %229 = arith.mulf %224, %228 : vector<2x64xf32>
    %230 = vector.extract_strided_slice %35 {offsets = [20, 0], sizes = [10, 32], strides = [1, 1]} : vector<80x32xf32> to vector<10x32xf32>
    %231 = vector.extract_strided_slice %38 {offsets = [20, 0], sizes = [10, 256], strides = [1, 1]} : vector<80x256xf32> to vector<10x256xf32>
    %232 = vector.extract_strided_slice %24 {offsets = [20, 0], sizes = [10, 1], strides = [1, 1]} : vector<80x1xf32> to vector<10x1xf32>
    %233 = vector.extract_strided_slice %45 {offsets = [4, 0], sizes = [2, 256], strides = [1, 1]} : vector<16x256xf32> to vector<2x256xf32>
    %cst_89 = arith.constant dense<0.000000e+00> : vector<2x32xf32>
    %234 = tpu.matmul %229, %3, %cst_89 {dimension_numbers = #tpu.dot_dimension_numbers<[1], [0], [0], [1], [0, 0, 1, 1], [], []>} : vector<2x64xf32>, vector<64x32xf32>, vector<2x32xf32> -> vector<2x32xf32>
    %cst_90 = arith.constant dense<0.000000e+00> : vector<10x32xf32>
    %235 = tpu.matmul %1, %234, %cst_90 {dimension_numbers = #tpu.dot_dimension_numbers<[1], [0], [0], [1], [0, 0, 1, 1], [], []>} : vector<10x2xf32>, vector<2x32xf32>, vector<10x32xf32> -> vector<10x32xf32>
    %236 = arith.addf %235, %230 : vector<10x32xf32>
    %237 = math.tanh %236 : vector<10x32xf32>
    %cst_91 = arith.constant dense<0.000000e+00> : vector<10x1xf32>
    %238 = tpu.matmul %237, %4, %cst_91 {dimension_numbers = #tpu.dot_dimension_numbers<[1], [0], [0], [1], [0, 0, 1, 1], [], []>} : vector<10x32xf32>, vector<32x1xf32>, vector<10x1xf32> -> vector<10x1xf32>
    %239 = arith.mulf %238, %232 : vector<10x1xf32>
    %240 = math.exp %239 : vector<10x1xf32>
    %cst_92 = arith.constant dense<0.000000e+00> : vector<10x1xf32>
    %241 = tpu.matmul %2, %240, %cst_92 {dimension_numbers = #tpu.dot_dimension_numbers<[1], [0], [0], [1], [0, 0, 1, 1], [], []>} : vector<10x10xf32>, vector<10x1xf32>, vector<10x1xf32> -> vector<10x1xf32>
    %242 = arith.divf %240, %241 : vector<10x1xf32>
    %c2_i32 = arith.constant 2 : i32
    %243 = vector.broadcast %c2_i32 : i32 to vector<10x8xi32>
    %244 = arith.cmpi eq, %46, %243 : vector<10x8xi32>
    %245 = vector.shape_cast %242 : vector<10x1xf32> to vector<10x1xf32>
    %246 = vector.broadcast %245 : vector<10x1xf32> to vector<10x8xf32>
    %247 = arith.select %244, %246, %158 : vector<10x8xi1>, vector<10x8xf32>
    %248 = vector.broadcast %242 : vector<10x1xf32> to vector<10x256xf32>
    %249 = arith.mulf %248, %231 : vector<10x256xf32>
    %250 = arith.truncf %249 : vector<10x256xf32> to vector<10x256xbf16>
    %cst_93 = arith.constant dense<0.000000e+00> : vector<2x256xf32>
    %251 = tpu.matmul %0, %250, %cst_93 {dimension_numbers = #tpu.dot_dimension_numbers<[1], [0], [0], [1], [0, 0, 1, 1], [], []>} : vector<2x10xbf16>, vector<10x256xbf16>, vector<2x256xf32> -> vector<2x256xf32>
    %252 = arith.addf %233, %251 : vector<2x256xf32>
    %253 = arith.truncf %194 : vector<2x64xf32> to vector<2x64xbf16>
    %c0_94 = arith.constant 0 : index
    %c0_95 = arith.constant 0 : index
    %c0_96 = arith.constant 0 : index
    %254 = vector.load %arg14[%c0_94, %c0_95, %c0_96] : memref<2x64x256xbf16, #tpu.memory_space<vmem>>, vector<1x64x256xbf16>
    %255 = vector.shape_cast %254 : vector<1x64x256xbf16> to vector<64x256xbf16>
    %cst_97 = arith.constant dense<0.000000e+00> : vector<2x256xf32>
    %256 = tpu.matmul %253, %255, %cst_97 {dimension_numbers = #tpu.dot_dimension_numbers<[1], [0], [0], [1], [0, 0, 1, 1], [], []>} : vector<2x64xbf16>, vector<64x256xbf16>, vector<2x256xf32> -> vector<2x256xf32>
    %257 = arith.addf %252, %256 : vector<2x256xf32>
    %258 = arith.addf %257, %12 : vector<2x256xf32>
    %259 = vector.extract_strided_slice %258 {offsets = [0, 0], sizes = [2, 64], strides = [1, 1]} : vector<2x256xf32> to vector<2x64xf32>
    %260 = arith.negf %259 : vector<2x64xf32>
    %261 = math.exp %260 : vector<2x64xf32>
    %cst_98 = arith.constant 1.000000e+00 : f32
    %262 = vector.broadcast %cst_98 : f32 to vector<2x64xf32>
    %263 = arith.addf %262, %261 : vector<2x64xf32>
    %264 = arith.divf %262, %263 : vector<2x64xf32>
    %265 = vector.extract_strided_slice %258 {offsets = [0, 64], sizes = [2, 64], strides = [1, 1]} : vector<2x256xf32> to vector<2x64xf32>
    %266 = arith.negf %265 : vector<2x64xf32>
    %267 = math.exp %266 : vector<2x64xf32>
    %cst_99 = arith.constant 1.000000e+00 : f32
    %268 = vector.broadcast %cst_99 : f32 to vector<2x64xf32>
    %269 = arith.addf %268, %267 : vector<2x64xf32>
    %270 = arith.divf %268, %269 : vector<2x64xf32>
    %271 = vector.extract_strided_slice %258 {offsets = [0, 128], sizes = [2, 64], strides = [1, 1]} : vector<2x256xf32> to vector<2x64xf32>
    %272 = math.tanh %271 : vector<2x64xf32>
    %273 = vector.extract_strided_slice %258 {offsets = [0, 192], sizes = [2, 64], strides = [1, 1]} : vector<2x256xf32> to vector<2x64xf32>
    %274 = arith.negf %273 : vector<2x64xf32>
    %275 = math.exp %274 : vector<2x64xf32>
    %cst_100 = arith.constant 1.000000e+00 : f32
    %276 = vector.broadcast %cst_100 : f32 to vector<2x64xf32>
    %277 = arith.addf %276, %275 : vector<2x64xf32>
    %278 = arith.divf %276, %277 : vector<2x64xf32>
    %279 = arith.mulf %270, %192 : vector<2x64xf32>
    %280 = arith.mulf %264, %272 : vector<2x64xf32>
    %281 = arith.addf %279, %280 : vector<2x64xf32>
    %282 = math.tanh %281 : vector<2x64xf32>
    %283 = arith.mulf %278, %282 : vector<2x64xf32>
    %284 = arith.truncf %283 : vector<2x64xf32> to vector<2x64xbf16>
    %c0_101 = arith.constant 0 : index
    %c0_102 = arith.constant 0 : index
    %c0_103 = arith.constant 0 : index
    %285 = vector.load %arg13[%c0_101, %c0_102, %c0_103] : memref<1x64x256xbf16, #tpu.memory_space<vmem>>, vector<1x64x256xbf16>
    %286 = vector.shape_cast %285 : vector<1x64x256xbf16> to vector<64x256xbf16>
    %cst_104 = arith.constant dense<0.000000e+00> : vector<2x256xf32>
    %287 = tpu.matmul %284, %286, %cst_104 {dimension_numbers = #tpu.dot_dimension_numbers<[1], [0], [0], [1], [0, 0, 1, 1], [], []>} : vector<2x64xbf16>, vector<64x256xbf16>, vector<2x256xf32> -> vector<2x256xf32>
    %288 = arith.truncf %229 : vector<2x64xf32> to vector<2x64xbf16>
    %c1_105 = arith.constant 1 : index
    %c0_106 = arith.constant 0 : index
    %c0_107 = arith.constant 0 : index
    %289 = vector.load %arg14[%c1_105, %c0_106, %c0_107] : memref<2x64x256xbf16, #tpu.memory_space<vmem>>, vector<1x64x256xbf16>
    %290 = vector.shape_cast %289 : vector<1x64x256xbf16> to vector<64x256xbf16>
    %cst_108 = arith.constant dense<0.000000e+00> : vector<2x256xf32>
    %291 = tpu.matmul %288, %290, %cst_108 {dimension_numbers = #tpu.dot_dimension_numbers<[1], [0], [0], [1], [0, 0, 1, 1], [], []>} : vector<2x64xbf16>, vector<64x256xbf16>, vector<2x256xf32> -> vector<2x256xf32>
    %292 = arith.addf %287, %291 : vector<2x256xf32>
    %293 = arith.addf %292, %16 : vector<2x256xf32>
    %294 = vector.extract_strided_slice %293 {offsets = [0, 0], sizes = [2, 64], strides = [1, 1]} : vector<2x256xf32> to vector<2x64xf32>
    %295 = arith.negf %294 : vector<2x64xf32>
    %296 = math.exp %295 : vector<2x64xf32>
    %cst_109 = arith.constant 1.000000e+00 : f32
    %297 = vector.broadcast %cst_109 : f32 to vector<2x64xf32>
    %298 = arith.addf %297, %296 : vector<2x64xf32>
    %299 = arith.divf %297, %298 : vector<2x64xf32>
    %300 = vector.extract_strided_slice %293 {offsets = [0, 64], sizes = [2, 64], strides = [1, 1]} : vector<2x256xf32> to vector<2x64xf32>
    %301 = arith.negf %300 : vector<2x64xf32>
    %302 = math.exp %301 : vector<2x64xf32>
    %cst_110 = arith.constant 1.000000e+00 : f32
    %303 = vector.broadcast %cst_110 : f32 to vector<2x64xf32>
    %304 = arith.addf %303, %302 : vector<2x64xf32>
    %305 = arith.divf %303, %304 : vector<2x64xf32>
    %306 = vector.extract_strided_slice %293 {offsets = [0, 128], sizes = [2, 64], strides = [1, 1]} : vector<2x256xf32> to vector<2x64xf32>
    %307 = math.tanh %306 : vector<2x64xf32>
    %308 = vector.extract_strided_slice %293 {offsets = [0, 192], sizes = [2, 64], strides = [1, 1]} : vector<2x256xf32> to vector<2x64xf32>
    %309 = arith.negf %308 : vector<2x64xf32>
    %310 = math.exp %309 : vector<2x64xf32>
    %cst_111 = arith.constant 1.000000e+00 : f32
    %311 = vector.broadcast %cst_111 : f32 to vector<2x64xf32>
    %312 = arith.addf %311, %310 : vector<2x64xf32>
    %313 = arith.divf %311, %312 : vector<2x64xf32>
    %314 = arith.mulf %305, %227 : vector<2x64xf32>
    %315 = arith.mulf %299, %307 : vector<2x64xf32>
    %316 = arith.addf %314, %315 : vector<2x64xf32>
    %317 = math.tanh %316 : vector<2x64xf32>
    %318 = arith.mulf %313, %317 : vector<2x64xf32>
    %319 = vector.extract_strided_slice %35 {offsets = [30, 0], sizes = [10, 32], strides = [1, 1]} : vector<80x32xf32> to vector<10x32xf32>
    %320 = vector.extract_strided_slice %38 {offsets = [30, 0], sizes = [10, 256], strides = [1, 1]} : vector<80x256xf32> to vector<10x256xf32>
    %321 = vector.extract_strided_slice %24 {offsets = [30, 0], sizes = [10, 1], strides = [1, 1]} : vector<80x1xf32> to vector<10x1xf32>
    %322 = vector.extract_strided_slice %45 {offsets = [6, 0], sizes = [2, 256], strides = [1, 1]} : vector<16x256xf32> to vector<2x256xf32>
    %cst_112 = arith.constant dense<0.000000e+00> : vector<2x32xf32>
    %323 = tpu.matmul %318, %3, %cst_112 {dimension_numbers = #tpu.dot_dimension_numbers<[1], [0], [0], [1], [0, 0, 1, 1], [], []>} : vector<2x64xf32>, vector<64x32xf32>, vector<2x32xf32> -> vector<2x32xf32>
    %cst_113 = arith.constant dense<0.000000e+00> : vector<10x32xf32>
    %324 = tpu.matmul %1, %323, %cst_113 {dimension_numbers = #tpu.dot_dimension_numbers<[1], [0], [0], [1], [0, 0, 1, 1], [], []>} : vector<10x2xf32>, vector<2x32xf32>, vector<10x32xf32> -> vector<10x32xf32>
    %325 = arith.addf %324, %319 : vector<10x32xf32>
    %326 = math.tanh %325 : vector<10x32xf32>
    %cst_114 = arith.constant dense<0.000000e+00> : vector<10x1xf32>
    %327 = tpu.matmul %326, %4, %cst_114 {dimension_numbers = #tpu.dot_dimension_numbers<[1], [0], [0], [1], [0, 0, 1, 1], [], []>} : vector<10x32xf32>, vector<32x1xf32>, vector<10x1xf32> -> vector<10x1xf32>
    %328 = arith.mulf %327, %321 : vector<10x1xf32>
    %329 = math.exp %328 : vector<10x1xf32>
    %cst_115 = arith.constant dense<0.000000e+00> : vector<10x1xf32>
    %330 = tpu.matmul %2, %329, %cst_115 {dimension_numbers = #tpu.dot_dimension_numbers<[1], [0], [0], [1], [0, 0, 1, 1], [], []>} : vector<10x10xf32>, vector<10x1xf32>, vector<10x1xf32> -> vector<10x1xf32>
    %331 = arith.divf %329, %330 : vector<10x1xf32>
    %c3_i32 = arith.constant 3 : i32
    %332 = vector.broadcast %c3_i32 : i32 to vector<10x8xi32>
    %333 = arith.cmpi eq, %46, %332 : vector<10x8xi32>
    %334 = vector.shape_cast %331 : vector<10x1xf32> to vector<10x1xf32>
    %335 = vector.broadcast %334 : vector<10x1xf32> to vector<10x8xf32>
    %336 = arith.select %333, %335, %247 : vector<10x8xi1>, vector<10x8xf32>
    %337 = vector.broadcast %331 : vector<10x1xf32> to vector<10x256xf32>
    %338 = arith.mulf %337, %320 : vector<10x256xf32>
    %339 = arith.truncf %338 : vector<10x256xf32> to vector<10x256xbf16>
    %cst_116 = arith.constant dense<0.000000e+00> : vector<2x256xf32>
    %340 = tpu.matmul %0, %339, %cst_116 {dimension_numbers = #tpu.dot_dimension_numbers<[1], [0], [0], [1], [0, 0, 1, 1], [], []>} : vector<2x10xbf16>, vector<10x256xbf16>, vector<2x256xf32> -> vector<2x256xf32>
    %341 = arith.addf %322, %340 : vector<2x256xf32>
    %342 = arith.truncf %283 : vector<2x64xf32> to vector<2x64xbf16>
    %c0_117 = arith.constant 0 : index
    %c0_118 = arith.constant 0 : index
    %c0_119 = arith.constant 0 : index
    %343 = vector.load %arg14[%c0_117, %c0_118, %c0_119] : memref<2x64x256xbf16, #tpu.memory_space<vmem>>, vector<1x64x256xbf16>
    %344 = vector.shape_cast %343 : vector<1x64x256xbf16> to vector<64x256xbf16>
    %cst_120 = arith.constant dense<0.000000e+00> : vector<2x256xf32>
    %345 = tpu.matmul %342, %344, %cst_120 {dimension_numbers = #tpu.dot_dimension_numbers<[1], [0], [0], [1], [0, 0, 1, 1], [], []>} : vector<2x64xbf16>, vector<64x256xbf16>, vector<2x256xf32> -> vector<2x256xf32>
    %346 = arith.addf %341, %345 : vector<2x256xf32>
    %347 = arith.addf %346, %12 : vector<2x256xf32>
    %348 = vector.extract_strided_slice %347 {offsets = [0, 0], sizes = [2, 64], strides = [1, 1]} : vector<2x256xf32> to vector<2x64xf32>
    %349 = arith.negf %348 : vector<2x64xf32>
    %350 = math.exp %349 : vector<2x64xf32>
    %cst_121 = arith.constant 1.000000e+00 : f32
    %351 = vector.broadcast %cst_121 : f32 to vector<2x64xf32>
    %352 = arith.addf %351, %350 : vector<2x64xf32>
    %353 = arith.divf %351, %352 : vector<2x64xf32>
    %354 = vector.extract_strided_slice %347 {offsets = [0, 64], sizes = [2, 64], strides = [1, 1]} : vector<2x256xf32> to vector<2x64xf32>
    %355 = arith.negf %354 : vector<2x64xf32>
    %356 = math.exp %355 : vector<2x64xf32>
    %cst_122 = arith.constant 1.000000e+00 : f32
    %357 = vector.broadcast %cst_122 : f32 to vector<2x64xf32>
    %358 = arith.addf %357, %356 : vector<2x64xf32>
    %359 = arith.divf %357, %358 : vector<2x64xf32>
    %360 = vector.extract_strided_slice %347 {offsets = [0, 128], sizes = [2, 64], strides = [1, 1]} : vector<2x256xf32> to vector<2x64xf32>
    %361 = math.tanh %360 : vector<2x64xf32>
    %362 = vector.extract_strided_slice %347 {offsets = [0, 192], sizes = [2, 64], strides = [1, 1]} : vector<2x256xf32> to vector<2x64xf32>
    %363 = arith.negf %362 : vector<2x64xf32>
    %364 = math.exp %363 : vector<2x64xf32>
    %cst_123 = arith.constant 1.000000e+00 : f32
    %365 = vector.broadcast %cst_123 : f32 to vector<2x64xf32>
    %366 = arith.addf %365, %364 : vector<2x64xf32>
    %367 = arith.divf %365, %366 : vector<2x64xf32>
    %368 = arith.mulf %359, %281 : vector<2x64xf32>
    %369 = arith.mulf %353, %361 : vector<2x64xf32>
    %370 = arith.addf %368, %369 : vector<2x64xf32>
    %371 = math.tanh %370 : vector<2x64xf32>
    %372 = arith.mulf %367, %371 : vector<2x64xf32>
    %373 = arith.truncf %372 : vector<2x64xf32> to vector<2x64xbf16>
    %c0_124 = arith.constant 0 : index
    %c0_125 = arith.constant 0 : index
    %c0_126 = arith.constant 0 : index
    %374 = vector.load %arg13[%c0_124, %c0_125, %c0_126] : memref<1x64x256xbf16, #tpu.memory_space<vmem>>, vector<1x64x256xbf16>
    %375 = vector.shape_cast %374 : vector<1x64x256xbf16> to vector<64x256xbf16>
    %cst_127 = arith.constant dense<0.000000e+00> : vector<2x256xf32>
    %376 = tpu.matmul %373, %375, %cst_127 {dimension_numbers = #tpu.dot_dimension_numbers<[1], [0], [0], [1], [0, 0, 1, 1], [], []>} : vector<2x64xbf16>, vector<64x256xbf16>, vector<2x256xf32> -> vector<2x256xf32>
    %377 = arith.truncf %318 : vector<2x64xf32> to vector<2x64xbf16>
    %c1_128 = arith.constant 1 : index
    %c0_129 = arith.constant 0 : index
    %c0_130 = arith.constant 0 : index
    %378 = vector.load %arg14[%c1_128, %c0_129, %c0_130] : memref<2x64x256xbf16, #tpu.memory_space<vmem>>, vector<1x64x256xbf16>
    %379 = vector.shape_cast %378 : vector<1x64x256xbf16> to vector<64x256xbf16>
    %cst_131 = arith.constant dense<0.000000e+00> : vector<2x256xf32>
    %380 = tpu.matmul %377, %379, %cst_131 {dimension_numbers = #tpu.dot_dimension_numbers<[1], [0], [0], [1], [0, 0, 1, 1], [], []>} : vector<2x64xbf16>, vector<64x256xbf16>, vector<2x256xf32> -> vector<2x256xf32>
    %381 = arith.addf %376, %380 : vector<2x256xf32>
    %382 = arith.addf %381, %16 : vector<2x256xf32>
    %383 = vector.extract_strided_slice %382 {offsets = [0, 0], sizes = [2, 64], strides = [1, 1]} : vector<2x256xf32> to vector<2x64xf32>
    %384 = arith.negf %383 : vector<2x64xf32>
    %385 = math.exp %384 : vector<2x64xf32>
    %cst_132 = arith.constant 1.000000e+00 : f32
    %386 = vector.broadcast %cst_132 : f32 to vector<2x64xf32>
    %387 = arith.addf %386, %385 : vector<2x64xf32>
    %388 = arith.divf %386, %387 : vector<2x64xf32>
    %389 = vector.extract_strided_slice %382 {offsets = [0, 64], sizes = [2, 64], strides = [1, 1]} : vector<2x256xf32> to vector<2x64xf32>
    %390 = arith.negf %389 : vector<2x64xf32>
    %391 = math.exp %390 : vector<2x64xf32>
    %cst_133 = arith.constant 1.000000e+00 : f32
    %392 = vector.broadcast %cst_133 : f32 to vector<2x64xf32>
    %393 = arith.addf %392, %391 : vector<2x64xf32>
    %394 = arith.divf %392, %393 : vector<2x64xf32>
    %395 = vector.extract_strided_slice %382 {offsets = [0, 128], sizes = [2, 64], strides = [1, 1]} : vector<2x256xf32> to vector<2x64xf32>
    %396 = math.tanh %395 : vector<2x64xf32>
    %397 = vector.extract_strided_slice %382 {offsets = [0, 192], sizes = [2, 64], strides = [1, 1]} : vector<2x256xf32> to vector<2x64xf32>
    %398 = arith.negf %397 : vector<2x64xf32>
    %399 = math.exp %398 : vector<2x64xf32>
    %cst_134 = arith.constant 1.000000e+00 : f32
    %400 = vector.broadcast %cst_134 : f32 to vector<2x64xf32>
    %401 = arith.addf %400, %399 : vector<2x64xf32>
    %402 = arith.divf %400, %401 : vector<2x64xf32>
    %403 = arith.mulf %394, %316 : vector<2x64xf32>
    %404 = arith.mulf %388, %396 : vector<2x64xf32>
    %405 = arith.addf %403, %404 : vector<2x64xf32>
    %406 = math.tanh %405 : vector<2x64xf32>
    %407 = arith.mulf %402, %406 : vector<2x64xf32>
    %408 = vector.extract_strided_slice %35 {offsets = [40, 0], sizes = [10, 32], strides = [1, 1]} : vector<80x32xf32> to vector<10x32xf32>
    %409 = vector.extract_strided_slice %38 {offsets = [40, 0], sizes = [10, 256], strides = [1, 1]} : vector<80x256xf32> to vector<10x256xf32>
    %410 = vector.extract_strided_slice %24 {offsets = [40, 0], sizes = [10, 1], strides = [1, 1]} : vector<80x1xf32> to vector<10x1xf32>
    %411 = vector.extract_strided_slice %45 {offsets = [8, 0], sizes = [2, 256], strides = [1, 1]} : vector<16x256xf32> to vector<2x256xf32>
    %cst_135 = arith.constant dense<0.000000e+00> : vector<2x32xf32>
    %412 = tpu.matmul %407, %3, %cst_135 {dimension_numbers = #tpu.dot_dimension_numbers<[1], [0], [0], [1], [0, 0, 1, 1], [], []>} : vector<2x64xf32>, vector<64x32xf32>, vector<2x32xf32> -> vector<2x32xf32>
    %cst_136 = arith.constant dense<0.000000e+00> : vector<10x32xf32>
    %413 = tpu.matmul %1, %412, %cst_136 {dimension_numbers = #tpu.dot_dimension_numbers<[1], [0], [0], [1], [0, 0, 1, 1], [], []>} : vector<10x2xf32>, vector<2x32xf32>, vector<10x32xf32> -> vector<10x32xf32>
    %414 = arith.addf %413, %408 : vector<10x32xf32>
    %415 = math.tanh %414 : vector<10x32xf32>
    %cst_137 = arith.constant dense<0.000000e+00> : vector<10x1xf32>
    %416 = tpu.matmul %415, %4, %cst_137 {dimension_numbers = #tpu.dot_dimension_numbers<[1], [0], [0], [1], [0, 0, 1, 1], [], []>} : vector<10x32xf32>, vector<32x1xf32>, vector<10x1xf32> -> vector<10x1xf32>
    %417 = arith.mulf %416, %410 : vector<10x1xf32>
    %418 = math.exp %417 : vector<10x1xf32>
    %cst_138 = arith.constant dense<0.000000e+00> : vector<10x1xf32>
    %419 = tpu.matmul %2, %418, %cst_138 {dimension_numbers = #tpu.dot_dimension_numbers<[1], [0], [0], [1], [0, 0, 1, 1], [], []>} : vector<10x10xf32>, vector<10x1xf32>, vector<10x1xf32> -> vector<10x1xf32>
    %420 = arith.divf %418, %419 : vector<10x1xf32>
    %c4_i32 = arith.constant 4 : i32
    %421 = vector.broadcast %c4_i32 : i32 to vector<10x8xi32>
    %422 = arith.cmpi eq, %46, %421 : vector<10x8xi32>
    %423 = vector.shape_cast %420 : vector<10x1xf32> to vector<10x1xf32>
    %424 = vector.broadcast %423 : vector<10x1xf32> to vector<10x8xf32>
    %425 = arith.select %422, %424, %336 : vector<10x8xi1>, vector<10x8xf32>
    %426 = vector.broadcast %420 : vector<10x1xf32> to vector<10x256xf32>
    %427 = arith.mulf %426, %409 : vector<10x256xf32>
    %428 = arith.truncf %427 : vector<10x256xf32> to vector<10x256xbf16>
    %cst_139 = arith.constant dense<0.000000e+00> : vector<2x256xf32>
    %429 = tpu.matmul %0, %428, %cst_139 {dimension_numbers = #tpu.dot_dimension_numbers<[1], [0], [0], [1], [0, 0, 1, 1], [], []>} : vector<2x10xbf16>, vector<10x256xbf16>, vector<2x256xf32> -> vector<2x256xf32>
    %430 = arith.addf %411, %429 : vector<2x256xf32>
    %431 = arith.truncf %372 : vector<2x64xf32> to vector<2x64xbf16>
    %c0_140 = arith.constant 0 : index
    %c0_141 = arith.constant 0 : index
    %c0_142 = arith.constant 0 : index
    %432 = vector.load %arg14[%c0_140, %c0_141, %c0_142] : memref<2x64x256xbf16, #tpu.memory_space<vmem>>, vector<1x64x256xbf16>
    %433 = vector.shape_cast %432 : vector<1x64x256xbf16> to vector<64x256xbf16>
    %cst_143 = arith.constant dense<0.000000e+00> : vector<2x256xf32>
    %434 = tpu.matmul %431, %433, %cst_143 {dimension_numbers = #tpu.dot_dimension_numbers<[1], [0], [0], [1], [0, 0, 1, 1], [], []>} : vector<2x64xbf16>, vector<64x256xbf16>, vector<2x256xf32> -> vector<2x256xf32>
    %435 = arith.addf %430, %434 : vector<2x256xf32>
    %436 = arith.addf %435, %12 : vector<2x256xf32>
    %437 = vector.extract_strided_slice %436 {offsets = [0, 0], sizes = [2, 64], strides = [1, 1]} : vector<2x256xf32> to vector<2x64xf32>
    %438 = arith.negf %437 : vector<2x64xf32>
    %439 = math.exp %438 : vector<2x64xf32>
    %cst_144 = arith.constant 1.000000e+00 : f32
    %440 = vector.broadcast %cst_144 : f32 to vector<2x64xf32>
    %441 = arith.addf %440, %439 : vector<2x64xf32>
    %442 = arith.divf %440, %441 : vector<2x64xf32>
    %443 = vector.extract_strided_slice %436 {offsets = [0, 64], sizes = [2, 64], strides = [1, 1]} : vector<2x256xf32> to vector<2x64xf32>
    %444 = arith.negf %443 : vector<2x64xf32>
    %445 = math.exp %444 : vector<2x64xf32>
    %cst_145 = arith.constant 1.000000e+00 : f32
    %446 = vector.broadcast %cst_145 : f32 to vector<2x64xf32>
    %447 = arith.addf %446, %445 : vector<2x64xf32>
    %448 = arith.divf %446, %447 : vector<2x64xf32>
    %449 = vector.extract_strided_slice %436 {offsets = [0, 128], sizes = [2, 64], strides = [1, 1]} : vector<2x256xf32> to vector<2x64xf32>
    %450 = math.tanh %449 : vector<2x64xf32>
    %451 = vector.extract_strided_slice %436 {offsets = [0, 192], sizes = [2, 64], strides = [1, 1]} : vector<2x256xf32> to vector<2x64xf32>
    %452 = arith.negf %451 : vector<2x64xf32>
    %453 = math.exp %452 : vector<2x64xf32>
    %cst_146 = arith.constant 1.000000e+00 : f32
    %454 = vector.broadcast %cst_146 : f32 to vector<2x64xf32>
    %455 = arith.addf %454, %453 : vector<2x64xf32>
    %456 = arith.divf %454, %455 : vector<2x64xf32>
    %457 = arith.mulf %448, %370 : vector<2x64xf32>
    %458 = arith.mulf %442, %450 : vector<2x64xf32>
    %459 = arith.addf %457, %458 : vector<2x64xf32>
    %460 = math.tanh %459 : vector<2x64xf32>
    %461 = arith.mulf %456, %460 : vector<2x64xf32>
    %462 = arith.truncf %461 : vector<2x64xf32> to vector<2x64xbf16>
    %c0_147 = arith.constant 0 : index
    %c0_148 = arith.constant 0 : index
    %c0_149 = arith.constant 0 : index
    %463 = vector.load %arg13[%c0_147, %c0_148, %c0_149] : memref<1x64x256xbf16, #tpu.memory_space<vmem>>, vector<1x64x256xbf16>
    %464 = vector.shape_cast %463 : vector<1x64x256xbf16> to vector<64x256xbf16>
    %cst_150 = arith.constant dense<0.000000e+00> : vector<2x256xf32>
    %465 = tpu.matmul %462, %464, %cst_150 {dimension_numbers = #tpu.dot_dimension_numbers<[1], [0], [0], [1], [0, 0, 1, 1], [], []>} : vector<2x64xbf16>, vector<64x256xbf16>, vector<2x256xf32> -> vector<2x256xf32>
    %466 = arith.truncf %407 : vector<2x64xf32> to vector<2x64xbf16>
    %c1_151 = arith.constant 1 : index
    %c0_152 = arith.constant 0 : index
    %c0_153 = arith.constant 0 : index
    %467 = vector.load %arg14[%c1_151, %c0_152, %c0_153] : memref<2x64x256xbf16, #tpu.memory_space<vmem>>, vector<1x64x256xbf16>
    %468 = vector.shape_cast %467 : vector<1x64x256xbf16> to vector<64x256xbf16>
    %cst_154 = arith.constant dense<0.000000e+00> : vector<2x256xf32>
    %469 = tpu.matmul %466, %468, %cst_154 {dimension_numbers = #tpu.dot_dimension_numbers<[1], [0], [0], [1], [0, 0, 1, 1], [], []>} : vector<2x64xbf16>, vector<64x256xbf16>, vector<2x256xf32> -> vector<2x256xf32>
    %470 = arith.addf %465, %469 : vector<2x256xf32>
    %471 = arith.addf %470, %16 : vector<2x256xf32>
    %472 = vector.extract_strided_slice %471 {offsets = [0, 0], sizes = [2, 64], strides = [1, 1]} : vector<2x256xf32> to vector<2x64xf32>
    %473 = arith.negf %472 : vector<2x64xf32>
    %474 = math.exp %473 : vector<2x64xf32>
    %cst_155 = arith.constant 1.000000e+00 : f32
    %475 = vector.broadcast %cst_155 : f32 to vector<2x64xf32>
    %476 = arith.addf %475, %474 : vector<2x64xf32>
    %477 = arith.divf %475, %476 : vector<2x64xf32>
    %478 = vector.extract_strided_slice %471 {offsets = [0, 64], sizes = [2, 64], strides = [1, 1]} : vector<2x256xf32> to vector<2x64xf32>
    %479 = arith.negf %478 : vector<2x64xf32>
    %480 = math.exp %479 : vector<2x64xf32>
    %cst_156 = arith.constant 1.000000e+00 : f32
    %481 = vector.broadcast %cst_156 : f32 to vector<2x64xf32>
    %482 = arith.addf %481, %480 : vector<2x64xf32>
    %483 = arith.divf %481, %482 : vector<2x64xf32>
    %484 = vector.extract_strided_slice %471 {offsets = [0, 128], sizes = [2, 64], strides = [1, 1]} : vector<2x256xf32> to vector<2x64xf32>
    %485 = math.tanh %484 : vector<2x64xf32>
    %486 = vector.extract_strided_slice %471 {offsets = [0, 192], sizes = [2, 64], strides = [1, 1]} : vector<2x256xf32> to vector<2x64xf32>
    %487 = arith.negf %486 : vector<2x64xf32>
    %488 = math.exp %487 : vector<2x64xf32>
    %cst_157 = arith.constant 1.000000e+00 : f32
    %489 = vector.broadcast %cst_157 : f32 to vector<2x64xf32>
    %490 = arith.addf %489, %488 : vector<2x64xf32>
    %491 = arith.divf %489, %490 : vector<2x64xf32>
    %492 = arith.mulf %483, %405 : vector<2x64xf32>
    %493 = arith.mulf %477, %485 : vector<2x64xf32>
    %494 = arith.addf %492, %493 : vector<2x64xf32>
    %495 = math.tanh %494 : vector<2x64xf32>
    %496 = arith.mulf %491, %495 : vector<2x64xf32>
    %497 = vector.extract_strided_slice %35 {offsets = [50, 0], sizes = [10, 32], strides = [1, 1]} : vector<80x32xf32> to vector<10x32xf32>
    %498 = vector.extract_strided_slice %38 {offsets = [50, 0], sizes = [10, 256], strides = [1, 1]} : vector<80x256xf32> to vector<10x256xf32>
    %499 = vector.extract_strided_slice %24 {offsets = [50, 0], sizes = [10, 1], strides = [1, 1]} : vector<80x1xf32> to vector<10x1xf32>
    %500 = vector.extract_strided_slice %45 {offsets = [10, 0], sizes = [2, 256], strides = [1, 1]} : vector<16x256xf32> to vector<2x256xf32>
    %cst_158 = arith.constant dense<0.000000e+00> : vector<2x32xf32>
    %501 = tpu.matmul %496, %3, %cst_158 {dimension_numbers = #tpu.dot_dimension_numbers<[1], [0], [0], [1], [0, 0, 1, 1], [], []>} : vector<2x64xf32>, vector<64x32xf32>, vector<2x32xf32> -> vector<2x32xf32>
    %cst_159 = arith.constant dense<0.000000e+00> : vector<10x32xf32>
    %502 = tpu.matmul %1, %501, %cst_159 {dimension_numbers = #tpu.dot_dimension_numbers<[1], [0], [0], [1], [0, 0, 1, 1], [], []>} : vector<10x2xf32>, vector<2x32xf32>, vector<10x32xf32> -> vector<10x32xf32>
    %503 = arith.addf %502, %497 : vector<10x32xf32>
    %504 = math.tanh %503 : vector<10x32xf32>
    %cst_160 = arith.constant dense<0.000000e+00> : vector<10x1xf32>
    %505 = tpu.matmul %504, %4, %cst_160 {dimension_numbers = #tpu.dot_dimension_numbers<[1], [0], [0], [1], [0, 0, 1, 1], [], []>} : vector<10x32xf32>, vector<32x1xf32>, vector<10x1xf32> -> vector<10x1xf32>
    %506 = arith.mulf %505, %499 : vector<10x1xf32>
    %507 = math.exp %506 : vector<10x1xf32>
    %cst_161 = arith.constant dense<0.000000e+00> : vector<10x1xf32>
    %508 = tpu.matmul %2, %507, %cst_161 {dimension_numbers = #tpu.dot_dimension_numbers<[1], [0], [0], [1], [0, 0, 1, 1], [], []>} : vector<10x10xf32>, vector<10x1xf32>, vector<10x1xf32> -> vector<10x1xf32>
    %509 = arith.divf %507, %508 : vector<10x1xf32>
    %c5_i32 = arith.constant 5 : i32
    %510 = vector.broadcast %c5_i32 : i32 to vector<10x8xi32>
    %511 = arith.cmpi eq, %46, %510 : vector<10x8xi32>
    %512 = vector.shape_cast %509 : vector<10x1xf32> to vector<10x1xf32>
    %513 = vector.broadcast %512 : vector<10x1xf32> to vector<10x8xf32>
    %514 = arith.select %511, %513, %425 : vector<10x8xi1>, vector<10x8xf32>
    %515 = vector.broadcast %509 : vector<10x1xf32> to vector<10x256xf32>
    %516 = arith.mulf %515, %498 : vector<10x256xf32>
    %517 = arith.truncf %516 : vector<10x256xf32> to vector<10x256xbf16>
    %cst_162 = arith.constant dense<0.000000e+00> : vector<2x256xf32>
    %518 = tpu.matmul %0, %517, %cst_162 {dimension_numbers = #tpu.dot_dimension_numbers<[1], [0], [0], [1], [0, 0, 1, 1], [], []>} : vector<2x10xbf16>, vector<10x256xbf16>, vector<2x256xf32> -> vector<2x256xf32>
    %519 = arith.addf %500, %518 : vector<2x256xf32>
    %520 = arith.truncf %461 : vector<2x64xf32> to vector<2x64xbf16>
    %c0_163 = arith.constant 0 : index
    %c0_164 = arith.constant 0 : index
    %c0_165 = arith.constant 0 : index
    %521 = vector.load %arg14[%c0_163, %c0_164, %c0_165] : memref<2x64x256xbf16, #tpu.memory_space<vmem>>, vector<1x64x256xbf16>
    %522 = vector.shape_cast %521 : vector<1x64x256xbf16> to vector<64x256xbf16>
    %cst_166 = arith.constant dense<0.000000e+00> : vector<2x256xf32>
    %523 = tpu.matmul %520, %522, %cst_166 {dimension_numbers = #tpu.dot_dimension_numbers<[1], [0], [0], [1], [0, 0, 1, 1], [], []>} : vector<2x64xbf16>, vector<64x256xbf16>, vector<2x256xf32> -> vector<2x256xf32>
    %524 = arith.addf %519, %523 : vector<2x256xf32>
    %525 = arith.addf %524, %12 : vector<2x256xf32>
    %526 = vector.extract_strided_slice %525 {offsets = [0, 0], sizes = [2, 64], strides = [1, 1]} : vector<2x256xf32> to vector<2x64xf32>
    %527 = arith.negf %526 : vector<2x64xf32>
    %528 = math.exp %527 : vector<2x64xf32>
    %cst_167 = arith.constant 1.000000e+00 : f32
    %529 = vector.broadcast %cst_167 : f32 to vector<2x64xf32>
    %530 = arith.addf %529, %528 : vector<2x64xf32>
    %531 = arith.divf %529, %530 : vector<2x64xf32>
    %532 = vector.extract_strided_slice %525 {offsets = [0, 64], sizes = [2, 64], strides = [1, 1]} : vector<2x256xf32> to vector<2x64xf32>
    %533 = arith.negf %532 : vector<2x64xf32>
    %534 = math.exp %533 : vector<2x64xf32>
    %cst_168 = arith.constant 1.000000e+00 : f32
    %535 = vector.broadcast %cst_168 : f32 to vector<2x64xf32>
    %536 = arith.addf %535, %534 : vector<2x64xf32>
    %537 = arith.divf %535, %536 : vector<2x64xf32>
    %538 = vector.extract_strided_slice %525 {offsets = [0, 128], sizes = [2, 64], strides = [1, 1]} : vector<2x256xf32> to vector<2x64xf32>
    %539 = math.tanh %538 : vector<2x64xf32>
    %540 = vector.extract_strided_slice %525 {offsets = [0, 192], sizes = [2, 64], strides = [1, 1]} : vector<2x256xf32> to vector<2x64xf32>
    %541 = arith.negf %540 : vector<2x64xf32>
    %542 = math.exp %541 : vector<2x64xf32>
    %cst_169 = arith.constant 1.000000e+00 : f32
    %543 = vector.broadcast %cst_169 : f32 to vector<2x64xf32>
    %544 = arith.addf %543, %542 : vector<2x64xf32>
    %545 = arith.divf %543, %544 : vector<2x64xf32>
    %546 = arith.mulf %537, %459 : vector<2x64xf32>
    %547 = arith.mulf %531, %539 : vector<2x64xf32>
    %548 = arith.addf %546, %547 : vector<2x64xf32>
    %549 = math.tanh %548 : vector<2x64xf32>
    %550 = arith.mulf %545, %549 : vector<2x64xf32>
    %551 = arith.truncf %550 : vector<2x64xf32> to vector<2x64xbf16>
    %c0_170 = arith.constant 0 : index
    %c0_171 = arith.constant 0 : index
    %c0_172 = arith.constant 0 : index
    %552 = vector.load %arg13[%c0_170, %c0_171, %c0_172] : memref<1x64x256xbf16, #tpu.memory_space<vmem>>, vector<1x64x256xbf16>
    %553 = vector.shape_cast %552 : vector<1x64x256xbf16> to vector<64x256xbf16>
    %cst_173 = arith.constant dense<0.000000e+00> : vector<2x256xf32>
    %554 = tpu.matmul %551, %553, %cst_173 {dimension_numbers = #tpu.dot_dimension_numbers<[1], [0], [0], [1], [0, 0, 1, 1], [], []>} : vector<2x64xbf16>, vector<64x256xbf16>, vector<2x256xf32> -> vector<2x256xf32>
    %555 = arith.truncf %496 : vector<2x64xf32> to vector<2x64xbf16>
    %c1_174 = arith.constant 1 : index
    %c0_175 = arith.constant 0 : index
    %c0_176 = arith.constant 0 : index
    %556 = vector.load %arg14[%c1_174, %c0_175, %c0_176] : memref<2x64x256xbf16, #tpu.memory_space<vmem>>, vector<1x64x256xbf16>
    %557 = vector.shape_cast %556 : vector<1x64x256xbf16> to vector<64x256xbf16>
    %cst_177 = arith.constant dense<0.000000e+00> : vector<2x256xf32>
    %558 = tpu.matmul %555, %557, %cst_177 {dimension_numbers = #tpu.dot_dimension_numbers<[1], [0], [0], [1], [0, 0, 1, 1], [], []>} : vector<2x64xbf16>, vector<64x256xbf16>, vector<2x256xf32> -> vector<2x256xf32>
    %559 = arith.addf %554, %558 : vector<2x256xf32>
    %560 = arith.addf %559, %16 : vector<2x256xf32>
    %561 = vector.extract_strided_slice %560 {offsets = [0, 0], sizes = [2, 64], strides = [1, 1]} : vector<2x256xf32> to vector<2x64xf32>
    %562 = arith.negf %561 : vector<2x64xf32>
    %563 = math.exp %562 : vector<2x64xf32>
    %cst_178 = arith.constant 1.000000e+00 : f32
    %564 = vector.broadcast %cst_178 : f32 to vector<2x64xf32>
    %565 = arith.addf %564, %563 : vector<2x64xf32>
    %566 = arith.divf %564, %565 : vector<2x64xf32>
    %567 = vector.extract_strided_slice %560 {offsets = [0, 64], sizes = [2, 64], strides = [1, 1]} : vector<2x256xf32> to vector<2x64xf32>
    %568 = arith.negf %567 : vector<2x64xf32>
    %569 = math.exp %568 : vector<2x64xf32>
    %cst_179 = arith.constant 1.000000e+00 : f32
    %570 = vector.broadcast %cst_179 : f32 to vector<2x64xf32>
    %571 = arith.addf %570, %569 : vector<2x64xf32>
    %572 = arith.divf %570, %571 : vector<2x64xf32>
    %573 = vector.extract_strided_slice %560 {offsets = [0, 128], sizes = [2, 64], strides = [1, 1]} : vector<2x256xf32> to vector<2x64xf32>
    %574 = math.tanh %573 : vector<2x64xf32>
    %575 = vector.extract_strided_slice %560 {offsets = [0, 192], sizes = [2, 64], strides = [1, 1]} : vector<2x256xf32> to vector<2x64xf32>
    %576 = arith.negf %575 : vector<2x64xf32>
    %577 = math.exp %576 : vector<2x64xf32>
    %cst_180 = arith.constant 1.000000e+00 : f32
    %578 = vector.broadcast %cst_180 : f32 to vector<2x64xf32>
    %579 = arith.addf %578, %577 : vector<2x64xf32>
    %580 = arith.divf %578, %579 : vector<2x64xf32>
    %581 = arith.mulf %572, %494 : vector<2x64xf32>
    %582 = arith.mulf %566, %574 : vector<2x64xf32>
    %583 = arith.addf %581, %582 : vector<2x64xf32>
    %584 = math.tanh %583 : vector<2x64xf32>
    %585 = arith.mulf %580, %584 : vector<2x64xf32>
    %586 = vector.extract_strided_slice %35 {offsets = [60, 0], sizes = [10, 32], strides = [1, 1]} : vector<80x32xf32> to vector<10x32xf32>
    %587 = vector.extract_strided_slice %38 {offsets = [60, 0], sizes = [10, 256], strides = [1, 1]} : vector<80x256xf32> to vector<10x256xf32>
    %588 = vector.extract_strided_slice %24 {offsets = [60, 0], sizes = [10, 1], strides = [1, 1]} : vector<80x1xf32> to vector<10x1xf32>
    %589 = vector.extract_strided_slice %45 {offsets = [12, 0], sizes = [2, 256], strides = [1, 1]} : vector<16x256xf32> to vector<2x256xf32>
    %cst_181 = arith.constant dense<0.000000e+00> : vector<2x32xf32>
    %590 = tpu.matmul %585, %3, %cst_181 {dimension_numbers = #tpu.dot_dimension_numbers<[1], [0], [0], [1], [0, 0, 1, 1], [], []>} : vector<2x64xf32>, vector<64x32xf32>, vector<2x32xf32> -> vector<2x32xf32>
    %cst_182 = arith.constant dense<0.000000e+00> : vector<10x32xf32>
    %591 = tpu.matmul %1, %590, %cst_182 {dimension_numbers = #tpu.dot_dimension_numbers<[1], [0], [0], [1], [0, 0, 1, 1], [], []>} : vector<10x2xf32>, vector<2x32xf32>, vector<10x32xf32> -> vector<10x32xf32>
    %592 = arith.addf %591, %586 : vector<10x32xf32>
    %593 = math.tanh %592 : vector<10x32xf32>
    %cst_183 = arith.constant dense<0.000000e+00> : vector<10x1xf32>
    %594 = tpu.matmul %593, %4, %cst_183 {dimension_numbers = #tpu.dot_dimension_numbers<[1], [0], [0], [1], [0, 0, 1, 1], [], []>} : vector<10x32xf32>, vector<32x1xf32>, vector<10x1xf32> -> vector<10x1xf32>
    %595 = arith.mulf %594, %588 : vector<10x1xf32>
    %596 = math.exp %595 : vector<10x1xf32>
    %cst_184 = arith.constant dense<0.000000e+00> : vector<10x1xf32>
    %597 = tpu.matmul %2, %596, %cst_184 {dimension_numbers = #tpu.dot_dimension_numbers<[1], [0], [0], [1], [0, 0, 1, 1], [], []>} : vector<10x10xf32>, vector<10x1xf32>, vector<10x1xf32> -> vector<10x1xf32>
    %598 = arith.divf %596, %597 : vector<10x1xf32>
    %c6_i32 = arith.constant 6 : i32
    %599 = vector.broadcast %c6_i32 : i32 to vector<10x8xi32>
    %600 = arith.cmpi eq, %46, %599 : vector<10x8xi32>
    %601 = vector.shape_cast %598 : vector<10x1xf32> to vector<10x1xf32>
    %602 = vector.broadcast %601 : vector<10x1xf32> to vector<10x8xf32>
    %603 = arith.select %600, %602, %514 : vector<10x8xi1>, vector<10x8xf32>
    %604 = vector.broadcast %598 : vector<10x1xf32> to vector<10x256xf32>
    %605 = arith.mulf %604, %587 : vector<10x256xf32>
    %606 = arith.truncf %605 : vector<10x256xf32> to vector<10x256xbf16>
    %cst_185 = arith.constant dense<0.000000e+00> : vector<2x256xf32>
    %607 = tpu.matmul %0, %606, %cst_185 {dimension_numbers = #tpu.dot_dimension_numbers<[1], [0], [0], [1], [0, 0, 1, 1], [], []>} : vector<2x10xbf16>, vector<10x256xbf16>, vector<2x256xf32> -> vector<2x256xf32>
    %608 = arith.addf %589, %607 : vector<2x256xf32>
    %609 = arith.truncf %550 : vector<2x64xf32> to vector<2x64xbf16>
    %c0_186 = arith.constant 0 : index
    %c0_187 = arith.constant 0 : index
    %c0_188 = arith.constant 0 : index
    %610 = vector.load %arg14[%c0_186, %c0_187, %c0_188] : memref<2x64x256xbf16, #tpu.memory_space<vmem>>, vector<1x64x256xbf16>
    %611 = vector.shape_cast %610 : vector<1x64x256xbf16> to vector<64x256xbf16>
    %cst_189 = arith.constant dense<0.000000e+00> : vector<2x256xf32>
    %612 = tpu.matmul %609, %611, %cst_189 {dimension_numbers = #tpu.dot_dimension_numbers<[1], [0], [0], [1], [0, 0, 1, 1], [], []>} : vector<2x64xbf16>, vector<64x256xbf16>, vector<2x256xf32> -> vector<2x256xf32>
    %613 = arith.addf %608, %612 : vector<2x256xf32>
    %614 = arith.addf %613, %12 : vector<2x256xf32>
    %615 = vector.extract_strided_slice %614 {offsets = [0, 0], sizes = [2, 64], strides = [1, 1]} : vector<2x256xf32> to vector<2x64xf32>
    %616 = arith.negf %615 : vector<2x64xf32>
    %617 = math.exp %616 : vector<2x64xf32>
    %cst_190 = arith.constant 1.000000e+00 : f32
    %618 = vector.broadcast %cst_190 : f32 to vector<2x64xf32>
    %619 = arith.addf %618, %617 : vector<2x64xf32>
    %620 = arith.divf %618, %619 : vector<2x64xf32>
    %621 = vector.extract_strided_slice %614 {offsets = [0, 64], sizes = [2, 64], strides = [1, 1]} : vector<2x256xf32> to vector<2x64xf32>
    %622 = arith.negf %621 : vector<2x64xf32>
    %623 = math.exp %622 : vector<2x64xf32>
    %cst_191 = arith.constant 1.000000e+00 : f32
    %624 = vector.broadcast %cst_191 : f32 to vector<2x64xf32>
    %625 = arith.addf %624, %623 : vector<2x64xf32>
    %626 = arith.divf %624, %625 : vector<2x64xf32>
    %627 = vector.extract_strided_slice %614 {offsets = [0, 128], sizes = [2, 64], strides = [1, 1]} : vector<2x256xf32> to vector<2x64xf32>
    %628 = math.tanh %627 : vector<2x64xf32>
    %629 = vector.extract_strided_slice %614 {offsets = [0, 192], sizes = [2, 64], strides = [1, 1]} : vector<2x256xf32> to vector<2x64xf32>
    %630 = arith.negf %629 : vector<2x64xf32>
    %631 = math.exp %630 : vector<2x64xf32>
    %cst_192 = arith.constant 1.000000e+00 : f32
    %632 = vector.broadcast %cst_192 : f32 to vector<2x64xf32>
    %633 = arith.addf %632, %631 : vector<2x64xf32>
    %634 = arith.divf %632, %633 : vector<2x64xf32>
    %635 = arith.mulf %626, %548 : vector<2x64xf32>
    %636 = arith.mulf %620, %628 : vector<2x64xf32>
    %637 = arith.addf %635, %636 : vector<2x64xf32>
    %638 = math.tanh %637 : vector<2x64xf32>
    %639 = arith.mulf %634, %638 : vector<2x64xf32>
    %640 = arith.truncf %639 : vector<2x64xf32> to vector<2x64xbf16>
    %c0_193 = arith.constant 0 : index
    %c0_194 = arith.constant 0 : index
    %c0_195 = arith.constant 0 : index
    %641 = vector.load %arg13[%c0_193, %c0_194, %c0_195] : memref<1x64x256xbf16, #tpu.memory_space<vmem>>, vector<1x64x256xbf16>
    %642 = vector.shape_cast %641 : vector<1x64x256xbf16> to vector<64x256xbf16>
    %cst_196 = arith.constant dense<0.000000e+00> : vector<2x256xf32>
    %643 = tpu.matmul %640, %642, %cst_196 {dimension_numbers = #tpu.dot_dimension_numbers<[1], [0], [0], [1], [0, 0, 1, 1], [], []>} : vector<2x64xbf16>, vector<64x256xbf16>, vector<2x256xf32> -> vector<2x256xf32>
    %644 = arith.truncf %585 : vector<2x64xf32> to vector<2x64xbf16>
    %c1_197 = arith.constant 1 : index
    %c0_198 = arith.constant 0 : index
    %c0_199 = arith.constant 0 : index
    %645 = vector.load %arg14[%c1_197, %c0_198, %c0_199] : memref<2x64x256xbf16, #tpu.memory_space<vmem>>, vector<1x64x256xbf16>
    %646 = vector.shape_cast %645 : vector<1x64x256xbf16> to vector<64x256xbf16>
    %cst_200 = arith.constant dense<0.000000e+00> : vector<2x256xf32>
    %647 = tpu.matmul %644, %646, %cst_200 {dimension_numbers = #tpu.dot_dimension_numbers<[1], [0], [0], [1], [0, 0, 1, 1], [], []>} : vector<2x64xbf16>, vector<64x256xbf16>, vector<2x256xf32> -> vector<2x256xf32>
    %648 = arith.addf %643, %647 : vector<2x256xf32>
    %649 = arith.addf %648, %16 : vector<2x256xf32>
    %650 = vector.extract_strided_slice %649 {offsets = [0, 0], sizes = [2, 64], strides = [1, 1]} : vector<2x256xf32> to vector<2x64xf32>
    %651 = arith.negf %650 : vector<2x64xf32>
    %652 = math.exp %651 : vector<2x64xf32>
    %cst_201 = arith.constant 1.000000e+00 : f32
    %653 = vector.broadcast %cst_201 : f32 to vector<2x64xf32>
    %654 = arith.addf %653, %652 : vector<2x64xf32>
    %655 = arith.divf %653, %654 : vector<2x64xf32>
    %656 = vector.extract_strided_slice %649 {offsets = [0, 64], sizes = [2, 64], strides = [1, 1]} : vector<2x256xf32> to vector<2x64xf32>
    %657 = arith.negf %656 : vector<2x64xf32>
    %658 = math.exp %657 : vector<2x64xf32>
    %cst_202 = arith.constant 1.000000e+00 : f32
    %659 = vector.broadcast %cst_202 : f32 to vector<2x64xf32>
    %660 = arith.addf %659, %658 : vector<2x64xf32>
    %661 = arith.divf %659, %660 : vector<2x64xf32>
    %662 = vector.extract_strided_slice %649 {offsets = [0, 128], sizes = [2, 64], strides = [1, 1]} : vector<2x256xf32> to vector<2x64xf32>
    %663 = math.tanh %662 : vector<2x64xf32>
    %664 = vector.extract_strided_slice %649 {offsets = [0, 192], sizes = [2, 64], strides = [1, 1]} : vector<2x256xf32> to vector<2x64xf32>
    %665 = arith.negf %664 : vector<2x64xf32>
    %666 = math.exp %665 : vector<2x64xf32>
    %cst_203 = arith.constant 1.000000e+00 : f32
    %667 = vector.broadcast %cst_203 : f32 to vector<2x64xf32>
    %668 = arith.addf %667, %666 : vector<2x64xf32>
    %669 = arith.divf %667, %668 : vector<2x64xf32>
    %670 = arith.mulf %661, %583 : vector<2x64xf32>
    %671 = arith.mulf %655, %663 : vector<2x64xf32>
    %672 = arith.addf %670, %671 : vector<2x64xf32>
    %673 = math.tanh %672 : vector<2x64xf32>
    %674 = arith.mulf %669, %673 : vector<2x64xf32>
    %675 = vector.extract_strided_slice %35 {offsets = [70, 0], sizes = [10, 32], strides = [1, 1]} : vector<80x32xf32> to vector<10x32xf32>
    %676 = vector.extract_strided_slice %38 {offsets = [70, 0], sizes = [10, 256], strides = [1, 1]} : vector<80x256xf32> to vector<10x256xf32>
    %677 = vector.extract_strided_slice %24 {offsets = [70, 0], sizes = [10, 1], strides = [1, 1]} : vector<80x1xf32> to vector<10x1xf32>
    %678 = vector.extract_strided_slice %45 {offsets = [14, 0], sizes = [2, 256], strides = [1, 1]} : vector<16x256xf32> to vector<2x256xf32>
    %cst_204 = arith.constant dense<0.000000e+00> : vector<2x32xf32>
    %679 = tpu.matmul %674, %3, %cst_204 {dimension_numbers = #tpu.dot_dimension_numbers<[1], [0], [0], [1], [0, 0, 1, 1], [], []>} : vector<2x64xf32>, vector<64x32xf32>, vector<2x32xf32> -> vector<2x32xf32>
    %cst_205 = arith.constant dense<0.000000e+00> : vector<10x32xf32>
    %680 = tpu.matmul %1, %679, %cst_205 {dimension_numbers = #tpu.dot_dimension_numbers<[1], [0], [0], [1], [0, 0, 1, 1], [], []>} : vector<10x2xf32>, vector<2x32xf32>, vector<10x32xf32> -> vector<10x32xf32>
    %681 = arith.addf %680, %675 : vector<10x32xf32>
    %682 = math.tanh %681 : vector<10x32xf32>
    %cst_206 = arith.constant dense<0.000000e+00> : vector<10x1xf32>
    %683 = tpu.matmul %682, %4, %cst_206 {dimension_numbers = #tpu.dot_dimension_numbers<[1], [0], [0], [1], [0, 0, 1, 1], [], []>} : vector<10x32xf32>, vector<32x1xf32>, vector<10x1xf32> -> vector<10x1xf32>
    %684 = arith.mulf %683, %677 : vector<10x1xf32>
    %685 = math.exp %684 : vector<10x1xf32>
    %cst_207 = arith.constant dense<0.000000e+00> : vector<10x1xf32>
    %686 = tpu.matmul %2, %685, %cst_207 {dimension_numbers = #tpu.dot_dimension_numbers<[1], [0], [0], [1], [0, 0, 1, 1], [], []>} : vector<10x10xf32>, vector<10x1xf32>, vector<10x1xf32> -> vector<10x1xf32>
    %687 = arith.divf %685, %686 : vector<10x1xf32>
    %c7_i32 = arith.constant 7 : i32
    %688 = vector.broadcast %c7_i32 : i32 to vector<10x8xi32>
    %689 = arith.cmpi eq, %46, %688 : vector<10x8xi32>
    %690 = vector.shape_cast %687 : vector<10x1xf32> to vector<10x1xf32>
    %691 = vector.broadcast %690 : vector<10x1xf32> to vector<10x8xf32>
    %692 = arith.select %689, %691, %603 : vector<10x8xi1>, vector<10x8xf32>
    %693 = vector.broadcast %687 : vector<10x1xf32> to vector<10x256xf32>
    %694 = arith.mulf %693, %676 : vector<10x256xf32>
    %695 = arith.truncf %694 : vector<10x256xf32> to vector<10x256xbf16>
    %cst_208 = arith.constant dense<0.000000e+00> : vector<2x256xf32>
    %696 = tpu.matmul %0, %695, %cst_208 {dimension_numbers = #tpu.dot_dimension_numbers<[1], [0], [0], [1], [0, 0, 1, 1], [], []>} : vector<2x10xbf16>, vector<10x256xbf16>, vector<2x256xf32> -> vector<2x256xf32>
    %697 = arith.addf %678, %696 : vector<2x256xf32>
    %698 = arith.truncf %639 : vector<2x64xf32> to vector<2x64xbf16>
    %c0_209 = arith.constant 0 : index
    %c0_210 = arith.constant 0 : index
    %c0_211 = arith.constant 0 : index
    %699 = vector.load %arg14[%c0_209, %c0_210, %c0_211] : memref<2x64x256xbf16, #tpu.memory_space<vmem>>, vector<1x64x256xbf16>
    %700 = vector.shape_cast %699 : vector<1x64x256xbf16> to vector<64x256xbf16>
    %cst_212 = arith.constant dense<0.000000e+00> : vector<2x256xf32>
    %701 = tpu.matmul %698, %700, %cst_212 {dimension_numbers = #tpu.dot_dimension_numbers<[1], [0], [0], [1], [0, 0, 1, 1], [], []>} : vector<2x64xbf16>, vector<64x256xbf16>, vector<2x256xf32> -> vector<2x256xf32>
    %702 = arith.addf %697, %701 : vector<2x256xf32>
    %703 = arith.addf %702, %12 : vector<2x256xf32>
    %704 = vector.extract_strided_slice %703 {offsets = [0, 0], sizes = [2, 64], strides = [1, 1]} : vector<2x256xf32> to vector<2x64xf32>
    %705 = arith.negf %704 : vector<2x64xf32>
    %706 = math.exp %705 : vector<2x64xf32>
    %cst_213 = arith.constant 1.000000e+00 : f32
    %707 = vector.broadcast %cst_213 : f32 to vector<2x64xf32>
    %708 = arith.addf %707, %706 : vector<2x64xf32>
    %709 = arith.divf %707, %708 : vector<2x64xf32>
    %710 = vector.extract_strided_slice %703 {offsets = [0, 64], sizes = [2, 64], strides = [1, 1]} : vector<2x256xf32> to vector<2x64xf32>
    %711 = arith.negf %710 : vector<2x64xf32>
    %712 = math.exp %711 : vector<2x64xf32>
    %cst_214 = arith.constant 1.000000e+00 : f32
    %713 = vector.broadcast %cst_214 : f32 to vector<2x64xf32>
    %714 = arith.addf %713, %712 : vector<2x64xf32>
    %715 = arith.divf %713, %714 : vector<2x64xf32>
    %716 = vector.extract_strided_slice %703 {offsets = [0, 128], sizes = [2, 64], strides = [1, 1]} : vector<2x256xf32> to vector<2x64xf32>
    %717 = math.tanh %716 : vector<2x64xf32>
    %718 = vector.extract_strided_slice %703 {offsets = [0, 192], sizes = [2, 64], strides = [1, 1]} : vector<2x256xf32> to vector<2x64xf32>
    %719 = arith.negf %718 : vector<2x64xf32>
    %720 = math.exp %719 : vector<2x64xf32>
    %cst_215 = arith.constant 1.000000e+00 : f32
    %721 = vector.broadcast %cst_215 : f32 to vector<2x64xf32>
    %722 = arith.addf %721, %720 : vector<2x64xf32>
    %723 = arith.divf %721, %722 : vector<2x64xf32>
    %724 = arith.mulf %715, %637 : vector<2x64xf32>
    %725 = arith.mulf %709, %717 : vector<2x64xf32>
    %726 = arith.addf %724, %725 : vector<2x64xf32>
    %727 = math.tanh %726 : vector<2x64xf32>
    %728 = arith.mulf %723, %727 : vector<2x64xf32>
    %729 = arith.truncf %728 : vector<2x64xf32> to vector<2x64xbf16>
    %c0_216 = arith.constant 0 : index
    %c0_217 = arith.constant 0 : index
    %c0_218 = arith.constant 0 : index
    %730 = vector.load %arg13[%c0_216, %c0_217, %c0_218] : memref<1x64x256xbf16, #tpu.memory_space<vmem>>, vector<1x64x256xbf16>
    %731 = vector.shape_cast %730 : vector<1x64x256xbf16> to vector<64x256xbf16>
    %cst_219 = arith.constant dense<0.000000e+00> : vector<2x256xf32>
    %732 = tpu.matmul %729, %731, %cst_219 {dimension_numbers = #tpu.dot_dimension_numbers<[1], [0], [0], [1], [0, 0, 1, 1], [], []>} : vector<2x64xbf16>, vector<64x256xbf16>, vector<2x256xf32> -> vector<2x256xf32>
    %733 = arith.truncf %674 : vector<2x64xf32> to vector<2x64xbf16>
    %c1_220 = arith.constant 1 : index
    %c0_221 = arith.constant 0 : index
    %c0_222 = arith.constant 0 : index
    %734 = vector.load %arg14[%c1_220, %c0_221, %c0_222] : memref<2x64x256xbf16, #tpu.memory_space<vmem>>, vector<1x64x256xbf16>
    %735 = vector.shape_cast %734 : vector<1x64x256xbf16> to vector<64x256xbf16>
    %cst_223 = arith.constant dense<0.000000e+00> : vector<2x256xf32>
    %736 = tpu.matmul %733, %735, %cst_223 {dimension_numbers = #tpu.dot_dimension_numbers<[1], [0], [0], [1], [0, 0, 1, 1], [], []>} : vector<2x64xbf16>, vector<64x256xbf16>, vector<2x256xf32> -> vector<2x256xf32>
    %737 = arith.addf %732, %736 : vector<2x256xf32>
    %738 = arith.addf %737, %16 : vector<2x256xf32>
    %739 = vector.extract_strided_slice %738 {offsets = [0, 0], sizes = [2, 64], strides = [1, 1]} : vector<2x256xf32> to vector<2x64xf32>
    %740 = arith.negf %739 : vector<2x64xf32>
    %741 = math.exp %740 : vector<2x64xf32>
    %cst_224 = arith.constant 1.000000e+00 : f32
    %742 = vector.broadcast %cst_224 : f32 to vector<2x64xf32>
    %743 = arith.addf %742, %741 : vector<2x64xf32>
    %744 = arith.divf %742, %743 : vector<2x64xf32>
    %745 = vector.extract_strided_slice %738 {offsets = [0, 64], sizes = [2, 64], strides = [1, 1]} : vector<2x256xf32> to vector<2x64xf32>
    %746 = arith.negf %745 : vector<2x64xf32>
    %747 = math.exp %746 : vector<2x64xf32>
    %cst_225 = arith.constant 1.000000e+00 : f32
    %748 = vector.broadcast %cst_225 : f32 to vector<2x64xf32>
    %749 = arith.addf %748, %747 : vector<2x64xf32>
    %750 = arith.divf %748, %749 : vector<2x64xf32>
    %751 = vector.extract_strided_slice %738 {offsets = [0, 128], sizes = [2, 64], strides = [1, 1]} : vector<2x256xf32> to vector<2x64xf32>
    %752 = math.tanh %751 : vector<2x64xf32>
    %753 = vector.extract_strided_slice %738 {offsets = [0, 192], sizes = [2, 64], strides = [1, 1]} : vector<2x256xf32> to vector<2x64xf32>
    %754 = arith.negf %753 : vector<2x64xf32>
    %755 = math.exp %754 : vector<2x64xf32>
    %cst_226 = arith.constant 1.000000e+00 : f32
    %756 = vector.broadcast %cst_226 : f32 to vector<2x64xf32>
    %757 = arith.addf %756, %755 : vector<2x64xf32>
    %758 = arith.divf %756, %757 : vector<2x64xf32>
    %759 = arith.mulf %750, %672 : vector<2x64xf32>
    %760 = arith.mulf %744, %752 : vector<2x64xf32>
    %761 = arith.addf %759, %760 : vector<2x64xf32>
    %762 = math.tanh %761 : vector<2x64xf32>
    %763 = arith.mulf %758, %762 : vector<2x64xf32>
    %c0_227 = arith.constant 0 : index
    %c0_228 = arith.constant 0 : index
    %764 = vector.load %arg18[%c0_227, %c0_228] : memref<10x8xf32, #tpu.memory_space<vmem>>, vector<10x8xf32>
    tpu.vector_store %arg18[%c0_227, %c0_228], %692 {strides = array<i32>} : memref<10x8xf32, #tpu.memory_space<vmem>>, vector<10x8xf32>,
    %765 = arith.truncf %140 : vector<2x64xf32> to vector<2x64xbf16>
    %cst_229 = arith.constant dense<0.000000e+00> : vector<2x2xf32>
    %766 = tpu.matmul %765, %5, %cst_229 {dimension_numbers = #tpu.dot_dimension_numbers<[1], [0], [0], [1], [0, 0, 1, 1], [], []>} : vector<2x64xbf16>, vector<64x2xbf16>, vector<2x2xf32> -> vector<2x2xf32>
    %767 = arith.addf %766, %8 : vector<2x2xf32>
    %768 = arith.truncf %229 : vector<2x64xf32> to vector<2x64xbf16>
    %cst_230 = arith.constant dense<0.000000e+00> : vector<2x2xf32>
    %769 = tpu.matmul %768, %5, %cst_230 {dimension_numbers = #tpu.dot_dimension_numbers<[1], [0], [0], [1], [0, 0, 1, 1], [], []>} : vector<2x64xbf16>, vector<64x2xbf16>, vector<2x2xf32> -> vector<2x2xf32>
    %770 = arith.addf %769, %8 : vector<2x2xf32>
    %771 = arith.truncf %318 : vector<2x64xf32> to vector<2x64xbf16>
    %cst_231 = arith.constant dense<0.000000e+00> : vector<2x2xf32>
    %772 = tpu.matmul %771, %5, %cst_231 {dimension_numbers = #tpu.dot_dimension_numbers<[1], [0], [0], [1], [0, 0, 1, 1], [], []>} : vector<2x64xbf16>, vector<64x2xbf16>, vector<2x2xf32> -> vector<2x2xf32>
    %773 = arith.addf %772, %8 : vector<2x2xf32>
    %774 = arith.truncf %407 : vector<2x64xf32> to vector<2x64xbf16>
    %cst_232 = arith.constant dense<0.000000e+00> : vector<2x2xf32>
    %775 = tpu.matmul %774, %5, %cst_232 {dimension_numbers = #tpu.dot_dimension_numbers<[1], [0], [0], [1], [0, 0, 1, 1], [], []>} : vector<2x64xbf16>, vector<64x2xbf16>, vector<2x2xf32> -> vector<2x2xf32>
    %776 = arith.addf %775, %8 : vector<2x2xf32>
    %777 = arith.truncf %496 : vector<2x64xf32> to vector<2x64xbf16>
    %cst_233 = arith.constant dense<0.000000e+00> : vector<2x2xf32>
    %778 = tpu.matmul %777, %5, %cst_233 {dimension_numbers = #tpu.dot_dimension_numbers<[1], [0], [0], [1], [0, 0, 1, 1], [], []>} : vector<2x64xbf16>, vector<64x2xbf16>, vector<2x2xf32> -> vector<2x2xf32>
    %779 = arith.addf %778, %8 : vector<2x2xf32>
    %780 = arith.truncf %585 : vector<2x64xf32> to vector<2x64xbf16>
    %cst_234 = arith.constant dense<0.000000e+00> : vector<2x2xf32>
    %781 = tpu.matmul %780, %5, %cst_234 {dimension_numbers = #tpu.dot_dimension_numbers<[1], [0], [0], [1], [0, 0, 1, 1], [], []>} : vector<2x64xbf16>, vector<64x2xbf16>, vector<2x2xf32> -> vector<2x2xf32>
    %782 = arith.addf %781, %8 : vector<2x2xf32>
    %783 = arith.truncf %674 : vector<2x64xf32> to vector<2x64xbf16>
    %cst_235 = arith.constant dense<0.000000e+00> : vector<2x2xf32>
    %784 = tpu.matmul %783, %5, %cst_235 {dimension_numbers = #tpu.dot_dimension_numbers<[1], [0], [0], [1], [0, 0, 1, 1], [], []>} : vector<2x64xbf16>, vector<64x2xbf16>, vector<2x2xf32> -> vector<2x2xf32>
    %785 = arith.addf %784, %8 : vector<2x2xf32>
    %786 = arith.truncf %763 : vector<2x64xf32> to vector<2x64xbf16>
    %cst_236 = arith.constant dense<0.000000e+00> : vector<2x2xf32>
    %787 = tpu.matmul %786, %5, %cst_236 {dimension_numbers = #tpu.dot_dimension_numbers<[1], [0], [0], [1], [0, 0, 1, 1], [], []>} : vector<2x64xbf16>, vector<64x2xbf16>, vector<2x2xf32> -> vector<2x2xf32>
    %788 = arith.addf %787, %8 : vector<2x2xf32>
    %789 = vector.shape_cast %767 : vector<2x2xf32> to vector<1x2x2xf32>
    %790 = vector.shape_cast %770 : vector<2x2xf32> to vector<1x2x2xf32>
    %791 = vector.shape_cast %773 : vector<2x2xf32> to vector<1x2x2xf32>
    %792 = vector.shape_cast %776 : vector<2x2xf32> to vector<1x2x2xf32>
    %793 = vector.shape_cast %779 : vector<2x2xf32> to vector<1x2x2xf32>
    %794 = vector.shape_cast %782 : vector<2x2xf32> to vector<1x2x2xf32>
    %795 = vector.shape_cast %785 : vector<2x2xf32> to vector<1x2x2xf32>
    %796 = vector.shape_cast %788 : vector<2x2xf32> to vector<1x2x2xf32>
    %797 = tpu.concatenate %789, %790, %791, %792, %793, %794, %795, %796 in 0 : vector<1x2x2xf32>, vector<1x2x2xf32>, vector<1x2x2xf32>, vector<1x2x2xf32>, vector<1x2x2xf32>, vector<1x2x2xf32>, vector<1x2x2xf32>, vector<1x2x2xf32> -> vector<8x2x2xf32>
    %c0_237 = arith.constant 0 : index
    %c0_238 = arith.constant 0 : index
    %c0_239 = arith.constant 0 : index
    %798 = vector.load %arg19[%c0_237, %c0_238, %c0_239] : memref<8x2x2xf32, #tpu.memory_space<vmem>>, vector<8x2x2xf32>
    tpu.vector_store %arg19[%c0_237, %c0_238, %c0_239], %797 {strides = array<i32>} : memref<8x2x2xf32, #tpu.memory_space<vmem>>, vector<8x2x2xf32>,
    return
  }
}

</mosaic_0001>

<bundles_post_ra>
// kernel: tpu_custom_call.1
= control target key start
LH: loop header
LB: loop body
LE: loop exit
PB: predicated region body
PF: predicated region fallthrough
CT: control target
= control target key end

     0   :  { %s7155_s0 = inlined_call_operand.vmem [shape: f32[16,64], index: 0, kind: input, shape index: {}]   ;;  %s7156_s1 = inlined_call_operand.vmem [shape: f32[80,64], index: 1, kind: input, shape index: {}]   ;;  %s7157_s2 = inlined_call_operand.vmem [shape: bf16[2,10], index: 2, kind: input, shape index: {}]   ;;  %s7158_s3 = inlined_call_operand.vmem [shape: f32[10,2], index: 3, kind: input, shape index: {}]   ;;  %s7159_s4 = inlined_call_operand.vmem [shape: f32[10,10], index: 4, kind: input, shape index: {}]   ;;  %s7160_s5 = inlined_call_operand.vmem [shape: bf16[64,32], index: 5, kind: input, shape index: {}]   ;;  %s7161_s6 = inlined_call_operand.vmem [shape: f32[1,32], index: 6, kind: input, shape index: {}]   ;;  %s7162_s7 = inlined_call_operand.hbm [shape: f32[1,32], index: 7, kind: input, shape index: {}]   ;;  %s7163_s8 = inlined_call_operand.vmem [shape: bf16[64,256], index: 8, kind: input, shape index: {}]   ;;  %s7164_s9 = inlined_call_operand.vmem [shape: f32[1,256], index: 9, kind: input, shape index: {}]   ;;  %s7165_s10 = inlined_call_operand.vmem [shape: bf16[32,256], index: 10, kind: input, shape index: {}]   ;;  %s7166_s11 = inlined_call_operand.vmem [shape: f32[64,32], index: 11, kind: input, shape index: {}]   ;;  %s7167_s12 = inlined_call_operand.vmem [shape: f32[32,1], index: 12, kind: input, shape index: {}]   ;;  %s7168_s13 = inlined_call_operand.hbm [shape: bf16[1,64,256], index: 13, kind: input, shape index: {}]   ;;  %s7169_s14 = inlined_call_operand.vmem [shape: bf16[2,64,256], index: 14, kind: input, shape index: {}]   ;;  %s7170_s15 = inlined_call_operand.vmem [shape: f32[2,1,256], index: 15, kind: input, shape index: {}]   ;;  %s7171_s16 = inlined_call_operand.vmem [shape: bf16[64,2], index: 16, kind: input, shape index: {}]   ;;  %s7172_s17 = inlined_call_operand.vmem [shape: f32[1,2], index: 17, kind: input, shape index: {}]   ;;  %s7173_s18 = inlined_call_operand.vmem [shape: f32[10,8], index: 18, kind: output, shape index: {0}]   ;;  %s7174_s19 = inlined_call_operand.vmem [shape: f32[8,2,2], index: 19, kind: output, shape index: {1}]  }
   0x1   :  { %7250 = sst [smem:[#allocation58_spill]] %s7155_s0 }
   0x2   :  { %7251 = sst [smem:[#allocation59_spill]] %s7156_s1 }
   0x3   :  { %7252 = sst [smem:[#allocation60_spill]] %s7157_s2 }
   0x4   :  { %7253 = sst [smem:[#allocation61_spill]] %s7158_s3 }
   0x5   :  { %25 = vsyncpa [#allocation3], 0  ;;  %s46_s20 = sshll.u32 %s7162_s7, 4  ;;  %s47_s20 = int_to_ptr.hbm [resolvable:$true] %s46_s20 }
   0x6   :  { %26 = vsyncpa [#allocation5], 0  ;;  %s5062_s21 = smov [#allocation2]   ;;  %s66_s23 = sshll.u32 %s7168_s13, 4  ;;  %s67_s23 = int_to_ptr.hbm [resolvable:$true] %s66_s23 }
   0x7   :  { %s48_s1 = sshll.u32 %s5062_s21, 4  ;;  %s5063_s24 = smov [#allocation4]   ;;  %s49_s1 = int_to_ptr.vmem [resolvable:$true] %s48_s1 }
   0x8   :  { %51 = dma.hbm_to_vmem [thread:$0]  %s47_s20, 16, %s49_s1, [#allocation3]  }
   0x9   :  { %s68_s25 = sshll.u32 %s5063_s24, 4  ;;  %s5064_s3 = smov 128   ;;  %s69_s25 = int_to_ptr.vmem [resolvable:$true] %s68_s25 }
   0xa   :  { %s5065_s26 = smov 8  }
   0xb   :  { %74 = dma.hbm_to_vmem [thread:$0]  %s67_s23, 1024, %s69_s25, [#allocation5], %s5064_s3, %s5064_s3, %s5065_s26  }
   0xc   :  { %5058 = dma.done.wait [#allocation3], 16  }
   0xd   :  { %5059 = vsyncadd [#allocation3], 4294967280 }
   0xe   :  { %5060 = dma.done.wait [#allocation5], 1024  }
   0xf   :  { %5061 = vsyncadd [#allocation5], 4294966272  ;;  %v4313_v0 = vld [vmem:[%s7163_s8 + $0x30] sm:$0xf]  ;;  %v4631_v1 = vld [vmem:[%s7163_s8 + $0x34] sm:$0xf0] }
  0x10   :  { %v4305_v2 = vld [vmem:[%s7163_s8 + $0x20] sm:$0xf]  ;;  %v4314_v3 = vor.u32 %v4631_v1, %v4313_v0  ;;  %v4629_v4 = vld [vmem:[%s7163_s8 + $0x24] sm:$0xf0]  ;;  %v4297_v6 = vld [vmem:[%s7163_s8 + $0x10] sm:$0xf] }
  0x11   :  { %v4306_v5 = vor.u32 %v4629_v4, %v4305_v2  ;;  %v4627_v7 = vld [vmem:[%s7163_s8 + $0x14] sm:$0xf0]  ;;  %v4289_v9 = vld [vmem:[%s7163_s8] sm:$0xf]  ;;  %v4625_v10 = vld [vmem:[%s7163_s8 + $0x4] sm:$0xf0] }
  0x12   :  { %506 = vmatpush.bf16.msra.mxu3 %v4314_v3  ;;  %v4298_v8 = vor.u32 %v4627_v7, %v4297_v6  ;;  %v4630_v11 = vld [vmem:[%s7163_s8 + $0x34] sm:$0xf]  ;;  %v4315_v12 = vld [vmem:[%s7163_s8 + $0x38] sm:$0xf0]  ;;  %v4290_v13 = vor.u32 %v4625_v10, %v4289_v9  ;;  %s7254_s0 = sld [smem:[#allocation58_spill]]  ;;  %vm144_vm0 = vcmask 523264  }
  0x13   :  { %v4318_v16 = vor.u32 %v4630_v11, %v4315_v12  ;;  %v4628_v17 = vld [vmem:[%s7163_s8 + $0x24] sm:$0xf]  ;;  %v4307_v18 = vld [vmem:[%s7163_s8 + $0x28] sm:$0xf0]  ;;  %v4626_v21 = vld [vmem:[%s7163_s8 + $0x14] sm:$0xf] }
  0x14   :  { %v4310_v20 = vor.u32 %v4628_v17, %v4307_v18  ;;  %v4299_v22 = vld [vmem:[%s7163_s8 + $0x18] sm:$0xf0]  ;;  %v4618_v25 = vld [vmem:[%s7160_s5 + $0x10] sm:$0xff]  ;;  %v4624_v26 = vld [vmem:[%s7163_s8 + $0x4] sm:$0xf]  ;;  %v5066_v37 = vmov 0.0  }
  0x15   :  { %v4619_v23 = vld [vmem:[%s7160_s5 + $0x18] sm:$0xff]  ;;  %v4302_v24 = vor.u32 %v4626_v21, %v4299_v22  ;;  %v4291_v27 = vld [vmem:[%s7163_s8 + $0x8] sm:$0xf0]  ;;  %v5244_v30 = vld [vmem:[%s7166_s11 + $0x30] sm:$0xff]  ;;  %s7255_s2 = sld [smem:[#allocation59_spill]]  ;;  %vm562_vm1 = vcmask 1041408  }
  0x16   :  { %507 = vmatpush.bf16.msra.mxu3 %v4306_v5  ;;  %275 = vmatpush.bf16.msra.mxu0 %v4619_v23  ;;  %v4294_v28 = vor.u32 %v4624_v26, %v4291_v27  ;;  %v5239_v29 = vld [vmem:[%s7166_s11 + $0x38] sm:$0xff]  ;;  %v5250_v31 = vld [vmem:[%s7166_s11 + $0x28] sm:$0xff]  ;;  %v5256_v32 = vld [vmem:[%s7166_s11 + $0x20] sm:$0xff]  ;;  %s7259_s22 = sld [smem:[#allocation61_spill]]  ;;  %vm555_vm2 = vcmask 15360   ;;  %vm358_vm5 = vcmask 261120  }
  0x17   :  { %v5263_v33 = vld [vmem:[%s7166_s11 + $0x18] sm:$0xff]  ;;  %v5269_v34 = vld [vmem:[%s7166_s11 + $0x10] sm:$0xff]  ;;  %v5275_v35 = vld [vmem:[%s7166_s11 + $0x8] sm:$0xff]  ;;  %vm7236_vm14 = vcmask 1043456   ;;  %vm626_vm15 = vcmask 80896   ;;  %s7291_s7 = sld [smem:[#allocation60_spill]] }
  0x18   :  { %v442_v14 = vld [vmem:[%s7254_s0] sm:$0xff]  ;;  %v443_v15 = vld [vmem:[%s7254_s0 + $0x8] sm:$0xff]  ;;  %v4271_v4 = vld [vmem:[%s7165_s10 + $0x10] sm:$0xf]  ;;  %s5068_s29 = smov 64  }
  0x19   :  { %v444_v19 = vpack.c.bf16 %v443_v15, %v442_v14  ;;  %v5281_v36 = vld [vmem:[%s7166_s11] sm:$0xff]  ;;  %v4617_v38 = vld [vmem:[%s7160_s5 + $0x8] sm:$0xff]  ;;  %v4623_v5 = vld [vmem:[%s7165_s10 + $0x14] sm:$0xf0] }
  0x1a   :  { %508 = vmatpush.bf16.msra.mxu3 %v4298_v8  ;;  %276 = vmatpush.bf16.msra.mxu0 %v4618_v25  ;;  %v4616_v39 = vld [vmem:[%s7160_s5] sm:$0xff]  ;;  %v4622_v6 = vld [vmem:[%s7165_s10 + $0x14] sm:$0xf]  ;;  %v4272_v7 = vor.u32 %v4623_v5, %v4271_v4  ;;  %v4273_v8 = vld [vmem:[%s7165_s10 + $0x18] sm:$0xf0] }
  0x1b   :  { %v134_v40 = vld [vmem:[%s7255_s2] sm:$0xff]  ;;  %v135_v41 = vld [vmem:[%s7255_s2 + $0x8] sm:$0xff]  ;;  %v136_v44 = vld [vmem:[%s7255_s2 + $0x10] sm:$0xff] }
  0x1c   :  { %v215_v42 = vpack.c.bf16 %v135_v41, %v134_v40  ;;  %v145_v43 = vsel %vm144_vm0, %v134_v40, 0.0  ;;  %v137_v45 = vld [vmem:[%s7255_s2 + $0x18] sm:$0xff]  ;;  %v148_v47 = vsel %vm144_vm0, %v135_v41, 0.0  ;;  %v151_v49 = vsel %vm144_vm0, %v136_v44, 0.0  ;;  %v138_v52 = vld [vmem:[%s7255_s2 + $0x20] sm:$0xff]  ;;  %v139_v53 = vld [vmem:[%s7255_s2 + $0x28] sm:$0xff]  ;;  %380 = vmatpush.bf16.msra.mxu1 %v4272_v7 }
  0x1d   :  { %146 = vadd.xlane.f32.xlu0 %v145_v43  ;;  %v216_v46 = vpack.c.bf16 %v137_v45, %v136_v44  ;;  %152 = vadd.xlane.f32.xlu1 %v151_v49  ;;  %v154_v50 = vsel %vm144_vm0, %v137_v45, 0.0  ;;  %v217_v54 = vpack.c.bf16 %v139_v53, %v138_v52  ;;  %v157_v55 = vsel %vm144_vm0, %v138_v52, 0.0  ;;  %v5328_v58 = vld [vmem:[%s7164_s9] sm:$0x3]  ;;  %v140_v59 = vld [vmem:[%s7255_s2 + $0x30] sm:$0xff]  ;;  %v141_v60 = vld [vmem:[%s7255_s2 + $0x38] sm:$0xff] }
  0x1e   :  { %509 = vmatpush.bf16.msra.mxu3 %v4290_v13  ;;  %277 = vmatpush.bf16.msra.mxu0 %v4617_v38  ;;  %v160_v57 = vsel %vm144_vm0, %v139_v53, 0.0  ;;  %7257 = vst [vmem:[#allocation9_spill] sm:$0xff] %v5328_v58  ;;  %v7185_v61 = vperm.slane %v5328_v58, 1  ;;  %v218_v0 = vpack.c.bf16 %v141_v60, %v140_v59  ;;  %v93_v1 = vld [vmem:[%s7259_s22] sm:$0xff]  ;;  %v94_v3 = vld [vmem:[%s7259_s22 + $0x8] sm:$0x3]  ;;  %v4276_v13 = vor.u32 %v4622_v6, %v4273_v8 }
  0x1f   :  { %158 = vadd.xlane.f32.xlu2 %v157_v55  ;;  %v166_v9 = vsel %vm144_vm0, %v141_v60, 0.0  ;;  %v142_v10 = vld [vmem:[%s7255_s2 + $0x40] sm:$0xff]  ;;  %v143_v11 = vld [vmem:[%s7255_s2 + $0x48] sm:$0xff]  ;;  %v163_v12 = vsel %vm144_vm0, %v140_v59, 0.0  ;;  %v5431_v6 = vld [vmem:[%s7167_s12 + $0x18] sm:$0xff] }
  0x20   :  { %v219_v14 = vpack.c.bf16 %v143_v11, %v142_v10  ;;  %v4263_v15 = vld [vmem:[%s7165_s10] sm:$0xf]  ;;  %v4620_v17 = vld [vmem:[%s7165_s10 + $0x4] sm:$0xf]  ;;  %414 = vmatpush.bf16.msra.mxu2 %v4276_v13  ;;  %v169_v21 = vsel %vm144_vm0, %v142_v10, 0.0  ;;  %v172_v22 = vsel %vm144_vm0, %v143_v11, 0.0 }
  0x21   :  { %4319 = vmatmul.msk.bf16.vlgmr.msra.gmra.mxu3 %vm144_vm0, %v444_v19  ;;  %v5389_v25 = vld [vmem:[%s7161_s6] ss:$0 sm:$0xff]  ;;  %v5438_v7 = vld [vmem:[%s7167_s12 + $0x10] sm:$0xff]  ;;  %v5444_v8 = vld [vmem:[%s7167_s12 + $0x8] sm:$0xff] }
  0x22   :  { %520 = vmatpush.bf16.msrb.mxu3 %v4318_v16  ;;  %278 = vmatpush.bf16.msra.mxu0 %v4616_v39  ;;  %v4621_v16 = vld [vmem:[%s7165_s10 + $0x4] sm:$0xf0]  ;;  %v5396_v40 = vld [vmem:[#allocation2] ss:$0 sm:$0xff] }
  0x23   :  { %v4264_v18 = vor.u32 %v4621_v16, %v4263_v15 }
  0x25   :  { %4256 = vmatmul.msk.bf16.vlgmr.msra.gmra.mxu0 %vm144_vm0, %v215_v42  ;;  %149 = vadd.xlane.f32.xlu0 %v148_v47 }
  0x26   :  { %521 = vmatpush.bf16.msrb.mxu3 %v4310_v20  ;;  %155 = vadd.xlane.f32.xlu1 %v154_v50 }
  0x27   :  { %161 = vadd.xlane.f32.xlu2 %v160_v57  ;;  %381 = vmatpush.bf16.msra.mxu1 %v4264_v18 }
  0x2a   :  { %522 = vmatpush.bf16.msrb.mxu3 %v4302_v24 }
  0x2d   :  { %164 = vadd.xlane.f32.xlu0 %v163_v12 }
  0x2e   :  { %523 = vmatpush.bf16.msrb.mxu3 %v4294_v28  ;;  %167 = vadd.xlane.f32.xlu1 %v166_v9  ;;  %v5451_v9 = vld [vmem:[%s7167_s12] sm:$0xff] }
  0x2f   :  { %170 = vadd.xlane.f32.xlu2 %v169_v21 }
  0x31   :  { %4320 = vmatmul.msk.bf16.vlgmr.msrb.gmra.mxu3 %vm144_vm0, %v444_v19  ;;  %v4265_v19 = vld [vmem:[%s7165_s10 + $0x8] sm:$0xf0] }
  0x32   :  { %543 = vmatpush.msra.mxu3 %v5239_v29  ;;  %v4268_v20 = vor.u32 %v4620_v17, %v4265_v19 }
  0x34   :  { %544 = vmatpush.msra.mxu3 %v5244_v30  ;;  %415 = vmatpush.bf16.msra.mxu2 %v4268_v20 }
  0x35   :  { %4257 = vmatmul.msk.bf16.gmra.mxu0 %vm144_vm0, %v216_v46  ;;  %173 = vadd.xlane.f32.xlu0 %v172_v22 }
  0x36   :  { %545 = vmatpush.msra.mxu3 %v5250_v31 }
  0x38   :  { %546 = vmatpush.msra.mxu3 %v5256_v32 }
  0x3a   :  { %547 = vmatpush.msra.mxu3 %v5263_v33 }
  0x3c   :  { %548 = vmatpush.msra.mxu3 %v5269_v34 }
  0x3e   :  { %549 = vmatpush.msra.mxu3 %v5275_v35 }
  0x40   :  { %550 = vmatpush.msra.mxu3 %v5281_v36 }
  0x41   :  { %551 = vmatmul.f32.vlgmr.msra.gmra.mxu3 %v5066_v37 }
  0x45   :  { %4258 = vmatmul.msk.bf16.gmra.mxu0 %vm144_vm0, %v217_v54 }
  0x55   :  { %4259 = vmatmul.msk.bf16.gmra.mxu0 %vm144_vm0, %v218_v0 }
  0x65   :  { %4260 = vmatmul.msk.bf16.gmra.mxu0 %vm144_vm0, %v219_v14 }
  0x90   :  { %v147_v23 = vpop.xlane.xlu0 %146  ;;  %v153_v49 = vpop.xlane.xlu1 %152 }
  0x91   :  { %v175_v24 = vand.u32 2147483647, %v147_v23  ;;  %v177_v50 = vand.u32 2147483647, %v153_v49 }
  0x92   :  { %v159_v10 = vpop.xlane.xlu2 %158 }
  0x93   :  { %vm185_vm3 = vcmp.gt.f32.partialorder %v175_v24, 1e-06  ;;  %vm187_vm6 = vcmp.gt.f32.partialorder %v177_v50, 1e-06  ;;  %v179_v12 = vand.u32 2147483647, %v159_v10 }
  0x94   :  { %v5393_v28 = vsel %vm185_vm3, 1.0, %v5066_v37  ;;  %v5412_v55 = vsel %vm187_vm6, 1.0, %v5066_v37 }
  0x95   :  { %vm189_vm8 = vcmp.gt.f32.partialorder %v179_v12, 1e-06 }
  0x96   :  { %v5456_v14 = vsel %vm189_vm8, 1.0, %v5066_v37 }
  0x97   :  { %7262 = vst [vmem:[#allocation13_spill] sm:$0xff] %v5456_v14 }
  0x98   :  { %v150_v38 = vpop.xlane.xlu0 %149 }
  0x99   :  { %v176_v41 = vand.u32 2147483647, %v150_v38  ;;  %v156_v57 = vpop.xlane.xlu1 %155 }
  0x9a   :  { %v178_v60 = vand.u32 2147483647, %v156_v57  ;;  %v162_v15 = vpop.xlane.xlu2 %161 }
  0x9b   :  { %vm186_vm4 = vcmp.gt.f32.partialorder %v176_v41, 1e-06  ;;  %v180_v18 = vand.u32 2147483647, %v162_v15 }
  0x9c   :  { %v5400_v44 = vsel %vm186_vm4, 1.0, %v5066_v37  ;;  %vm188_vm7 = vcmp.gt.f32.partialorder %v178_v60, 1e-06 }
  0x9d   :  { %vm190_vm9 = vcmp.gt.f32.partialorder %v180_v18, 1e-06 }
  0x9e   :  { %v5461_v20 = vsel %vm190_vm9, 1.0, %v5066_v37 }
  0x9f   :  { %7263 = vst [vmem:[#allocation14_spill] sm:$0xff] %v5461_v20 }
  0xa0   :  { %v165_v49 = vpop.xlane.xlu0 %164 }
  0xa2   :  { %v280_v26 = vpop.f32.mrf.mxu0 }
  0xa3   :  { %v281_v27 = vadd.f32 %v5389_v25, %v280_v26 }
  0xa4   :  { %v5308_v48 = vpop.f32.mrf.mxu3 }
  0xa5   :  { %v305_v39 = vmul.f32 %v5393_v28, %v281_v27 }
  0xa7   :  { %v319_v45 = vadd.f32 %v5396_v40, %v305_v39 }
  0xa8   :  { %v174_v12 = vpop.xlane.xlu0 %173 }
  0xaa   :  { %v282_v42 = vpop.f32.mrf.mxu0 }
  0xab   :  { %v283_v43 = vadd.f32 %v5389_v25, %v282_v42 }
  0xac   :  { %v5312_v51 = vpop.f32.mrf.mxu3 }
  0xad   :  { %7256 = vst [vmem:[#allocation8_spill] sm:$0xff] %v5312_v51  ;;  %v306_v46 = vmul.f32 %v5400_v44, %v283_v43  ;;  %v121_v51 = vld [vmem:[%s7170_s15] sm:$0x3] }
  0xaf   :  { %v5405_v47 = vadd.f32 %v5396_v40, %v306_v46  ;;  %v168_v46 = vpop.xlane.xlu1 %167 }
  0xb1   :  { %v329_v52 = vpack.c.bf16 %v5405_v47, %v319_v45 }
  0xb2   :  { %v285_v53 = vpop.f32.mrf.mxu0 }
  0xb3   :  { %4277 = vmatmul.msk.bf16.vlgmr.msra.gmra.mxu1 %vm358_vm5, %v329_v52  ;;  %4282 = vmatmul.msk.bf16.vlgmr.msra.gmra.mxu2 %vm358_vm5, %v329_v52  ;;  %v286_v54 = vadd.f32 %v5389_v25, %v285_v53  ;;  %v182_v52 = vand.u32 2147483647, %v168_v46  ;;  %v181_v53 = vand.u32 2147483647, %v165_v49 }
  0xb4   :  { %v5322_v56 = vpop.f32.mrf.mxu3 }
  0xb5   :  { %v307_v59 = vmul.f32 %v5412_v55, %v286_v54  ;;  %vm192_vm10 = vcmp.gt.f32.partialorder %v182_v52, 1e-06  ;;  %vm191_vm11 = vcmp.gt.f32.partialorder %v181_v53, 1e-06 }
  0xb6   :  { %v5480_v57 = vsel %vm192_vm10, 1.0, %v5066_v37 }
  0xb7   :  { %7266 = vst [vmem:[#allocation17_spill] sm:$0xff] %v5480_v57 }
  0xbc   :  { %v527_v62 = vpop.f32.mrf.mxu3 }
  0xbd   :  { %v5339_v63 = vadd.f32 %v527_v62, %v7185_v61  ;;  %v287_v62 = vpop.f32.mrf.mxu0 }
  0xbe   :  { %v288_v0 = vadd.f32 %v5389_v25, %v287_v62 }
  0xbf   :  { %7258 = vst [vmem:[#allocation10_spill] sm:$0xff] %v5339_v63  ;;  %v7205_v63 = vperm.slane %v5328_v58, 0 }
  0xc4   :  { %v552_v2 = vpop.f32.mrf.mxu3 }
  0xc5   :  { %4321 = vmatpush.msk.msrb.mxu3 %vm562_vm1, %v552_v2  ;;  %v5420_v2 = vadd.f32 %v5396_v40, %v307_v59  ;;  %v290_v11 = vpop.f32.mrf.mxu0  ;;  %v5483_v59 = vsel %vm191_vm11, 1.0, %v5066_v37 }
  0xc6   :  { %4322 = vmatmul.msk.f32.vlgmr.msrb.gmra.mxu3 %vm555_vm2, %v93_v1  ;;  %v5417_v1 = vsel %vm188_vm7, 1.0, %v5066_v37  ;;  %v291_v13 = vadd.f32 %v5389_v25, %v290_v11  ;;  %7267 = vst [vmem:[#allocation18_spill] sm:$0xff] %v5483_v59  ;;  %v171_v11 = vpop.xlane.xlu2 %170 }
  0xc7   :  { %7260 = vst [vmem:[#allocation11_spill] sm:$0xff] %v5417_v1  ;;  %609 = vmatpush.msra.mxu3 %v5431_v6  ;;  %v183_v15 = vand.u32 2147483647, %v171_v11  ;;  %v7184_v18 = vrot.slane %v5417_v1, 4 }
  0xc8   :  { %v309_v17 = vmul.f32 %v5456_v14, %v291_v13 }
  0xc9   :  { %610 = vmatpush.msra.mxu3 %v5438_v7  ;;  %vm193_vm12 = vcmp.gt.f32.partialorder %v183_v15, 1e-06 }
  0xca   :  { %v5464_v21 = vadd.f32 %v5396_v40, %v309_v17  ;;  %v1607_v17 = vrot.slane %v5412_v55, 4 }
  0xcb   :  { %611 = vmatpush.msra.mxu3 %v5444_v8 }
  0xcc   :  { %7264 = vst [vmem:[#allocation15_spill] sm:$0xff] %v5464_v21 }
  0xcd   :  { %612 = vmatpush.msra.mxu3 %v5451_v9  ;;  %v292_v16 = vpop.f32.mrf.mxu0 }
  0xce   :  { %4323 = vmatmul.msk.f32.gmra.mxu3 %vm555_vm2, %v94_v3  ;;  %v308_v3 = vmul.f32 %v5417_v1, %v288_v0  ;;  %v293_v19 = vadd.f32 %v5389_v25, %v292_v16  ;;  %v184_v16 = vand.u32 2147483647, %v174_v12 }
  0xd0   :  { %v5424_v4 = vadd.f32 %v5396_v40, %v308_v3  ;;  %v310_v22 = vmul.f32 %v5461_v20, %v293_v19  ;;  %vm194_vm13 = vcmp.gt.f32.partialorder %v184_v16, 1e-06  ;;  %v5501_v19 = vsel %vm193_vm12, 1.0, %v5066_v37 }
  0xd1   :  { %7270 = vst [vmem:[#allocation21_spill] sm:$0xff] %v5501_v19  ;;  %vm711_vm12 = vcmask 1044480  }
  0xd2   :  { %7261 = vst [vmem:[#allocation12_spill] sm:$0xff] %v5424_v4  ;;  %v330_v5 = vpack.c.bf16 %v5424_v4, %v5420_v2  ;;  %v5468_v26 = vadd.f32 %v5396_v40, %v310_v22 }
  0xd4   :  { %4278 = vmatmul.msk.bf16.gmra.mxu1 %vm358_vm5, %v330_v5  ;;  %4283 = vmatmul.msk.bf16.gmra.mxu2 %vm358_vm5, %v330_v5  ;;  %7265 = vst [vmem:[#allocation16_spill] sm:$0xff] %v5468_v26  ;;  %v331_v27 = vpack.c.bf16 %v5468_v26, %v5464_v21  ;;  %v4649_v21 = vld [vmem:[%s7169_s14 + $0x44] sm:$0xf0] }
  0xd5   :  { %v295_v43 = vpop.f32.mrf.mxu0 }
  0xd6   :  { %v296_v50 = vadd.f32 %v5389_v25, %v295_v43  ;;  %v7183_v43 = vrot.slane %v5456_v14, 6 }
  0xd8   :  { %v311_v60 = vmul.f32 %v5483_v59, %v296_v50  ;;  %v3298_v50 = vrot.slane %v5480_v57, 4  ;;  %v7301_v59 = vperm.slane %v5328_v58, 1  ;;  %v4383_v58 = vld [vmem:[%s7169_s14 + $0x50] sm:$0xf] }
  0xda   :  { %v5488_v0 = vadd.f32 %v5396_v40, %v311_v60  ;;  %v5729_v20 = vadd.f32 %v5322_v56, %v7301_v59 }
  0xdc   :  { %7268 = vst [vmem:[#allocation19_spill] sm:$0xff] %v5488_v0 }
  0xdd   :  { %7302 = vst [vmem:[#allocation50_spill] sm:$0xff] %v5729_v20 }
  0xe4   :  { %4279 = vmatmul.msk.bf16.gmra.mxu1 %vm358_vm5, %v331_v27  ;;  %4284 = vmatmul.msk.bf16.gmra.mxu2 %vm358_vm5, %v331_v27 }
 0x149   :  { %v583_v23 = vpop.f32.mrf.mxu3 }
 0x14a   :  { %v584_v24 = vadd.f32 %v583_v23, %v319_v45  ;;  %v297_v45 = vpop.f32.mrf.mxu0  ;;  %v5505_v23 = vsel %vm194_vm13, 1.0, %v5066_v37 }
 0x14b   :  { %v298_v54 = vadd.f32 %v5389_v25, %v297_v45  ;;  %7271 = vst [vmem:[#allocation22_spill] sm:$0xff] %v5505_v23 }
 0x14c   :  { %4669 = vtanh.f32 %v584_v24 }
 0x14d   :  { %v312_v62 = vmul.f32 %v5480_v57, %v298_v54 }
 0x14f   :  { %v5491_v3 = vadd.f32 %v5396_v40, %v312_v62  ;;  %v3729_v62 = vrot.slane %v5501_v19, 6 }
 0x151   :  { %v586_v38 = vpop.f32.mrf.mxu3  ;;  %7269 = vst [vmem:[#allocation20_spill] sm:$0xff] %v5491_v3  ;;  %v332_v5 = vpack.c.bf16 %v5491_v3, %v5488_v0  ;;  %v3235_v46 = vrot.slane %v5491_v3, 4 }
 0x152   :  { %v4670_v39 = vpop.eup %4669  ;;  %v587_v41 = vadd.f32 %v586_v38, %v5405_v47  ;;  %v300_v10 = vpop.f32.mrf.mxu0  ;;  %v5511_v38 = vsel %vm7236_vm14, %v1607_v17, %v7184_v18 }
 0x153   :  { %4324 = vmatmul.msk.f32.vlgmr.msra.gmra.mxu3 %vm358_vm5, %v4670_v39  ;;  %4280 = vmatmul.msk.bf16.gmra.mxu1 %vm358_vm5, %v332_v5  ;;  %v301_v13 = vadd.f32 %v5389_v25, %v300_v10  ;;  %7272 = vst [vmem:[#allocation23_spill] sm:$0xff] %v5511_v38  ;;  %v4641_v38 = vld [vmem:[#allocation4 + $0x4] sm:$0xf0] }
 0x154   :  { %4671 = vtanh.f32 %v587_v41  ;;  %4285 = vmatmul.msk.bf16.gmra.mxu2 %vm358_vm5, %v332_v5  ;;  %v7179_v5 = vrot.slane %v5505_v23, 6 }
 0x155   :  { %v313_v22 = vmul.f32 %v5501_v19, %v301_v13 }
 0x156   :  { %v5557_v11 = vsel %vm562_vm1, %v3729_v62, %v7179_v5 }
 0x157   :  { %v5514_v39 = vadd.f32 %v5396_v40, %v313_v22  ;;  %7279 = vst [vmem:[#allocation30_spill] sm:$0xff] %v5557_v11 }
 0x159   :  { %7273 = vst [vmem:[#allocation24_spill] sm:$0xff] %v5514_v39  ;;  %v7182_v49 = vrot.slane %v5514_v39, 4  ;;  %v3666_v54 = vrot.slane %v5514_v39, 6 }
 0x15a   :  { %v4672_v42 = vpop.eup %4671  ;;  %v302_v24 = vpop.f32.mrf.mxu0 }
 0x15b   :  { %4325 = vmatmul.msk.f32.gmra.mxu3 %vm358_vm5, %v4672_v42  ;;  %v303_v27 = vadd.f32 %v5389_v25, %v302_v24  ;;  %v2038_v42 = vrot.slane %v5417_v1, 6  ;;  %v5538_v52 = vsel %vm7236_vm14, %v3235_v46, %v7182_v49  ;;  %v4407_v1 = vld [vmem:[#allocation4] sm:$0xf] }
 0x15c   :  { %7276 = vst [vmem:[#allocation27_spill] sm:$0xff] %v5538_v52 }
 0x15d   :  { %v314_v41 = vmul.f32 %v5505_v23, %v303_v27  ;;  %v5529_v45 = vsel %vm562_vm1, %v2038_v42, %v7183_v43  ;;  %v5565_v27 = vld [vmem:[%s7159_s4] sm:$0xff]  ;;  %v5576_v42 = vpop.f32.mrf.mxu1 }
 0x15e   :  { %7275 = vst [vmem:[#allocation26_spill] sm:$0xff] %v5529_v45  ;;  %v4375_v45 = vld [vmem:[%s7169_s14 + $0x40] sm:$0xf] }
 0x15f   :  { %v5520_v37 = vadd.f32 %v5396_v40, %v314_v41  ;;  %v7181_v40 = vrot.slane %v5501_v19, 4 }
 0x161   :  { %7274 = vst [vmem:[#allocation25_spill] sm:$0xff] %v5520_v37  ;;  %v333_v25 = vpack.c.bf16 %v5520_v37, %v5514_v39  ;;  %v5543_v53 = vsel %vm7236_vm14, %v3298_v50, %v7181_v40  ;;  %v7180_v60 = vrot.slane %v5520_v37, 6 }
 0x162   :  { %7277 = vst [vmem:[#allocation28_spill] sm:$0xff] %v5543_v53 }
 0x163   :  { %4281 = vmatmul.msk.bf16.gmra.mxu1 %vm358_vm5, %v333_v25  ;;  %v5552_v10 = vsel %vm562_vm1, %v3666_v54, %v7180_v60 }
 0x164   :  { %4286 = vmatmul.msk.bf16.gmra.mxu2 %vm358_vm5, %v333_v25  ;;  %7278 = vst [vmem:[#allocation29_spill] sm:$0xff] %v5552_v10 }
 0x165   :  { %v5578_v25 = vpop.f32.mrf.mxu1 }
 0x16d   :  { %v5580_v46 = vpop.f32.mrf.mxu1 }
 0x175   :  { %v5582_v50 = vpop.f32.mrf.mxu1 }
 0x176   :  { %7280 = vst [vmem:[#allocation31_spill] sm:$0xff] %v5582_v50  ;;  %v4417_v50 = vld [vmem:[#allocation4 + $0x18] sm:$0xf0] }
 0x17d   :  { %v5584_v54 = vpop.f32.mrf.mxu1 }
 0x17e   :  { %7281 = vst [vmem:[#allocation32_spill] sm:$0xff] %v5584_v54 }
 0x185   :  { %v5586_v62 = vpop.f32.mrf.mxu1 }
 0x186   :  { %7282 = vst [vmem:[#allocation33_spill] sm:$0xff] %v5586_v62 }
 0x1d6   :  { %v614_v12 = vpop.f32.mrf.mxu3 }
 0x1d7   :  { %v620_v13 = vmul.f32 %v5393_v28, %v614_v12  ;;  %v5572_v28 = vld [vmem:[%s7159_s4 + $0x8] sm:$0x3]  ;;  %v5588_v12 = vpop.f32.mrf.mxu1 }
 0x1d8   :  { %7283 = vst [vmem:[#allocation34_spill] sm:$0xff] %v5588_v12  ;;  %v5720_v12 = vadd.f32 %v5308_v48, %v7205_v63 }
 0x1d9   :  { %v622_v17 = vmul.f32 1.442695, %v620_v13 }
 0x1da   :  { %7299 = vst [vmem:[#allocation48_spill] sm:$0xff] %v5720_v12 }
 0x1de   :  { %v617_v15 = vpop.f32.mrf.mxu3 }
 0x1df   :  { %v621_v16 = vmul.f32 %v5400_v44, %v617_v15  ;;  %v5590_v13 = vpop.f32.mrf.mxu1 }
 0x1e0   :  { %7284 = vst [vmem:[#allocation35_spill] sm:$0xff] %v5590_v13  ;;  %v5691_v13 = vld [vmem:[%s7291_s7] sm:$0x1] }
 0x1e1   :  { %v624_v22 = vmul.f32 1.442695, %v621_v16  ;;  %v7188_v16 = vmov 0  }
 0x1e2   :  { %4663 = vset.pattern.permute.xlu1 %v7188_v16  ;;  %4664 = vset.pattern.permute.xlu2 %v7188_v16 }
 0x1e3   :  { %4673 = vpow2.f32 %v624_v22  ;;  %4665 = vset.pattern.permute.xlu0 %v7188_v16 }
 0x1e4   :  { %4675 = vpow2.f32 %v622_v17 }
 0x1e7   :  { %v5592_v15 = vpop.f32.mrf.mxu1 }
 0x1e8   :  { %7285 = vst [vmem:[#allocation36_spill] sm:$0xff] %v5592_v15 }
 0x1e9   :  { %v4674_v24 = vpop.eup %4673 }
 0x1ea   :  { %4326 = vmatpush.msk.msrb.mxu1 %vm562_vm1, %v4674_v24  ;;  %v4676_v41 = vpop.eup %4675 }
 0x1ec   :  { %651 = vmatpush.msrb.mxu1 %v4676_v41 }
 0x1ed   :  { %4327 = vmatmul.msk.f32.vlgmr.msrb.gmra.mxu1 %vm626_vm15, %v5565_v27 }
 0x1ef   :  { %v5597_v17 = vpop.f32.mrf.mxu1 }
 0x1f0   :  { %7286 = vst [vmem:[#allocation37_spill] sm:$0xff] %v5597_v17 }
 0x1f5   :  { %4328 = vmatmul.msk.f32.gmra.mxu1 %vm626_vm15, %v5572_v28 }
 0x26a   :  { %v653_v22 = vpop.f32.mrf.mxu1 }
 0x26b   :  { %4677 = vrcp.f32 %v653_v22  ;;  %v670_v43 = vand.u32 2147483648, %v653_v22  ;;  %v668_v61 = vand.u32 2147483647, %v653_v22  ;;  %vm664_vm4 = vweird.f32 %v653_v22 }
 0x26d   :  { %v671_v37 = vor.u32 1.1754944e-38, %v670_v43  ;;  %vm669_vm7 = vcmp.eq.f32.partialorder %v668_v61, 8.507059e+37  ;;  %v4357_v61 = vld [vmem:[%s7169_s14 + $0x30] sm:$0xf] }
 0x271   :  { %v4678_v5 = vpop.eup %4677 }
 0x272   :  { %v660_v60 = vmul.f32 %v4678_v5, %v653_v22  ;;  %v656_v40 = vpop.f32.mrf.mxu1  ;;  %vm665_vm3 = vweird.f32 %v4678_v5 }
 0x273   :  { %4679 = vrcp.f32 %v656_v40  ;;  %vm666_vm6 = vmor %vm664_vm4, %vm665_vm3  ;;  %vm679_vm8 = vweird.f32 %v656_v40  ;;  %v685_v15 = vand.u32 2147483648, %v656_v40  ;;  %v683_v39 = vand.u32 2147483647, %v656_v40 }
 0x274   :  { %v661_v49 = vsub.f32 1.0, %v660_v60 }
 0x275   :  { %vm684_vm11 = vcmp.eq.f32.partialorder %v683_v39, 8.507059e+37  ;;  %v4637_v39 = vld [vmem:[%s7169_s14 + $0x24] sm:$0xf0] }
 0x276   :  { %v662_v18 = vmul.f32 %v4678_v5, %v661_v49  ;;  %v686_v49 = vor.u32 1.1754944e-38, %v685_v15  ;;  %v4351_v15 = vld [vmem:[%s7169_s14 + $0x28] sm:$0xf0] }
 0x278   :  { %v663_v23 = vadd.f32 %v4678_v5, %v662_v18 }
 0x279   :  { %v4680_v11 = vpop.eup %4679 }
 0x27a   :  { %v675_v10 = vmul.f32 %v4680_v11, %v656_v40  ;;  %v667_v16 = vsel %vm666_vm6, %v4678_v5, %v663_v23  ;;  %vm680_vm9 = vweird.f32 %v4680_v11  ;;  %v4639_v23 = vld [vmem:[%s7169_s14 + $0x34] sm:$0xf0]  ;;  %v4341_v5 = vld [vmem:[%s7169_s14 + $0x10] sm:$0xf] }
 0x27b   :  { %v672_v17 = vsel %vm669_vm7, %v671_v37, %v667_v16  ;;  %vm681_vm10 = vmor %vm679_vm8, %vm680_vm9  ;;  %v5605_v37 = vor.u32 %v4639_v23, %v4357_v61  ;;  %v4632_v61 = vld [vmem:[%s7169_s14 + $0x4] sm:$0xf]  ;;  %v4335_v23 = vld [vmem:[%s7169_s14 + $0x8] sm:$0xf0] }
 0x27c   :  { %v676_v19 = vsub.f32 1.0, %v675_v10  ;;  %v673_v53 = vmul.f32 %v4676_v41, %v672_v17  ;;  %v4636_v41 = vld [vmem:[%s7169_s14 + $0x24] sm:$0xf]  ;;  %v4333_v17 = vld [vmem:[%s7169_s14] sm:$0xf] }
 0x27d   :  { %801 = vmatpush.bf16.msrb.mxu0 %v5605_v37  ;;  %v5641_v16 = vor.u32 %v4636_v41, %v4351_v15 }
 0x27e   :  { %692 = vperm.xlu1 %4663, %v673_v53   ;;  %v677_v60 = vmul.f32 %v4680_v11, %v676_v19  ;;  %v4349_v19 = vld [vmem:[%s7169_s14 + $0x20] sm:$0xf]  ;;  %v4359_v53 = vld [vmem:[%s7169_s14 + $0x38] sm:$0xf0] }
 0x27f   :  { %v5614_v40 = vor.u32 %v4637_v39, %v4349_v19  ;;  %v5668_v19 = vor.u32 %v4632_v61, %v4335_v23  ;;  %v7288_v39 = vmov 0  }
 0x280   :  { %v678_v52 = vadd.f32 %v4680_v11, %v677_v60  ;;  %v4633_v60 = vld [vmem:[%s7169_s14 + $0x4] sm:$0xf0] }
 0x281   :  { %802 = vmatpush.bf16.msrb.mxu0 %v5614_v40  ;;  %7287 = vst [vmem:[#allocation38_spill] sm:$0xff] %v5668_v19 }
 0x282   :  { %v682_v18 = vsel %vm681_vm10, %v4680_v11, %v678_v52  ;;  %v4638_v52 = vld [vmem:[%s7169_s14 + $0x34] sm:$0xf]  ;;  %v4635_v11 = vld [vmem:[%s7169_s14 + $0x14] sm:$0xf0] }
 0x283   :  { %v687_v22 = vsel %vm684_vm11, %v686_v49, %v682_v18  ;;  %v5626_v10 = vor.u32 %v4638_v52, %v4359_v53  ;;  %v5649_v49 = vor.u32 %v4633_v60, %v4333_v17  ;;  %v4634_v18 = vld [vmem:[%s7169_s14 + $0x14] sm:$0xf]  ;;  %v417_v52 = vpop.f32.mrf.mxu2 }
 0x284   :  { %v688_v43 = vmul.f32 %v4674_v24, %v687_v22  ;;  %v5631_v24 = vor.u32 %v4635_v11, %v4341_v5  ;;  %v4343_v22 = vld [vmem:[%s7169_s14 + $0x18] sm:$0xf0] }
 0x285   :  { %814 = vmatpush.bf16.msra.mxu1 %v5626_v10 }
 0x286   :  { %697 = vperm.xlu2 %4664, %v688_v43   ;;  %803 = vmatpush.bf16.msrb.mxu0 %v5631_v24  ;;  %v5659_v43 = vor.u32 %v4634_v18, %v4343_v22 }
 0x289   :  { %815 = vmatpush.bf16.msra.mxu1 %v5641_v16 }
 0x28a   :  { %804 = vmatpush.bf16.msrb.mxu0 %v5649_v49 }
 0x28b   :  { %v5675_v5 = vpop.f32.mrf.mxu2 }
 0x28d   :  { %816 = vmatpush.bf16.msra.mxu1 %v5659_v43  ;;  %805 = vmatmul.bf16.vlgmr.msrb.gmra.mxu0 %v7288_v39 }
 0x291   :  { %817 = vmatpush.bf16.msra.mxu1 %v5668_v19 }
 0x294   :  { %818 = vmatmul.bf16.vlgmr.msra.gmra.mxu1 %v7288_v39 }
 0x2e0   :  { %v5673_v53 = vpop.permute.xlu2 %697 }
 0x2e1   :  { %7289 = vst [vmem:[#allocation39_spill] sm:$0xff] %v5673_v53  ;;  %v704_v41 = vmul.f32 %v5673_v53, %v5578_v25  ;;  %v705_v15 = vmul.f32 %v5673_v53, %v5675_v5 }
 0x2f0   :  { %v5677_v11 = vpop.permute.xlu1 %692 }
 0x2f1   :  { %7290 = vst [vmem:[#allocation40_spill] sm:$0xff] %v5677_v11  ;;  %v702_v17 = vmul.f32 %v5677_v11, %v5576_v42  ;;  %v703_v60 = vmul.f32 %v5677_v11, %v417_v52  ;;  %v5697_v42 = vpop.f32.mrf.mxu2 }
 0x2f3   :  { %v706_v18 = vpack.c.bf16 %v704_v41, %v702_v17  ;;  %v707_v22 = vpack.c.bf16 %v705_v15, %v703_v60 }
 0x2f5   :  { %v713_v61 = vsel %vm711_vm12, %v706_v18, 0  ;;  %v716_v23 = vsel %vm711_vm12, %v707_v22, 0 }
 0x2f6   :  { %725 = vmatpush.bf16.msrb.mxu2 %v713_v61  ;;  %738 = vmatpush.bf16.msrb.mxu3 %v716_v23 }
 0x2f9   :  { %4329 = vmatmul.msk.bf16.vlgmr.msrb.gmra.mxu2 %vm626_vm15, %v5691_v13  ;;  %4330 = vmatmul.msk.bf16.vlgmr.msrb.gmra.mxu3 %vm626_vm15, %v5691_v13  ;;  %v5699_v52 = vpop.f32.mrf.mxu2 }
 0x2fa   :  { %7292 = vst [vmem:[#allocation41_spill] sm:$0xff] %v5699_v52  ;;  %v4415_v52 = vld [vmem:[#allocation4 + $0x10] sm:$0xf] }
 0x301   :  { %v5701_v41 = vpop.f32.mrf.mxu2 }
 0x302   :  { %7293 = vst [vmem:[#allocation42_spill] sm:$0xff] %v5701_v41 }
 0x309   :  { %v5703_v15 = vpop.f32.mrf.mxu2 }
 0x30a   :  { %7294 = vst [vmem:[#allocation43_spill] sm:$0xff] %v5703_v15  ;;  %v806_v17 = vpop.f32.mrf.mxu0 }
 0x311   :  { %v5705_v60 = vpop.f32.mrf.mxu2  ;;  %v819_v18 = vpop.f32.mrf.mxu1 }
 0x312   :  { %7295 = vst [vmem:[#allocation44_spill] sm:$0xff] %v5705_v60  ;;  %v808_v22 = vpop.f32.mrf.mxu0 }
 0x319   :  { %v5707_v61 = vpop.f32.mrf.mxu2  ;;  %v821_v23 = vpop.f32.mrf.mxu1 }
 0x31a   :  { %7296 = vst [vmem:[#allocation45_spill] sm:$0xff] %v5707_v61  ;;  %v5723_v23 = vperm.slane %v121_v51, 0 }
 0x31c   :  { %7300 = vst [vmem:[#allocation49_spill] sm:$0xff] %v5723_v23 }
 0x321   :  { %v5709_v57 = vpop.f32.mrf.mxu2 }
 0x322   :  { %7297 = vst [vmem:[#allocation46_spill] sm:$0xff] %v5709_v57 }
 0x329   :  { %v5711_v3 = vpop.f32.mrf.mxu2 }
 0x32a   :  { %7298 = vst [vmem:[#allocation47_spill] sm:$0xff] %v5711_v3 }
 0x37c   :  { %v727_v60 = vpop.f32.mrf.mxu2  ;;  %v740_v22 = vpop.f32.mrf.mxu3 }
 0x37d   :  { %v744_v61 = vadd.f32 %v727_v60, %v5720_v12  ;;  %v745_v63 = vadd.f32 %v740_v22, %v5729_v20  ;;  %v5732_v60 = vperm.slane %v121_v51, 1  ;;  %v4640_v20 = vld [vmem:[#allocation4 + $0x4] sm:$0xf] }
 0x37f   :  { %v823_v57 = vadd.f32 %v806_v17, %v744_v61  ;;  %7303 = vst [vmem:[#allocation51_spill] sm:$0xff] %v5732_v60  ;;  %v824_v26 = vadd.f32 %v819_v18, %v745_v63 }
 0x381   :  { %v825_v3 = vadd.f32 %v823_v57, %v5723_v23  ;;  %v826_v57 = vadd.f32 %v824_v26, %v5732_v60  ;;  %v4409_v23 = vld [vmem:[#allocation4 + $0x8] sm:$0xf0] }
 0x383   :  { %v4363_v15 = vmul.f32 -1.442695, %v825_v3  ;;  %v4364_v26 = vmul.f32 -1.442695, %v826_v57 }
 0x384   :  { %v729_v62 = vpop.f32.mrf.mxu2  ;;  %v742_v53 = vpop.f32.mrf.mxu3 }
 0x385   :  { %4681 = vpow2.f32 %v4363_v15 }
 0x38b   :  { %v4682_v48 = vpop.eup %4681 }
 0x38c   :  { %v830_v0 = vadd.f32 1.0, %v4682_v48 }
 0x38e   :  { %4683 = vrcp.f32 %v830_v0  ;;  %v842_v53 = vand.u32 2147483648, %v830_v0  ;;  %v840_v61 = vand.u32 2147483647, %v830_v0  ;;  %vm836_vm3 = vweird.f32 %v830_v0 }
 0x38f   :  { %4685 = vtanh.f32 %v826_v57  ;;  %v4401_v57 = vld [vmem:[%s7169_s14 + $0x78] sm:$0xf0] }
 0x390   :  { %v843_v59 = vor.u32 1.1754944e-38, %v842_v53  ;;  %vm841_vm6 = vcmp.eq.f32.partialorder %v840_v61, 8.507059e+37  ;;  %4687 = vpow2.f32 %v4364_v26  ;;  %v4653_v61 = vld [vmem:[%s7169_s14 + $0x64] sm:$0xf0]  ;;  %v4647_v26 = vld [vmem:[#allocation4 + $0x34] sm:$0xf0] }
 0x394   :  { %v4684_v17 = vpop.eup %4683 }
 0x395   :  { %v832_v3 = vmul.f32 %v4684_v17, %v830_v0  ;;  %vm837_vm13 = vweird.f32 %v4684_v17  ;;  %v4686_v48 = vpop.eup %4685  ;;  %v4399_v0 = vld [vmem:[%s7169_s14 + $0x70] sm:$0xf] }
 0x396   :  { %vm838_vm4 = vmor %vm836_vm3, %vm837_vm13  ;;  %v4688_v18 = vpop.eup %4687 }
 0x397   :  { %v833_v62 = vsub.f32 1.0, %v832_v3  ;;  %v5739_v3 = vadd.f32 1.0, %v4688_v18  ;;  %v4646_v18 = vld [vmem:[#allocation4 + $0x34] sm:$0xf] }
 0x399   :  { %v834_v15 = vmul.f32 %v4684_v17, %v833_v62  ;;  %4689 = vrcp.f32 %v5739_v3  ;;  %v4654_v62 = vld [vmem:[%s7169_s14 + $0x74] sm:$0xf]  ;;  %vm856_vm8 = vweird.f32 %v5739_v3 }
 0x39b   :  { %v835_v56 = vadd.f32 %v4684_v17, %v834_v15  ;;  %v4391_v15 = vld [vmem:[%s7169_s14 + $0x60] sm:$0xf] }
 0x39d   :  { %v839_v22 = vsel %vm838_vm4, %v4684_v17, %v835_v56  ;;  %v4655_v17 = vld [vmem:[%s7169_s14 + $0x74] sm:$0xf0]  ;;  %v5762_v56 = vor.u32 %v4654_v62, %v4401_v57 }
 0x39e   :  { %v5735_v51 = vsel %vm841_vm6, %v843_v59, %v839_v22  ;;  %v5751_v53 = vor.u32 %v4655_v17, %v4399_v0  ;;  %v4652_v59 = vld [vmem:[%s7169_s14 + $0x64] sm:$0xf]  ;;  %v4393_v22 = vld [vmem:[%s7169_s14 + $0x68] sm:$0xf0]  ;;  %v4433_v0 = vld [vmem:[#allocation4 + $0x38] sm:$0xf0] }
 0x39f   :  { %v867_v63 = vmul.f32 %v4686_v48, %v5735_v51  ;;  %v4431_v48 = vld [vmem:[#allocation4 + $0x30] sm:$0xf]  ;;  %950 = vmatpush.bf16.msra.mxu3 %v5762_v56  ;;  %v5774_v17 = vor.u32 %v4652_v59, %v4393_v22  ;;  %v5778_v57 = vor.u32 %v4646_v18, %v4433_v0  ;;  %v5789_v41 = vpop.eup %4689  ;;  %v4385_v59 = vld [vmem:[%s7169_s14 + $0x58] sm:$0xf0]  ;;  %v4423_v22 = vld [vmem:[#allocation4 + $0x20] sm:$0xf] }
 0x3a0   :  { %937 = vmatpush.bf16.msra.mxu2 %v5751_v53  ;;  %v5776_v62 = vor.u32 %v4647_v26, %v4431_v48  ;;  %v4645_v48 = vld [vmem:[#allocation4 + $0x24] sm:$0xf0]  ;;  %v4644_v18 = vld [vmem:[#allocation4 + $0x24] sm:$0xf]  ;;  %v4425_v0 = vld [vmem:[#allocation4 + $0x28] sm:$0xf0]  ;;  %vm857_vm7 = vweird.f32 %v5789_v41 }
 0x3a1   :  { %869 = vrot.lane.b32.xlu0 %v867_v63, %s5068_s29  ;;  %v5771_v63 = vor.u32 %v4653_v61, %v4391_v15  ;;  %7304 = vst [vmem:[#allocation52_spill] sm:$0xff] %v5778_v57  ;;  %v4651_v15 = vld [vmem:[%s7169_s14 + $0x54] sm:$0xf0]  ;;  %v4650_v61 = vld [vmem:[%s7169_s14 + $0x54] sm:$0xf]  ;;  %1022 = vmatpush.bf16.msrb.mxu1 %v5778_v57  ;;  %v5796_v26 = vor.u32 %v4645_v48, %v4423_v22  ;;  %vm858_vm9 = vmor %vm856_vm8, %vm857_vm7 }
 0x3a2   :  { %1009 = vmatpush.bf16.msra.mxu0 %v5776_v62  ;;  %v5799_v54 = vor.u32 %v4651_v15, %v4383_v58  ;;  %v5801_v14 = vor.u32 %v4644_v18, %v4425_v0  ;;  %v852_v22 = vmul.f32 %v5789_v41, %v5739_v3  ;;  %v5812_v48 = vor.u32 %v4650_v61, %v4385_v59  ;;  %v4643_v58 = vld [vmem:[#allocation4 + $0x14] sm:$0xf0]  ;;  %v4642_v15 = vld [vmem:[#allocation4 + $0x14] sm:$0xf]  ;;  %v4648_v18 = vld [vmem:[%s7169_s14 + $0x44] sm:$0xf] }
 0x3a3   :  { %951 = vmatpush.bf16.msra.mxu3 %v5774_v17  ;;  %v4377_v0 = vld [vmem:[%s7169_s14 + $0x48] sm:$0xf0]  ;;  %v5822_v11 = vor.u32 %v4643_v58, %v4415_v52  ;;  %v5824_v61 = vor.u32 %v4642_v15, %v4417_v50  ;;  %v5827_v59 = vor.u32 %v4649_v21, %v4375_v45  ;;  %v5834_v52 = vor.u32 %v4641_v38, %v4407_v1 }
 0x3a4   :  { %938 = vmatpush.bf16.msra.mxu2 %v5771_v63  ;;  %7305 = vst [vmem:[#allocation53_spill] sm:$0xff] %v5801_v14  ;;  %v853_v4 = vsub.f32 1.0, %v852_v22  ;;  %v5830_v60 = vor.u32 %v4648_v18, %v4377_v0  ;;  %v5837_v50 = vor.u32 %v4640_v20, %v4409_v23  ;;  %v866_v45 = vmul.f32 0.0, %v5735_v51 }
 0x3a5   :  { %1023 = vmatpush.bf16.msrb.mxu1 %v5801_v14  ;;  %7306 = vst [vmem:[#allocation54_spill] sm:$0xff] %v5824_v61 }
 0x3a6   :  { %1010 = vmatpush.bf16.msra.mxu0 %v5796_v26  ;;  %7307 = vst [vmem:[#allocation55_spill] sm:$0xff] %v5837_v50  ;;  %v854_v21 = vmul.f32 %v5789_v41, %v853_v4  ;;  %v860_v4 = vand.u32 2147483647, %v5739_v3 }
 0x3a7   :  { %952 = vmatpush.bf16.msra.mxu3 %v5812_v48 }
 0x3a8   :  { %939 = vmatpush.bf16.msra.mxu2 %v5799_v54  ;;  %v855_v1 = vadd.f32 %v5789_v41, %v854_v21  ;;  %vm861_vm10 = vcmp.eq.f32.partialorder %v860_v4, 8.507059e+37 }
 0x3a9   :  { %1024 = vmatpush.bf16.msrb.mxu1 %v5824_v61 }
 0x3aa   :  { %1011 = vmatpush.bf16.msra.mxu0 %v5822_v11  ;;  %v859_v20 = vsel %vm858_vm9, %v5789_v41, %v855_v1  ;;  %v4229_v41 = vld [vmem:[%s7170_s15 + $0x2] sm:$0x3] }
 0x3ab   :  { %953 = vmatpush.bf16.msra.mxu3 %v5830_v60  ;;  %v5881_v51 = vperm.slane %v4229_v41, 0  ;;  %v5884_v4 = vperm.slane %v4229_v41, 1 }
 0x3ac   :  { %940 = vmatpush.bf16.msra.mxu2 %v5827_v59 }
 0x3ad   :  { %1025 = vmatpush.bf16.msrb.mxu1 %v5837_v50 }
 0x3ae   :  { %1012 = vmatpush.bf16.msra.mxu0 %v5834_v52  ;;  %954 = vmatmul.bf16.vlgmr.msra.gmra.mxu3 %v7288_v39 }
 0x3af   :  { %941 = vmatmul.bf16.vlgmr.msra.gmra.mxu2 %v7288_v39 }
 0x3b0   :  { %1094 = vmatpush.msrb.mxu2 %v5239_v29  ;;  %v862_v29 = vand.u32 2147483648, %v5739_v3 }
 0x3b2   :  { %1095 = vmatpush.msrb.mxu2 %v5244_v30  ;;  %1160 = vmatpush.msrb.mxu0 %v5431_v6  ;;  %v863_v30 = vor.u32 1.1754944e-38, %v862_v29 }
 0x3b4   :  { %1096 = vmatpush.msrb.mxu2 %v5250_v31  ;;  %1161 = vmatpush.msrb.mxu0 %v5438_v7  ;;  %v864_v39 = vsel %vm861_vm10, %v863_v30, %v859_v20  ;;  %vm7237_vm10 = vcmask 1045504  }
 0x3b6   :  { %1097 = vmatpush.msrb.mxu2 %v5256_v32  ;;  %1162 = vmatpush.msrb.mxu0 %v5444_v8 }
 0x3b8   :  { %1098 = vmatpush.msrb.mxu2 %v5263_v33  ;;  %1163 = vmatpush.msrb.mxu0 %v5451_v9 }
 0x3ba   :  { %1099 = vmatpush.msrb.mxu2 %v5269_v34 }
 0x3bc   :  { %1100 = vmatpush.msrb.mxu2 %v5275_v35 }
 0x3be   :  { %1101 = vmatpush.msrb.mxu2 %v5281_v36 }
 0x413   :  { %v870_v22 = vpop.permute.xlu0 %869 }
 0x414   :  { %v5845_v58 = vadd.f32 %v870_v22, %v866_v45 }
 0x416   :  { %4691 = vtanh.f32 %v5845_v58 }
 0x41c   :  { %v4692_v38 = vpop.eup %4691 }
 0x41d   :  { %v874_v23 = vmul.f32 %v4692_v38, %v864_v39 }
 0x41f   :  { %v875_v31 = vpack.c.bf16 %v874_v23, %v874_v23 }
 0x421   :  { %960 = vrot.lane.b32.xlu2 %v875_v31, %s5068_s29 }
 0x431   :  { %v955_v34 = vpop.f32.mrf.mxu3 }
 0x432   :  { %v942_v33 = vpop.f32.mrf.mxu2 }
 0x439   :  { %v957_v36 = vpop.f32.mrf.mxu3 }
 0x43a   :  { %v944_v35 = vpop.f32.mrf.mxu2 }
 0x47b   :  { %v5868_v32 = vpop.permute.xlu2 %960 }
 0x47c   :  { %4437 = vmatmul.msk.bf16.vlgmr.msra.gmra.mxu0 %vm144_vm0, %v5868_v32  ;;  %4438 = vmatmul.msk.bf16.vlgmr.msrb.gmra.mxu1 %vm144_vm0, %v5868_v32 }
 0x47d   :  { %1317 = vmatpush.bf16.msra.mxu0 %v5605_v37 }
 0x481   :  { %1318 = vmatpush.bf16.msra.mxu0 %v5614_v40 }
 0x485   :  { %1319 = vmatpush.bf16.msra.mxu0 %v5631_v24 }
 0x489   :  { %1320 = vmatpush.bf16.msra.mxu0 %v5649_v49 }
 0x4f9   :  { %v1014_v3 = vpop.f32.mrf.mxu0  ;;  %v1027_v15 = vpop.f32.mrf.mxu1 }
 0x4fa   :  { %v1015_v18 = vadd.f32 %v1014_v3, %v942_v33  ;;  %v1028_v20 = vadd.f32 %v1027_v15, %v955_v34 }
 0x4fc   :  { %v1031_v0 = vadd.f32 %v1015_v18, %v5881_v51  ;;  %v1032_v38 = vadd.f32 %v1028_v20, %v5884_v4 }
 0x4fe   :  { %v4439_v21 = vmul.f32 -1.442695, %v1031_v0  ;;  %v4440_v34 = vmul.f32 -1.442695, %v1032_v38 }
 0x500   :  { %4693 = vpow2.f32 %v4439_v21 }
 0x501   :  { %v1016_v45 = vpop.f32.mrf.mxu0  ;;  %v1029_v22 = vpop.f32.mrf.mxu1 }
 0x506   :  { %v4694_v1 = vpop.eup %4693 }
 0x507   :  { %v1036_v29 = vadd.f32 1.0, %v4694_v1 }
 0x509   :  { %4695 = vrcp.f32 %v1036_v29  ;;  %v1048_v31 = vand.u32 2147483648, %v1036_v29  ;;  %v1046_v35 = vand.u32 2147483647, %v1036_v29  ;;  %vm1042_vm13 = vweird.f32 %v1036_v29 }
 0x50a   :  { %4697 = vtanh.f32 %v1032_v38 }
 0x50b   :  { %v1049_v3 = vor.u32 1.1754944e-38, %v1048_v31  ;;  %vm1047_vm4 = vcmp.eq.f32.partialorder %v1046_v35, 8.507059e+37  ;;  %4699 = vpow2.f32 %v4440_v34  ;;  %v5900_v34 = vld [vmem:[%s7259_s22] sm:$0xff] }
 0x50f   :  { %v4696_v30 = vpop.eup %4695 }
 0x510   :  { %v1038_v39 = vmul.f32 %v4696_v30, %v1036_v29  ;;  %vm1043_vm11 = vweird.f32 %v4696_v30  ;;  %v4698_v0 = vpop.eup %4697 }
 0x511   :  { %vm1044_vm3 = vmor %vm1042_vm13, %vm1043_vm11  ;;  %v4700_v15 = vpop.eup %4699 }
 0x512   :  { %v1039_v23 = vsub.f32 1.0, %v1038_v39  ;;  %v1056_v45 = vadd.f32 1.0, %v4700_v15  ;;  %v5907_v15 = vld [vmem:[%s7259_s22 + $0x8] sm:$0x3] }
 0x514   :  { %v1040_v33 = vmul.f32 %v4696_v30, %v1039_v23  ;;  %4701 = vrcp.f32 %v1056_v45  ;;  %v1068_v31 = vand.u32 2147483648, %v1056_v45  ;;  %vm1062_vm7 = vweird.f32 %v1056_v45 }
 0x515   :  { %v1066_v35 = vand.u32 2147483647, %v1056_v45 }
 0x516   :  { %v1041_v36 = vadd.f32 %v4696_v30, %v1040_v33 }
 0x517   :  { %vm1067_vm9 = vcmp.eq.f32.partialorder %v1066_v35, 8.507059e+37  ;;  %v1173_v35 = vrot.slane %v5400_v44, 2 }
 0x518   :  { %v1045_v18 = vsel %vm1044_vm3, %v4696_v30, %v1041_v36  ;;  %v1069_v36 = vor.u32 1.1754944e-38, %v1068_v31 }
 0x519   :  { %v1050_v41 = vsel %vm1047_vm4, %v1049_v3, %v1045_v18 }
 0x51a   :  { %v1073_v21 = vmul.f32 %v4698_v0, %v1050_v41  ;;  %v4702_v22 = vpop.eup %4701  ;;  %v1072_v23 = vmul.f32 0.0, %v1050_v41 }
 0x51b   :  { %v1058_v1 = vmul.f32 %v4702_v22, %v1056_v45  ;;  %vm1063_vm6 = vweird.f32 %v4702_v22  ;;  %v1109_v45 = vrot.slane %v5405_v47, 2 }
 0x51c   :  { %1075 = vrot.lane.b32.xlu1 %v1073_v21, %s5068_s29  ;;  %vm1064_vm8 = vmor %vm1062_vm7, %vm1063_vm6 }
 0x51d   :  { %v1059_v20 = vsub.f32 1.0, %v1058_v1 }
 0x51f   :  { %v1060_v39 = vmul.f32 %v4702_v22, %v1059_v20 }
 0x521   :  { %v1061_v30 = vadd.f32 %v4702_v22, %v1060_v39 }
 0x523   :  { %v1065_v38 = vsel %vm1064_vm8, %v4702_v22, %v1061_v30  ;;  %v1110_v22 = vrot.slane %v5420_v2, 2 }
 0x524   :  { %v1070_v18 = vsel %vm1067_vm9, %v1069_v36, %v1065_v38  ;;  %v1174_v38 = vrot.slane %v5412_v55, 2 }
 0x525   :  { %v1111_v1 = vsel %vm7237_vm10, %v1109_v45, %v1110_v22 }
 0x526   :  { %v1175_v36 = vsel %vm7237_vm10, %v1173_v35, %v1174_v38 }
 0x58e   :  { %v1076_v29 = vpop.permute.xlu1 %1075 }
 0x58f   :  { %v5888_v33 = vadd.f32 %v1076_v29, %v1072_v23 }
 0x591   :  { %4703 = vtanh.f32 %v5888_v33 }
 0x597   :  { %v4704_v3 = vpop.eup %4703 }
 0x598   :  { %v5891_v0 = vmul.f32 %v4704_v3, %v1070_v18 }
 0x59a   :  { %1082 = vrot.lane.b32.xlu0 %v5891_v0, %s5068_s29 }
 0x60c   :  { %v1083_v41 = vpop.permute.xlu0 %1082 }
 0x60d   :  { %4441 = vmatmul.msk.f32.vlgmr.msrb.gmra.mxu2 %vm144_vm0, %v1083_v41 }
 0x690   :  { %v1103_v21 = vpop.f32.mrf.mxu2 }
 0x691   :  { %4442 = vmatpush.msk.msrb.mxu3 %vm562_vm1, %v1103_v21 }
 0x692   :  { %4443 = vmatmul.msk.f32.vlgmr.msrb.gmra.mxu3 %vm555_vm2, %v5900_v34 }
 0x69a   :  { %4444 = vmatmul.msk.f32.gmra.mxu3 %vm555_vm2, %v5907_v15 }
 0x715   :  { %v1134_v20 = vpop.f32.mrf.mxu3 }
 0x716   :  { %v1135_v39 = vadd.f32 %v1134_v20, %v1111_v1 }
 0x718   :  { %4705 = vtanh.f32 %v1135_v39 }
 0x71d   :  { %v1137_v23 = vpop.f32.mrf.mxu3 }
 0x71e   :  { %v4706_v29 = vpop.eup %4705  ;;  %v1138_v30 = vadd.f32 %v1137_v23, %v1110_v22 }
 0x71f   :  { %4445 = vmatmul.msk.f32.vlgmr.msrb.gmra.mxu0 %vm358_vm5, %v4706_v29 }
 0x720   :  { %4707 = vtanh.f32 %v1138_v30  ;;  %1445 = vmatpush.bf16.msrb.mxu0 %v5776_v62 }
 0x724   :  { %1446 = vmatpush.bf16.msrb.mxu0 %v5796_v26 }
 0x726   :  { %v4708_v31 = vpop.eup %4707 }
 0x727   :  { %4446 = vmatmul.msk.f32.gmra.mxu0 %vm358_vm5, %v4708_v31 }
 0x728   :  { %1447 = vmatpush.bf16.msrb.mxu0 %v5822_v11 }
 0x72c   :  { %1448 = vmatpush.bf16.msrb.mxu0 %v5834_v52 }
 0x72f   :  { %4452 = vmatmul.msk.bf16.vlgmr.msra.gmra.mxu0 %vm144_vm0, %v5868_v32 }
 0x730   :  { %1595 = vmatpush.msra.mxu0 %v5431_v6 }
 0x732   :  { %1596 = vmatpush.msra.mxu0 %v5438_v7 }
 0x734   :  { %1597 = vmatpush.msra.mxu0 %v5444_v8 }
 0x736   :  { %1598 = vmatpush.msra.mxu0 %v5451_v9 }
 0x79c   :  { %v1165_v47 = vpop.f32.mrf.mxu0 }
 0x79d   :  { %v1178_v3 = vmul.f32 %v1175_v36, %v1165_v47 }
 0x79f   :  { %v1180_v21 = vmul.f32 1.442695, %v1178_v3 }
 0x7a4   :  { %v1168_v18 = vpop.f32.mrf.mxu0 }
 0x7a5   :  { %v1179_v41 = vmul.f32 %v1174_v38, %v1168_v18 }
 0x7a7   :  { %v1182_v45 = vmul.f32 1.442695, %v1179_v41 }
 0x7a9   :  { %4709 = vpow2.f32 %v1182_v45 }
 0x7aa   :  { %4711 = vpow2.f32 %v1180_v21 }
 0x7ac   :  { %v5929_v6 = vpop.f32.mrf.mxu0 }
 0x7af   :  { %v4710_v7 = vpop.eup %4709 }
 0x7b0   :  { %4447 = vmatpush.msk.msra.mxu2 %vm562_vm1, %v4710_v7  ;;  %v4712_v8 = vpop.eup %4711 }
 0x7b2   :  { %1202 = vmatpush.msra.mxu2 %v4712_v8 }
 0x7b3   :  { %4448 = vmatmul.msk.f32.vlgmr.msra.gmra.mxu2 %vm626_vm15, %v5565_v27 }
 0x7b4   :  { %v1324_v44 = vpop.f32.mrf.mxu0  ;;  %1330 = vmatpush.bf16.msrb.mxu2 %v5626_v10 }
 0x7b8   :  { %1331 = vmatpush.bf16.msrb.mxu2 %v5641_v16 }
 0x7bb   :  { %4449 = vmatmul.msk.f32.gmra.mxu2 %vm626_vm15, %v5572_v28 }
 0x7bc   :  { %1332 = vmatpush.bf16.msrb.mxu2 %v5659_v43 }
 0x7c0   :  { %1333 = vmatpush.bf16.msrb.mxu2 %v5668_v19 }
 0x7c3   :  { %4453 = vmatmul.msk.bf16.vlgmr.msrb.gmra.mxu2 %vm144_vm0, %v5868_v32 }
 0x7c4   :  { %1458 = vmatpush.bf16.msra.mxu2 %v5778_v57 }
 0x7c8   :  { %1459 = vmatpush.bf16.msra.mxu2 %v5801_v14 }
 0x7cc   :  { %1460 = vmatpush.bf16.msra.mxu2 %v5824_v61 }
 0x7d0   :  { %1461 = vmatpush.bf16.msra.mxu2 %v5837_v50 }
 0x836   :  { %v1204_v55 = vpop.f32.mrf.mxu2 }
 0x837   :  { %4713 = vrcp.f32 %v1204_v55  ;;  %v1221_v1 = vand.u32 2147483648, %v1204_v55  ;;  %v1219_v39 = vand.u32 2147483647, %v1204_v55  ;;  %vm1215_vm13 = vweird.f32 %v1204_v55 }
 0x839   :  { %v1222_v29 = vor.u32 1.1754944e-38, %v1221_v1  ;;  %vm1220_vm4 = vcmp.eq.f32.partialorder %v1219_v39, 8.507059e+37  ;;  %v1260_v1 = vrot.slane %v5675_v5, 2 }
 0x83d   :  { %v4714_v9 = vpop.eup %4713 }
 0x83e   :  { %v1211_v27 = vmul.f32 %v4714_v9, %v1204_v55  ;;  %v1207_v28 = vpop.f32.mrf.mxu2  ;;  %vm1216_vm11 = vweird.f32 %v4714_v9 }
 0x83f   :  { %4715 = vrcp.f32 %v1207_v28  ;;  %vm1217_vm3 = vmor %vm1215_vm13, %vm1216_vm11  ;;  %v1236_v3 = vand.u32 2147483648, %v1207_v28  ;;  %v1234_v41 = vand.u32 2147483647, %v1207_v28  ;;  %vm1230_vm7 = vweird.f32 %v1207_v28 }
 0x840   :  { %v1212_v22 = vsub.f32 1.0, %v1211_v27 }
 0x841   :  { %v1237_v45 = vor.u32 1.1754944e-38, %v1236_v3  ;;  %vm1235_vm9 = vcmp.eq.f32.partialorder %v1234_v41, 8.507059e+37  ;;  %v6006_v41 = vld [vmem:[%s7166_s11 + $0x20] sm:$0xff] }
 0x842   :  { %v1213_v20 = vmul.f32 %v4714_v9, %v1212_v22 }
 0x844   :  { %v1214_v23 = vadd.f32 %v4714_v9, %v1213_v20  ;;  %v1261_v20 = vrot.slane %v5697_v42, 2 }
 0x845   :  { %v4716_v32 = vpop.eup %4715 }
 0x846   :  { %v1226_v30 = vmul.f32 %v4716_v32, %v1207_v28  ;;  %v5946_v31 = vpop.f32.mrf.mxu2  ;;  %v1218_v47 = vsel %vm1217_vm3, %v4714_v9, %v1214_v23  ;;  %vm1231_vm6 = vweird.f32 %v4716_v32  ;;  %v1401_v9 = vpack.c.bf16 %v5891_v0, %v5891_v0 }
 0x847   :  { %v1223_v35 = vsel %vm1220_vm4, %v1222_v29, %v1218_v47  ;;  %vm1232_vm8 = vmor %vm1230_vm7, %vm1231_vm6  ;;  %v1258_v28 = vrot.slane %v5580_v46, 2 }
 0x848   :  { %v1227_v38 = vsub.f32 1.0, %v1226_v30  ;;  %v1224_v36 = vmul.f32 %v4712_v8, %v1223_v35  ;;  %v1257_v8 = vrot.slane %v5578_v25, 2 }
 0x84a   :  { %v1228_v18 = vmul.f32 %v4716_v32, %v1227_v38  ;;  %1243 = vperm.xlu2 %4664, %v1224_v36   ;;  %v1259_v23 = vsel %vm7237_vm10, %v1257_v8, %v1258_v28  ;;  %v5982_v36 = vld [vmem:[%s7166_s11 + $0x38] sm:$0xff] }
 0x84c   :  { %v1229_v21 = vadd.f32 %v4716_v32, %v1228_v18  ;;  %v5996_v18 = vld [vmem:[%s7166_s11 + $0x28] sm:$0xff] }
 0x84e   :  { %v1337_v44 = vpop.f32.mrf.mxu2  ;;  %v1233_v55 = vsel %vm1232_vm8, %v4716_v32, %v1229_v21  ;;  %v1262_v32 = vsel %vm7237_vm10, %v1260_v1, %v1261_v20  ;;  %v6012_v21 = vld [vmem:[%s7166_s11 + $0x18] sm:$0xff] }
 0x84f   :  { %v1238_v27 = vsel %vm1235_vm9, %v1237_v45, %v1233_v55  ;;  %v6018_v45 = vld [vmem:[%s7166_s11 + $0x10] sm:$0xff]  ;;  %v6024_v44 = vld [vmem:[%s7166_s11 + $0x8] sm:$0xff]  ;;  %v6030_v55 = vld [vmem:[%s7166_s11] sm:$0xff] }
 0x850   :  { %v1239_v22 = vmul.f32 %v4710_v7, %v1238_v27 }
 0x852   :  { %1403 = vrot.lane.b32.xlu2 %v1401_v9, %s5068_s29  ;;  %1248 = vperm.xlu1 %4663, %v1239_v22   ;;  %v1341_v22 = vrot.slane %v5929_v6, 6 }
 0x8a4   :  { %v5955_v39 = vpop.permute.xlu2 %1243 }
 0x8a5   :  { %v1267_v0 = vmul.f32 %v1259_v23, %v5955_v39  ;;  %v1268_v7 = vmul.f32 %v1262_v32, %v5955_v39 }
 0x8ac   :  { %v5991_v3 = vpop.permute.xlu2 %1403 }
 0x8ad   :  { %7309 = vst [vmem:[#allocation57_spill] sm:$0xff] %v5991_v3 }
 0x8c4   :  { %v5959_v29 = vpop.permute.xlu1 %1248 }
 0x8c5   :  { %7308 = vst [vmem:[#allocation56_spill] sm:$0xff] %v5959_v29  ;;  %v1269_v25 = vmul.f32 %v1258_v28, %v5959_v29  ;;  %v1270_v5 = vmul.f32 %v1261_v20, %v5959_v29  ;;  %v7310_v20 = vld [vmem:[#allocation49_spill] sm:$0xff] }
 0x8c7   :  { %v1271_v30 = vpack.c.bf16 %v1269_v25, %v1267_v0  ;;  %v1272_v47 = vpack.c.bf16 %v1270_v5, %v1268_v7 }
 0x8c9   :  { %v1274_v35 = vsel %vm711_vm12, %v1271_v30, 0  ;;  %v1277_v38 = vsel %vm711_vm12, %v1272_v47, 0 }
 0x8ca   :  { %1286 = vmatpush.bf16.msra.mxu1 %v1274_v35  ;;  %1299 = vmatpush.bf16.msra.mxu3 %v1277_v38  ;;  %v7311_v35 = vld [vmem:[#allocation50_spill] sm:$0xff] }
 0x8cd   :  { %4450 = vmatmul.msk.bf16.vlgmr.msra.gmra.mxu1 %vm626_vm15, %v5691_v13  ;;  %4451 = vmatmul.msk.bf16.vlgmr.msra.gmra.mxu3 %vm626_vm15, %v5691_v13  ;;  %v5988_v13 = vld [vmem:[%s7166_s11 + $0x30] sm:$0xff] }
 0x8ce   :  { %1412 = vmatpush.bf16.msrb.mxu1 %v5751_v53  ;;  %1425 = vmatpush.bf16.msrb.mxu3 %v5762_v56 }
 0x8d2   :  { %1413 = vmatpush.bf16.msrb.mxu1 %v5771_v63  ;;  %1426 = vmatpush.bf16.msrb.mxu3 %v5774_v17 }
 0x8d6   :  { %1414 = vmatpush.bf16.msrb.mxu1 %v5799_v54  ;;  %1427 = vmatpush.bf16.msrb.mxu3 %v5812_v48 }
 0x8da   :  { %1415 = vmatpush.bf16.msrb.mxu1 %v5827_v59  ;;  %1428 = vmatpush.bf16.msrb.mxu3 %v5830_v60 }
 0x8dd   :  { %4456 = vmatmul.msk.bf16.vlgmr.msrb.gmra.mxu1 %vm144_vm0, %v5991_v3  ;;  %4457 = vmatmul.msk.bf16.vlgmr.msrb.gmra.mxu3 %vm144_vm0, %v5991_v3 }
 0x8de   :  { %1530 = vmatpush.msra.mxu1 %v5982_v36 }
 0x8e0   :  { %1531 = vmatpush.msra.mxu1 %v5988_v13 }
 0x8e2   :  { %1532 = vmatpush.msra.mxu1 %v5996_v18 }
 0x8e4   :  { %1533 = vmatpush.msra.mxu1 %v6006_v41 }
 0x8e6   :  { %1534 = vmatpush.msra.mxu1 %v6012_v21 }
 0x8e8   :  { %1535 = vmatpush.msra.mxu1 %v6018_v45 }
 0x8ea   :  { %1536 = vmatpush.msra.mxu1 %v6024_v44 }
 0x8ec   :  { %1537 = vmatpush.msra.mxu1 %v6030_v55 }
 0x94a   :  { %v1288_v27 = vpop.f32.mrf.mxu1 }
 0x94b   :  { %v1307_v9 = vrot.slane %v1288_v27, 6  ;;  %v1342_v27 = vrot.slane %v5946_v31, 6 }
 0x94d   :  { %v1311_v8 = vadd.f32 %v1307_v9, %v5720_v12 }
 0x94f   :  { %v1345_v1 = vadd.f32 %v1341_v22, %v1311_v8 }
 0x950   :  { %v1301_v28 = vpop.f32.mrf.mxu3 }
 0x951   :  { %v1347_v23 = vadd.f32 %v1345_v1, %v7310_v20  ;;  %v1308_v7 = vrot.slane %v1301_v28, 6  ;;  %v7312_v1 = vld [vmem:[#allocation51_spill] sm:$0xff] }
 0x952   :  { %v1290_v32 = vpop.f32.mrf.mxu1 }
 0x953   :  { %v4454_v0 = vmul.f32 -1.442695, %v1347_v23  ;;  %v1312_v38 = vadd.f32 %v1308_v7, %v7311_v35  ;;  %v1389_v7 = vrot.slane %v5845_v58, 6 }
 0x955   :  { %4717 = vpow2.f32 %v4454_v0  ;;  %v1346_v6 = vadd.f32 %v1342_v27, %v1312_v38 }
 0x957   :  { %v1348_v32 = vadd.f32 %v1346_v6, %v7312_v1 }
 0x958   :  { %v1303_v25 = vpop.f32.mrf.mxu3 }
 0x95a   :  { %v6036_v5 = vpop.f32.mrf.mxu1 }
 0x95b   :  { %v4718_v30 = vpop.eup %4717 }
 0x95c   :  { %v1352_v47 = vadd.f32 1.0, %v4718_v30 }
 0x95e   :  { %4719 = vrcp.f32 %v1352_v47  ;;  %v1364_v25 = vand.u32 2147483648, %v1352_v47  ;;  %v1362_v30 = vand.u32 2147483647, %v1352_v47  ;;  %vm1358_vm13 = vweird.f32 %v1352_v47 }
 0x95f   :  { %4721 = vtanh.f32 %v1348_v32 }
 0x960   :  { %v6040_v9 = vpop.f32.mrf.mxu3  ;;  %v1365_v31 = vor.u32 1.1754944e-38, %v1364_v25  ;;  %vm1363_vm4 = vcmp.eq.f32.partialorder %v1362_v30, 8.507059e+37 }
 0x962   :  { %v1419_v22 = vpop.f32.mrf.mxu1 }
 0x964   :  { %v4720_v8 = vpop.eup %4719 }
 0x965   :  { %v1354_v23 = vmul.f32 %v4720_v8, %v1352_v47  ;;  %vm1359_vm11 = vweird.f32 %v4720_v8  ;;  %v4722_v27 = vpop.eup %4721 }
 0x966   :  { %vm1360_vm3 = vmor %vm1358_vm13, %vm1359_vm11 }
 0x967   :  { %v1355_v0 = vsub.f32 1.0, %v1354_v23  ;;  %v4455_v23 = vmul.f32 -1.442695, %v1348_v32 }
 0x968   :  { %v1432_v28 = vpop.f32.mrf.mxu3 }
 0x969   :  { %v1356_v3 = vmul.f32 %v4720_v8, %v1355_v0  ;;  %4723 = vpow2.f32 %v4455_v23 }
 0x96b   :  { %v1357_v29 = vadd.f32 %v4720_v8, %v1356_v3 }
 0x96d   :  { %v1361_v38 = vsel %vm1360_vm3, %v4720_v8, %v1357_v29 }
 0x96e   :  { %v1366_v22 = vsel %vm1363_vm4, %v1365_v31, %v1361_v38 }
 0x96f   :  { %v1392_v35 = vmul.f32 %v4722_v27, %v1366_v22  ;;  %v1391_v6 = vmul.f32 %v1389_v7, %v1366_v22  ;;  %v4724_v28 = vpop.eup %4723 }
 0x970   :  { %v1372_v0 = vadd.f32 1.0, %v4724_v28 }
 0x971   :  { %1394 = vrot.lane.b32.xlu0 %v1392_v35, %s5068_s29 }
 0x972   :  { %4725 = vrcp.f32 %v1372_v0  ;;  %v1384_v29 = vand.u32 2147483648, %v1372_v0  ;;  %vm1378_vm7 = vweird.f32 %v1372_v0  ;;  %v1382_v8 = vand.u32 2147483647, %v1372_v0 }
 0x974   :  { %v1385_v32 = vor.u32 1.1754944e-38, %v1384_v29  ;;  %vm1383_vm9 = vcmp.eq.f32.partialorder %v1382_v8, 8.507059e+37 }
 0x978   :  { %v4726_v1 = vpop.eup %4725 }
 0x979   :  { %v1374_v3 = vmul.f32 %v4726_v1, %v1372_v0  ;;  %vm1379_vm6 = vweird.f32 %v4726_v1 }
 0x97a   :  { %vm1380_vm8 = vmor %vm1378_vm7, %vm1379_vm6 }
 0x97b   :  { %v1375_v47 = vsub.f32 1.0, %v1374_v3 }
 0x97d   :  { %v1376_v20 = vmul.f32 %v4726_v1, %v1375_v47 }
 0x97f   :  { %v1377_v58 = vadd.f32 %v4726_v1, %v1376_v20 }
 0x981   :  { %v1381_v35 = vsel %vm1380_vm8, %v4726_v1, %v1377_v58 }
 0x982   :  { %v1386_v31 = vsel %vm1383_vm9, %v1385_v32, %v1381_v35 }
 0x9e3   :  { %v1395_v25 = vpop.permute.xlu0 %1394 }
 0x9e4   :  { %v6045_v12 = vadd.f32 %v1395_v25, %v1391_v6 }
 0x9e6   :  { %4727 = vtanh.f32 %v6045_v12 }
 0x9ec   :  { %v4728_v30 = vpop.eup %4727 }
 0x9ed   :  { %v1399_v7 = vmul.f32 %v4728_v30, %v1386_v31 }
 0x9ef   :  { %v1400_v38 = vpack.c.bf16 %v1399_v7, %v1399_v7 }
 0x9f1   :  { %v1435_v27 = vrot.slane %v1400_v38, 1 }
 0x9f3   :  { %1436 = vrot.lane.b32.xlu1 %v1435_v27, %s5068_s29 }
 0xa65   :  { %v6049_v22 = vpop.permute.xlu1 %1436 }
 0xa66   :  { %4458 = vmatmul.msk.bf16.vlgmr.msrb.gmra.mxu0 %vm144_vm0, %v6049_v22  ;;  %4459 = vmatmul.msk.bf16.vlgmr.msra.gmra.mxu2 %vm144_vm0, %v6049_v22 }
 0xa67   :  { %1749 = vmatpush.bf16.msrb.mxu0 %v5605_v37 }
 0xa6b   :  { %1750 = vmatpush.bf16.msrb.mxu0 %v5614_v40 }
 0xa6f   :  { %1751 = vmatpush.bf16.msrb.mxu0 %v5631_v24 }
 0xa73   :  { %1752 = vmatpush.bf16.msrb.mxu0 %v5649_v49 }
 0xae3   :  { %v1450_v20 = vpop.f32.mrf.mxu0 }
 0xae4   :  { %v1451_v1 = vadd.f32 %v1450_v20, %v6036_v5 }
 0xae6   :  { %v1467_v6 = vadd.f32 %v1451_v1, %v5881_v51 }
 0xae8   :  { %v4460_v23 = vmul.f32 -1.442695, %v1467_v6 }
 0xae9   :  { %v1463_v28 = vpop.f32.mrf.mxu2 }
 0xaea   :  { %4729 = vpow2.f32 %v4460_v23  ;;  %v1464_v58 = vadd.f32 %v1463_v28, %v6040_v9 }
 0xaeb   :  { %v1452_v0 = vpop.f32.mrf.mxu0 }
 0xaec   :  { %v1468_v8 = vadd.f32 %v1464_v58, %v5884_v4 }
 0xaee   :  { %v4461_v9 = vmul.f32 -1.442695, %v1468_v8 }
 0xaf0   :  { %v4730_v3 = vpop.eup %4729 }
 0xaf1   :  { %v1472_v47 = vadd.f32 1.0, %v4730_v3  ;;  %v1465_v25 = vpop.f32.mrf.mxu2 }
 0xaf3   :  { %4731 = vrcp.f32 %v1472_v47  ;;  %v1484_v30 = vand.u32 2147483648, %v1472_v47  ;;  %v1482_v31 = vand.u32 2147483647, %v1472_v47  ;;  %vm1478_vm13 = vweird.f32 %v1472_v47 }
 0xaf4   :  { %4733 = vtanh.f32 %v1468_v8 }
 0xaf5   :  { %v1485_v38 = vor.u32 1.1754944e-38, %v1484_v30  ;;  %vm1483_vm4 = vcmp.eq.f32.partialorder %v1482_v31, 8.507059e+37  ;;  %4735 = vpow2.f32 %v4461_v9 }
 0xaf9   :  { %v4732_v29 = vpop.eup %4731 }
 0xafa   :  { %v1474_v35 = vmul.f32 %v4732_v29, %v1472_v47  ;;  %vm1479_vm11 = vweird.f32 %v4732_v29  ;;  %v4734_v20 = vpop.eup %4733 }
 0xafb   :  { %vm1480_vm3 = vmor %vm1478_vm13, %vm1479_vm11  ;;  %v4736_v23 = vpop.eup %4735 }
 0xafc   :  { %v1475_v32 = vsub.f32 1.0, %v1474_v35  ;;  %v1492_v28 = vadd.f32 1.0, %v4736_v23 }
 0xafe   :  { %v1476_v5 = vmul.f32 %v4732_v29, %v1475_v32  ;;  %4737 = vrcp.f32 %v1492_v28  ;;  %v1504_v30 = vand.u32 2147483648, %v1492_v28  ;;  %vm1498_vm7 = vweird.f32 %v1492_v28 }
 0xaff   :  { %v1502_v8 = vand.u32 2147483647, %v1492_v28 }
 0xb00   :  { %v1477_v7 = vadd.f32 %v4732_v29, %v1476_v5  ;;  %v1505_v31 = vor.u32 1.1754944e-38, %v1504_v30 }
 0xb01   :  { %vm1503_vm9 = vcmp.eq.f32.partialorder %v1502_v8, 8.507059e+37 }
 0xb02   :  { %v1481_v27 = vsel %vm1480_vm3, %v4732_v29, %v1477_v7 }
 0xb03   :  { %v1486_v1 = vsel %vm1483_vm4, %v1485_v38, %v1481_v27 }
 0xb04   :  { %v1509_v6 = vmul.f32 %v4734_v20, %v1486_v1  ;;  %v4738_v0 = vpop.eup %4737  ;;  %v1508_v47 = vmul.f32 %v1486_v1, %v5888_v33  ;;  %v1544_v1 = vrot.slane %v5420_v2, 4 }
 0xb05   :  { %v1494_v3 = vmul.f32 %v4738_v0, %v1492_v28  ;;  %vm1499_vm6 = vweird.f32 %v4738_v0 }
 0xb06   :  { %1511 = vrot.lane.b32.xlu0 %v1509_v6, %s5068_s29  ;;  %vm1500_vm8 = vmor %vm1498_vm7, %vm1499_vm6  ;;  %v7313_v6 = vld [vmem:[#allocation12_spill] sm:$0xff] }
 0xb07   :  { %v1495_v25 = vsub.f32 1.0, %v1494_v3  ;;  %v1545_v9 = vrot.slane %v7313_v6, 4 }
 0xb09   :  { %v1496_v58 = vmul.f32 %v4738_v0, %v1495_v25  ;;  %v1546_v23 = vsel %vm7236_vm14, %v1544_v1, %v1545_v9 }
 0xb0b   :  { %v1497_v29 = vadd.f32 %v4738_v0, %v1496_v58 }
 0xb0d   :  { %v1501_v5 = vsel %vm1500_vm8, %v4738_v0, %v1497_v29  ;;  %v7315_v29 = vld [vmem:[#allocation11_spill] sm:$0xff] }
 0xb0e   :  { %v1506_v38 = vsel %vm1503_vm9, %v1505_v31, %v1501_v5  ;;  %v7316_v30 = vrot.slane %v7315_v29, 4 }
 0xb78   :  { %v1512_v35 = vpop.permute.xlu0 %1511 }
 0xb79   :  { %v6065_v32 = vadd.f32 %v1512_v35, %v1508_v47 }
 0xb7b   :  { %4739 = vtanh.f32 %v6065_v32 }
 0xb81   :  { %v4740_v7 = vpop.eup %4739 }
 0xb82   :  { %v6068_v27 = vmul.f32 %v4740_v7, %v1506_v38 }
 0xb84   :  { %1518 = vrot.lane.b32.xlu2 %v6068_v27, %s5068_s29 }
 0xbde   :  { %v1519_v33 = vpop.permute.xlu2 %1518 }
 0xbdf   :  { %4462 = vmatmul.msk.f32.vlgmr.msra.gmra.mxu1 %vm144_vm0, %v1519_v33 }
 0xc5c   :  { %v1539_v20 = vpop.f32.mrf.mxu1 }
 0xc5d   :  { %4463 = vmatpush.msk.msra.mxu3 %vm562_vm1, %v1539_v20  ;;  %v6098_v20 = vld [vmem:[%s7159_s4] sm:$0xff] }
 0xc5e   :  { %4464 = vmatmul.msk.f32.vlgmr.msra.gmra.mxu3 %vm555_vm2, %v5900_v34 }
 0xc66   :  { %4465 = vmatmul.msk.f32.gmra.mxu3 %vm555_vm2, %v5907_v15  ;;  %v7314_v15 = vld [vmem:[#allocation23_spill] sm:$0xff] }
 0xce1   :  { %v1569_v28 = vpop.f32.mrf.mxu3 }
 0xce2   :  { %v1570_v0 = vadd.f32 %v1569_v28, %v1546_v23 }
 0xce4   :  { %4741 = vtanh.f32 %v1570_v0 }
 0xce9   :  { %v1572_v3 = vpop.f32.mrf.mxu3 }
 0xcea   :  { %v4742_v25 = vpop.eup %4741  ;;  %v1573_v58 = vadd.f32 %v1572_v3, %v1545_v9  ;;  %v6107_v9 = vld [vmem:[%s7159_s4 + $0x8] sm:$0x3] }
 0xceb   :  { %4466 = vmatmul.msk.f32.vlgmr.msra.gmra.mxu0 %vm358_vm5, %v4742_v25 }
 0xcec   :  { %4743 = vtanh.f32 %v1573_v58  ;;  %1877 = vmatpush.bf16.msra.mxu0 %v5776_v62 }
 0xcf0   :  { %1878 = vmatpush.bf16.msra.mxu0 %v5796_v26 }
 0xcf2   :  { %v4744_v34 = vpop.eup %4743 }
 0xcf3   :  { %4467 = vmatmul.msk.f32.gmra.mxu0 %vm358_vm5, %v4744_v34 }
 0xcf4   :  { %1879 = vmatpush.bf16.msra.mxu0 %v5822_v11 }
 0xcf8   :  { %1880 = vmatpush.bf16.msra.mxu0 %v5834_v52 }
 0xcfb   :  { %4473 = vmatmul.msk.bf16.vlgmr.msrb.gmra.mxu0 %vm144_vm0, %v6049_v22 }
 0xd68   :  { %v1600_v2 = vpop.f32.mrf.mxu0 }
 0xd69   :  { %v1612_v47 = vmul.f32 %v7314_v15, %v1600_v2 }
 0xd6b   :  { %v1614_v5 = vmul.f32 1.442695, %v1612_v47 }
 0xd70   :  { %v1603_v35 = vpop.f32.mrf.mxu0 }
 0xd71   :  { %v1613_v8 = vmul.f32 %v7316_v30, %v1603_v35 }
 0xd73   :  { %v1616_v31 = vmul.f32 1.442695, %v1613_v8 }
 0xd75   :  { %4745 = vpow2.f32 %v1616_v31 }
 0xd76   :  { %4747 = vpow2.f32 %v1614_v5 }
 0xd78   :  { %v6092_v7 = vpop.f32.mrf.mxu0 }
 0xd7b   :  { %v4746_v38 = vpop.eup %4745 }
 0xd7c   :  { %4468 = vmatpush.msk.msrb.mxu1 %vm562_vm1, %v4746_v38  ;;  %v4748_v33 = vpop.eup %4747 }
 0xd7e   :  { %1636 = vmatpush.msrb.mxu1 %v4748_v33 }
 0xd7f   :  { %4469 = vmatmul.msk.f32.vlgmr.msrb.gmra.mxu1 %vm626_vm15, %v6098_v20 }
 0xd80   :  { %v1756_v1 = vpop.f32.mrf.mxu0  ;;  %1762 = vmatpush.bf16.msra.mxu1 %v5626_v10 }
 0xd84   :  { %1763 = vmatpush.bf16.msra.mxu1 %v5641_v16 }
 0xd87   :  { %4470 = vmatmul.msk.f32.gmra.mxu1 %vm626_vm15, %v6107_v9 }
 0xd88   :  { %1764 = vmatpush.bf16.msra.mxu1 %v5659_v43 }
 0xd8c   :  { %1765 = vmatpush.bf16.msra.mxu1 %v5668_v19 }
 0xd8f   :  { %4474 = vmatmul.msk.bf16.vlgmr.msra.gmra.mxu1 %vm144_vm0, %v6049_v22 }
 0xd90   :  { %1890 = vmatpush.bf16.msrb.mxu1 %v5778_v57 }
 0xd94   :  { %1891 = vmatpush.bf16.msrb.mxu1 %v5801_v14 }
 0xd98   :  { %1892 = vmatpush.bf16.msrb.mxu1 %v5824_v61 }
 0xd9c   :  { %1893 = vmatpush.bf16.msrb.mxu1 %v5837_v50 }
 0xdfc   :  { %v1638_v23 = vpop.f32.mrf.mxu1 }
 0xdfd   :  { %4749 = vrcp.f32 %v1638_v23  ;;  %v1655_v58 = vand.u32 2147483648, %v1638_v23  ;;  %v1653_v2 = vand.u32 2147483647, %v1638_v23  ;;  %vm1649_vm13 = vweird.f32 %v1638_v23 }
 0xdff   :  { %v1656_v47 = vor.u32 1.1754944e-38, %v1655_v58  ;;  %vm1654_vm4 = vcmp.eq.f32.partialorder %v1653_v2, 8.507059e+37 }
 0xe03   :  { %v4750_v28 = vpop.eup %4749 }
 0xe04   :  { %v1645_v0 = vmul.f32 %v4750_v28, %v1638_v23  ;;  %v1641_v3 = vpop.f32.mrf.mxu1  ;;  %vm1650_vm11 = vweird.f32 %v4750_v28 }
 0xe05   :  { %4751 = vrcp.f32 %v1641_v3  ;;  %vm1651_vm3 = vmor %vm1649_vm13, %vm1650_vm11  ;;  %v1670_v1 = vand.u32 2147483648, %v1641_v3  ;;  %vm1664_vm7 = vweird.f32 %v1641_v3 }
 0xe06   :  { %v1646_v25 = vsub.f32 1.0, %v1645_v0 }
 0xe07   :  { %v1671_v23 = vor.u32 1.1754944e-38, %v1670_v1 }
 0xe08   :  { %v1647_v34 = vmul.f32 %v4750_v28, %v1646_v25  ;;  %v1668_v25 = vand.u32 2147483647, %v1641_v3 }
 0xe0a   :  { %v1648_v15 = vadd.f32 %v4750_v28, %v1647_v34  ;;  %vm1669_vm9 = vcmp.eq.f32.partialorder %v1668_v25, 8.507059e+37 }
 0xe0b   :  { %v4752_v22 = vpop.eup %4751 }
 0xe0c   :  { %v1660_v35 = vmul.f32 %v4752_v22, %v1641_v3  ;;  %v6119_v29 = vpop.f32.mrf.mxu1  ;;  %v1652_v30 = vsel %vm1651_vm3, %v4750_v28, %v1648_v15  ;;  %vm1665_vm6 = vweird.f32 %v4752_v22  ;;  %v1833_v28 = vpack.c.bf16 %v6068_v27, %v6068_v27  ;;  %v7318_v3 = vld [vmem:[#allocation40_spill] sm:$0xff] }
 0xe0d   :  { %v1657_v8 = vsel %vm1654_vm4, %v1656_v47, %v1652_v30  ;;  %vm1666_vm8 = vmor %vm1664_vm7, %vm1665_vm6  ;;  %v1692_v47 = vrot.slane %v5697_v42, 4 }
 0xe0e   :  { %v1661_v5 = vsub.f32 1.0, %v1660_v35  ;;  %v1658_v31 = vmul.f32 %v4748_v33, %v1657_v8  ;;  %v530_v33 = vlaneseq  ;;  %v7320_v35 = vld [vmem:[#allocation31_spill] sm:$0xff]  ;;  %v7321_v8 = vld [vmem:[#allocation41_spill] sm:$0xff] }
 0xe0f   :  { %v1690_v30 = vrot.slane %v7320_v35, 4 }
 0xe10   :  { %1677 = vperm.xlu1 %4663, %v1658_v31   ;;  %v1662_v0 = vmul.f32 %v4752_v22, %v1661_v5  ;;  %v6124_v15 = vand.u32 127, %v530_v33  ;;  %v1693_v5 = vrot.slane %v7321_v8, 4  ;;  %v6172_v33 = vld [vmem:[%s7167_s12 + $0x18] sm:$0xff] }
 0xe12   :  { %v1663_v50 = vadd.f32 %v4752_v22, %v1662_v0  ;;  %7317 = vst [vmem:[#allocation12_spill] sm:$0xff] %v6124_v15  ;;  %vm1240_vm11 = vcmp.eq.s32.totalorder %v6124_v15, 1  ;;  %vm689_vm13 = vcmp.eq.s32.totalorder %v6124_v15, 0  ;;  %vm1674_vm3 = vcmp.eq.s32.totalorder %v6124_v15, 2 }
 0xe13   :  { %v1694_v1 = vsel %vm7236_vm14, %v1692_v47, %v1693_v5 }
 0xe14   :  { %v1769_v34 = vpop.f32.mrf.mxu1  ;;  %v1667_v61 = vsel %vm1666_vm8, %v4752_v22, %v1663_v50  ;;  %v1689_v22 = vrot.slane %v5580_v46, 4 }
 0xe15   :  { %v1672_v58 = vsel %vm1669_vm9, %v1671_v23, %v1667_v61  ;;  %v700_v61 = vsel %vm689_vm13, %v7318_v3, 0.0  ;;  %v6179_v3 = vld [vmem:[%s7167_s12 + $0x10] sm:$0xff] }
 0xe16   :  { %v1673_v2 = vmul.f32 %v4746_v38, %v1672_v58  ;;  %v1251_v50 = vsel %vm1240_vm11, %v5955_v39, %v700_v61  ;;  %v1691_v31 = vsel %vm7236_vm14, %v1689_v22, %v1690_v30  ;;  %v7324_v22 = vld [vmem:[#allocation48_spill] sm:$0xff] }
 0xe18   :  { %1835 = vrot.lane.b32.xlu1 %v1833_v28, %s5068_s29  ;;  %1682 = vperm.xlu0 %4665, %v1673_v2   ;;  %v6156_v2 = vld [vmem:[%s7291_s7] sm:$0x1] }
 0xe82   :  { %v1678_v27 = vpop.permute.xlu1 %1677 }
 0xe83   :  { %v6137_v38 = vsel %vm1674_vm3, %v1678_v27, %v1251_v50  ;;  %v1699_v39 = vmul.f32 %v1691_v31, %v1678_v27  ;;  %v1700_v25 = vmul.f32 %v1694_v1, %v1678_v27  ;;  %v1773_v27 = vrot.slane %v6092_v7, 4 }
 0xe84   :  { %7319 = vst [vmem:[#allocation23_spill] sm:$0xff] %v6137_v38  ;;  %v1774_v7 = vrot.slane %v6119_v29, 4  ;;  %v1821_v29 = vrot.slane %v6045_v12, 6 }
 0xe8a   :  { %v6145_v0 = vpop.permute.xlu0 %1682  ;;  %v6182_v61 = vpop.permute.xlu1 %1835 }
 0xe8b   :  { %7322 = vst [vmem:[#allocation11_spill] sm:$0xff] %v6145_v0  ;;  %v1701_v23 = vmul.f32 %v1690_v30, %v6145_v0  ;;  %v1702_v34 = vmul.f32 %v1693_v5, %v6145_v0  ;;  %v7325_v30 = vld [vmem:[#allocation49_spill] sm:$0xff] }
 0xe8c   :  { %7323 = vst [vmem:[#allocation40_spill] sm:$0xff] %v6182_v61 }
 0xe8d   :  { %v1703_v58 = vpack.c.bf16 %v1701_v23, %v1699_v39  ;;  %v1704_v46 = vpack.c.bf16 %v1702_v34, %v1700_v25  ;;  %v7326_v34 = vld [vmem:[#allocation50_spill] sm:$0xff] }
 0xe8f   :  { %v1706_v42 = vsel %vm711_vm12, %v1703_v58, 0  ;;  %v1709_v28 = vsel %vm711_vm12, %v1704_v46, 0 }
 0xe90   :  { %1718 = vmatpush.bf16.msrb.mxu2 %v1706_v42  ;;  %1731 = vmatpush.bf16.msrb.mxu3 %v1709_v28 }
 0xe93   :  { %4471 = vmatmul.msk.bf16.vlgmr.msrb.gmra.mxu2 %vm626_vm15, %v6156_v2  ;;  %4472 = vmatmul.msk.bf16.vlgmr.msrb.gmra.mxu3 %vm626_vm15, %v6156_v2 }
 0xe94   :  { %1844 = vmatpush.bf16.msra.mxu2 %v5751_v53  ;;  %1857 = vmatpush.bf16.msra.mxu3 %v5762_v56 }
 0xe98   :  { %1845 = vmatpush.bf16.msra.mxu2 %v5771_v63  ;;  %1858 = vmatpush.bf16.msra.mxu3 %v5774_v17 }
 0xe9c   :  { %1846 = vmatpush.bf16.msra.mxu2 %v5799_v54  ;;  %1859 = vmatpush.bf16.msra.mxu3 %v5812_v48 }
 0xea0   :  { %1847 = vmatpush.bf16.msra.mxu2 %v5827_v59  ;;  %1860 = vmatpush.bf16.msra.mxu3 %v5830_v60 }
 0xea3   :  { %4477 = vmatmul.msk.bf16.vlgmr.msra.gmra.mxu2 %vm144_vm0, %v6182_v61  ;;  %4478 = vmatmul.msk.bf16.vlgmr.msra.gmra.mxu3 %vm144_vm0, %v6182_v61 }
 0xea4   :  { %1962 = vmatpush.msrb.mxu2 %v5982_v36  ;;  %2026 = vmatpush.msrb.mxu3 %v6172_v33  ;;  %v6188_v36 = vld [vmem:[%s7167_s12 + $0x8] sm:$0xff] }
 0xea6   :  { %1963 = vmatpush.msrb.mxu2 %v5988_v13  ;;  %2027 = vmatpush.msrb.mxu3 %v6179_v3  ;;  %v6199_v13 = vld [vmem:[%s7167_s12] sm:$0xff] }
 0xea8   :  { %1964 = vmatpush.msrb.mxu2 %v5996_v18  ;;  %2028 = vmatpush.msrb.mxu3 %v6188_v36 }
 0xeaa   :  { %1965 = vmatpush.msrb.mxu2 %v6006_v41  ;;  %2029 = vmatpush.msrb.mxu3 %v6199_v13 }
 0xeac   :  { %2180 = vmatpush.bf16.msra.mxu3 %v5605_v37  ;;  %1966 = vmatpush.msrb.mxu2 %v6012_v21 }
 0xeae   :  { %1967 = vmatpush.msrb.mxu2 %v6018_v45 }
 0xeb0   :  { %2181 = vmatpush.bf16.msra.mxu3 %v5614_v40  ;;  %1968 = vmatpush.msrb.mxu2 %v6024_v44 }
 0xeb2   :  { %1969 = vmatpush.msrb.mxu2 %v6030_v55 }
 0xeb4   :  { %2182 = vmatpush.bf16.msra.mxu3 %v5631_v24 }
 0xeb8   :  { %2183 = vmatpush.bf16.msra.mxu3 %v5649_v49 }
 0xf16   :  { %v1720_v18 = vpop.f32.mrf.mxu2  ;;  %v1733_v41 = vpop.f32.mrf.mxu3 }
 0xf17   :  { %v1739_v50 = vrot.slane %v1720_v18, 4  ;;  %v1740_v44 = vrot.slane %v1733_v41, 4 }
 0xf19   :  { %v1743_v47 = vadd.f32 %v1739_v50, %v7324_v22  ;;  %v1744_v58 = vadd.f32 %v1740_v44, %v7326_v34  ;;  %v7327_v50 = vld [vmem:[#allocation51_spill] sm:$0xff] }
 0xf1b   :  { %v1777_v21 = vadd.f32 %v1773_v27, %v1743_v47  ;;  %v1778_v46 = vadd.f32 %v1774_v7, %v1744_v58 }
 0xf1d   :  { %v1779_v45 = vadd.f32 %v1777_v21, %v7325_v30  ;;  %v1780_v27 = vadd.f32 %v1778_v46, %v7327_v50 }
 0xf1e   :  { %v1722_v5 = vpop.f32.mrf.mxu2  ;;  %v1735_v31 = vpop.f32.mrf.mxu3 }
 0xf1f   :  { %v4475_v1 = vmul.f32 -1.442695, %v1779_v45  ;;  %v4476_v46 = vmul.f32 -1.442695, %v1780_v27 }
 0xf21   :  { %4753 = vpow2.f32 %v4475_v1 }
 0xf26   :  { %v6213_v55 = vpop.f32.mrf.mxu2  ;;  %v6215_v39 = vpop.f32.mrf.mxu3 }
 0xf27   :  { %v4754_v25 = vpop.eup %4753 }
 0xf28   :  { %v1784_v23 = vadd.f32 1.0, %v4754_v25 }
 0xf2a   :  { %4755 = vrcp.f32 %v1784_v23  ;;  %v1796_v41 = vand.u32 2147483648, %v1784_v23  ;;  %v1794_v5 = vand.u32 2147483647, %v1784_v23  ;;  %vm1790_vm6 = vweird.f32 %v1784_v23 }
 0xf2b   :  { %4757 = vtanh.f32 %v1780_v27 }
 0xf2c   :  { %v1797_v1 = vor.u32 1.1754944e-38, %v1796_v41  ;;  %vm1795_vm8 = vcmp.eq.f32.partialorder %v1794_v5, 8.507059e+37  ;;  %4759 = vpow2.f32 %v4476_v46 }
 0xf2e   :  { %v1851_v42 = vpop.f32.mrf.mxu2  ;;  %v1864_v28 = vpop.f32.mrf.mxu3 }
 0xf30   :  { %v4756_v18 = vpop.eup %4755 }
 0xf31   :  { %v1786_v47 = vmul.f32 %v4756_v18, %v1784_v23  ;;  %vm1791_vm4 = vweird.f32 %v4756_v18  ;;  %v4758_v25 = vpop.eup %4757 }
 0xf32   :  { %vm1792_vm7 = vmor %vm1790_vm6, %vm1791_vm4  ;;  %v4760_v28 = vpop.eup %4759 }
 0xf33   :  { %v1787_v21 = vsub.f32 1.0, %v1786_v47  ;;  %v1804_v47 = vadd.f32 1.0, %v4760_v28 }
 0xf35   :  { %v1788_v45 = vmul.f32 %v4756_v18, %v1787_v21  ;;  %4761 = vrcp.f32 %v1804_v47  ;;  %vm1810_vm4 = vweird.f32 %v1804_v47  ;;  %v1814_v5 = vand.u32 2147483647, %v1804_v47 }
 0xf37   :  { %v1789_v31 = vadd.f32 %v4756_v18, %v1788_v45 }
 0xf39   :  { %v1793_v44 = vsel %vm1792_vm7, %v4756_v18, %v1789_v31  ;;  %v1816_v18 = vand.u32 2147483648, %v1804_v47  ;;  %vm1815_vm7 = vcmp.eq.f32.partialorder %v1814_v5, 8.507059e+37 }
 0xf3a   :  { %v1798_v58 = vsel %vm1795_vm8, %v1797_v1, %v1793_v44 }
 0xf3b   :  { %v1824_v7 = vmul.f32 %v4758_v25, %v1798_v58  ;;  %v1823_v42 = vmul.f32 %v1821_v29, %v1798_v58  ;;  %v4762_v21 = vpop.eup %4761  ;;  %v1817_v31 = vor.u32 1.1754944e-38, %v1816_v18 }
 0xf3c   :  { %v1806_v45 = vmul.f32 %v4762_v21, %v1804_v47  ;;  %vm1811_vm9 = vweird.f32 %v4762_v21 }
 0xf3d   :  { %1826 = vrot.lane.b32.xlu2 %v1824_v7, %s5068_s29  ;;  %vm1812_vm6 = vmor %vm1810_vm4, %vm1811_vm9 }
 0xf3e   :  { %v1807_v23 = vsub.f32 1.0, %v1806_v45 }
 0xf40   :  { %v1808_v61 = vmul.f32 %v4762_v21, %v1807_v23 }
 0xf42   :  { %v1809_v12 = vadd.f32 %v4762_v21, %v1808_v61 }
 0xf44   :  { %v1813_v27 = vsel %vm1812_vm6, %v4762_v21, %v1809_v12 }
 0xf45   :  { %v1818_v29 = vsel %vm1815_vm7, %v1817_v31, %v1813_v27 }
 0xf97   :  { %v1827_v41 = vpop.permute.xlu2 %1826 }
 0xf98   :  { %v6222_v38 = vadd.f32 %v1827_v41, %v1823_v42 }
 0xf9a   :  { %4763 = vtanh.f32 %v6222_v38 }
 0xfa0   :  { %v4764_v1 = vpop.eup %4763 }
 0xfa1   :  { %v1831_v44 = vmul.f32 %v4764_v1, %v1818_v29 }
 0xfa3   :  { %v1832_v25 = vpack.c.bf16 %v1831_v44, %v1831_v44 }
 0xfa5   :  { %v1867_v58 = vrot.slane %v1832_v25, 2 }
 0xfa7   :  { %1868 = vrot.lane.b32.xlu2 %v1867_v58, %s5068_s29 }
0x1001   :  { %v6226_v7 = vpop.permute.xlu2 %1868 }
0x1002   :  { %4479 = vmatmul.msk.bf16.vlgmr.msra.gmra.mxu0 %vm144_vm0, %v6226_v7  ;;  %4480 = vmatmul.msk.bf16.vlgmr.msrb.gmra.mxu1 %vm144_vm0, %v6226_v7 }
0x107f   :  { %v1882_v61 = vpop.f32.mrf.mxu0  ;;  %v1895_v42 = vpop.f32.mrf.mxu1 }
0x1080   :  { %v1883_v46 = vadd.f32 %v1882_v61, %v6213_v55  ;;  %v1896_v12 = vadd.f32 %v1895_v42, %v6215_v39 }
0x1082   :  { %v1899_v28 = vadd.f32 %v1883_v46, %v5881_v51  ;;  %v1900_v5 = vadd.f32 %v1896_v12, %v5884_v4 }
0x1084   :  { %v4481_v47 = vmul.f32 -1.442695, %v1899_v28  ;;  %v4482_v39 = vmul.f32 -1.442695, %v1900_v5 }
0x1086   :  { %4765 = vpow2.f32 %v4481_v47 }
0x1087   :  { %v1884_v21 = vpop.f32.mrf.mxu0  ;;  %v1897_v45 = vpop.f32.mrf.mxu1 }
0x108c   :  { %v4766_v23 = vpop.eup %4765 }
0x108d   :  { %v1904_v41 = vadd.f32 1.0, %v4766_v23 }
0x108f   :  { %4767 = vrcp.f32 %v1904_v41  ;;  %v1916_v1 = vand.u32 2147483648, %v1904_v41  ;;  %v1914_v55 = vand.u32 2147483647, %v1904_v41  ;;  %vm1910_vm9 = vweird.f32 %v1904_v41 }
0x1090   :  { %4769 = vtanh.f32 %v1900_v5 }
0x1091   :  { %v1917_v25 = vor.u32 1.1754944e-38, %v1916_v1  ;;  %vm1915_vm6 = vcmp.eq.f32.partialorder %v1914_v55, 8.507059e+37  ;;  %4771 = vpow2.f32 %v4482_v39  ;;  %v7328_v39 = vld [vmem:[#allocation15_spill] sm:$0xff] }
0x1095   :  { %v4768_v18 = vpop.eup %4767 }
0x1096   :  { %v1906_v27 = vmul.f32 %v4768_v18, %v1904_v41  ;;  %vm1911_vm8 = vweird.f32 %v4768_v18  ;;  %v4770_v61 = vpop.eup %4769 }
0x1097   :  { %vm1912_vm4 = vmor %vm1910_vm9, %vm1911_vm8  ;;  %v4772_v42 = vpop.eup %4771 }
0x1098   :  { %v1907_v31 = vsub.f32 1.0, %v1906_v27  ;;  %v1924_v47 = vadd.f32 1.0, %v4772_v42  ;;  %v1976_v42 = vrot.slane %v7328_v39, 6 }
0x109a   :  { %v1908_v29 = vmul.f32 %v4768_v18, %v1907_v31  ;;  %4773 = vrcp.f32 %v1924_v47  ;;  %v1936_v1 = vand.u32 2147483648, %v1924_v47  ;;  %vm1930_vm8 = vweird.f32 %v1924_v47 }
0x109b   :  { %v1934_v5 = vand.u32 2147483647, %v1924_v47 }
0x109c   :  { %v1909_v44 = vadd.f32 %v4768_v18, %v1908_v29  ;;  %v1937_v55 = vor.u32 1.1754944e-38, %v1936_v1  ;;  %v7329_v1 = vld [vmem:[#allocation26_spill] sm:$0xff] }
0x109e   :  { %v1913_v58 = vsel %vm1912_vm4, %v4768_v18, %v1909_v44  ;;  %vm1935_vm4 = vcmp.eq.f32.partialorder %v1934_v5, 8.507059e+37 }
0x109f   :  { %v1918_v46 = vsel %vm1915_vm6, %v1917_v25, %v1913_v58 }
0x10a0   :  { %v1941_v28 = vmul.f32 %v4770_v61, %v1918_v46  ;;  %v4774_v21 = vpop.eup %4773  ;;  %v1940_v41 = vmul.f32 %v1918_v46, %v6065_v32  ;;  %v6250_v46 = vld [vmem:[%s7259_s22] sm:$0xff] }
0x10a1   :  { %v1926_v45 = vmul.f32 %v4774_v21, %v1924_v47  ;;  %vm1931_vm7 = vweird.f32 %v4774_v21  ;;  %v1975_v47 = vrot.slane %v7313_v6, 6 }
0x10a2   :  { %1943 = vrot.lane.b32.xlu1 %v1941_v28, %s5068_s29  ;;  %vm1932_vm9 = vmor %vm1930_vm8, %vm1931_vm7  ;;  %v6257_v28 = vld [vmem:[%s7259_s22 + $0x8] sm:$0x3] }
0x10a3   :  { %v1927_v23 = vsub.f32 1.0, %v1926_v45 }
0x10a5   :  { %v1928_v12 = vmul.f32 %v4774_v21, %v1927_v23 }
0x10a7   :  { %v1929_v18 = vadd.f32 %v4774_v21, %v1928_v12 }
0x10a9   :  { %v1933_v29 = vsel %vm1932_vm9, %v4774_v21, %v1929_v18  ;;  %v1977_v21 = vsel %vm562_vm1, %v1975_v47, %v1976_v42 }
0x10aa   :  { %v1938_v25 = vsel %vm1935_vm4, %v1937_v55, %v1933_v29  ;;  %v7330_v55 = vld [vmem:[#allocation13_spill] sm:$0xff] }
0x1114   :  { %v1944_v27 = vpop.permute.xlu1 %1943 }
0x1115   :  { %v6238_v31 = vadd.f32 %v1944_v27, %v1940_v41 }
0x1117   :  { %4775 = vtanh.f32 %v6238_v31 }
0x111d   :  { %v4776_v44 = vpop.eup %4775 }
0x111e   :  { %v6241_v58 = vmul.f32 %v4776_v44, %v1938_v25  ;;  %v7331_v44 = vrot.slane %v7330_v55, 6 }
0x1120   :  { %1950 = vrot.lane.b32.xlu0 %v6241_v58, %s5068_s29 }
0x1192   :  { %v1951_v32 = vpop.permute.xlu0 %1950 }
0x1193   :  { %4483 = vmatmul.msk.f32.vlgmr.msrb.gmra.mxu2 %vm144_vm0, %v1951_v32 }
0x1216   :  { %v1971_v61 = vpop.f32.mrf.mxu2 }
0x1217   :  { %4484 = vmatpush.msk.msra.mxu2 %vm562_vm1, %v1971_v61 }
0x1218   :  { %4485 = vmatmul.msk.f32.vlgmr.msra.gmra.mxu2 %vm555_vm2, %v6250_v46 }
0x1220   :  { %4486 = vmatmul.msk.f32.gmra.mxu2 %vm555_vm2, %v6257_v28 }
0x129b   :  { %v2000_v45 = vpop.f32.mrf.mxu2 }
0x129c   :  { %v2001_v23 = vadd.f32 %v2000_v45, %v1977_v21  ;;  %v7333_v45 = vld [vmem:[#allocation55_spill] sm:$0xff] }
0x129e   :  { %4777 = vtanh.f32 %v2001_v23 }
0x12a3   :  { %v2003_v12 = vpop.f32.mrf.mxu2 }
0x12a4   :  { %v4778_v41 = vpop.eup %4777  ;;  %v2004_v27 = vadd.f32 %v2003_v12, %v1976_v42 }
0x12a5   :  { %4487 = vmatmul.msk.f32.vlgmr.msrb.gmra.mxu3 %vm358_vm5, %v4778_v41 }
0x12a6   :  { %4779 = vtanh.f32 %v2004_v27  ;;  %2308 = vmatpush.bf16.msrb.mxu3 %v5776_v62 }
0x12aa   :  { %2309 = vmatpush.bf16.msrb.mxu3 %v5796_v26 }
0x12ac   :  { %v4780_v18 = vpop.eup %4779 }
0x12ad   :  { %4488 = vmatmul.msk.f32.gmra.mxu3 %vm358_vm5, %v4780_v18 }
0x12ae   :  { %2310 = vmatpush.bf16.msrb.mxu3 %v5822_v11 }
0x12b2   :  { %2311 = vmatpush.bf16.msrb.mxu3 %v5834_v52 }
0x12b5   :  { %4494 = vmatmul.msk.bf16.vlgmr.msra.gmra.mxu3 %vm144_vm0, %v6226_v7 }
0x1328   :  { %v2031_v6 = vpop.f32.mrf.mxu3 }
0x1329   :  { %v2043_v5 = vmul.f32 %v7329_v1, %v2031_v6 }
0x132b   :  { %v2045_v32 = vmul.f32 1.442695, %v2043_v5 }
0x1330   :  { %v2034_v29 = vpop.f32.mrf.mxu3 }
0x1331   :  { %v2044_v25 = vmul.f32 %v7331_v44, %v2034_v29 }
0x1333   :  { %v2047_v61 = vmul.f32 1.442695, %v2044_v25 }
0x1335   :  { %4781 = vpow2.f32 %v2047_v61 }
0x1336   :  { %4783 = vpow2.f32 %v2045_v32 }
0x1338   :  { %v6275_v39 = vpop.f32.mrf.mxu3 }
0x133b   :  { %v4782_v42 = vpop.eup %4781 }
0x133c   :  { %4489 = vmatpush.msk.msrb.mxu0 %vm562_vm1, %v4782_v42  ;;  %v4784_v47 = vpop.eup %4783 }
0x133e   :  { %2067 = vmatpush.msrb.mxu0 %v4784_v47 }
0x133f   :  { %4490 = vmatmul.msk.f32.vlgmr.msrb.gmra.mxu0 %vm626_vm15, %v6098_v20  ;;  %v7332_v20 = vld [vmem:[#allocation54_spill] sm:$0xff] }
0x1340   :  { %v2187_v21 = vpop.f32.mrf.mxu3  ;;  %2193 = vmatpush.bf16.msra.mxu0 %v5626_v10 }
0x1344   :  { %2194 = vmatpush.bf16.msra.mxu0 %v5641_v16 }
0x1347   :  { %4491 = vmatmul.msk.f32.gmra.mxu0 %vm626_vm15, %v6107_v9 }
0x1348   :  { %2195 = vmatpush.bf16.msra.mxu0 %v5659_v43 }
0x134c   :  { %2196 = vmatpush.bf16.msra.mxu0 %v5668_v19 }
0x134f   :  { %4495 = vmatmul.msk.bf16.vlgmr.msra.gmra.mxu0 %vm144_vm0, %v6226_v7 }
0x1350   :  { %2321 = vmatpush.bf16.msrb.mxu0 %v5778_v57 }
0x1354   :  { %2322 = vmatpush.bf16.msrb.mxu0 %v5801_v14 }
0x1358   :  { %2323 = vmatpush.bf16.msrb.mxu0 %v7332_v20 }
0x135c   :  { %2324 = vmatpush.bf16.msrb.mxu0 %v7333_v45 }
0x13bc   :  { %v2069_v23 = vpop.f32.mrf.mxu0 }
0x13bd   :  { %4785 = vrcp.f32 %v2069_v23  ;;  %v2086_v18 = vand.u32 2147483648, %v2069_v23  ;;  %v2084_v1 = vand.u32 2147483647, %v2069_v23  ;;  %vm2080_vm7 = vweird.f32 %v2069_v23 }
0x13bf   :  { %v2087_v29 = vor.u32 1.1754944e-38, %v2086_v18  ;;  %vm2085_vm9 = vcmp.eq.f32.partialorder %v2084_v1, 8.507059e+37  ;;  %v2123_v1 = vrot.slane %v7321_v8, 6 }
0x13c3   :  { %v4786_v12 = vpop.eup %4785 }
0x13c4   :  { %v2076_v41 = vmul.f32 %v4786_v12, %v2069_v23  ;;  %v2072_v9 = vpop.f32.mrf.mxu0  ;;  %vm2081_vm6 = vweird.f32 %v4786_v12 }
0x13c5   :  { %4787 = vrcp.f32 %v2072_v9  ;;  %vm2082_vm8 = vmor %vm2080_vm7, %vm2081_vm6  ;;  %v2101_v0 = vand.u32 2147483648, %v2072_v9  ;;  %vm2095_vm14 = vweird.f32 %v2072_v9 }
0x13c6   :  { %v2077_v27 = vsub.f32 1.0, %v2076_v41 }
0x13c7   :  { %v2102_v23 = vor.u32 1.1754944e-38, %v2101_v0 }
0x13c8   :  { %v2078_v6 = vmul.f32 %v4786_v12, %v2077_v27  ;;  %v2099_v27 = vand.u32 2147483647, %v2072_v9 }
0x13ca   :  { %v2079_v5 = vadd.f32 %v4786_v12, %v2078_v6  ;;  %vm2100_vm6 = vcmp.eq.f32.partialorder %v2099_v27, 8.507059e+37  ;;  %v6344_v27 = vld [vmem:[%s7166_s11 + $0x28] sm:$0xff] }
0x13cb   :  { %v4788_v7 = vpop.eup %4787 }
0x13cc   :  { %v2091_v55 = vmul.f32 %v4788_v7, %v2072_v9  ;;  %v6292_v44 = vpop.f32.mrf.mxu0  ;;  %v2083_v25 = vsel %vm2082_vm8, %v4786_v12, %v2079_v5  ;;  %vm2096_vm4 = vweird.f32 %v4788_v7  ;;  %v2264_v12 = vpack.c.bf16 %v6241_v58, %v6241_v58  ;;  %v7334_v5 = vld [vmem:[#allocation32_spill] sm:$0xff]  ;;  %v7335_v9 = vld [vmem:[#allocation42_spill] sm:$0xff] }
0x13cd   :  { %v2088_v32 = vsel %vm2085_vm9, %v2087_v29, %v2083_v25  ;;  %vm2097_vm10 = vmor %vm2095_vm14, %vm2096_vm4  ;;  %v2121_v29 = vrot.slane %v7334_v5, 6 }
0x13ce   :  { %v2092_v61 = vsub.f32 1.0, %v2091_v55  ;;  %v2089_v21 = vmul.f32 %v4784_v47, %v2088_v32  ;;  %v2120_v47 = vrot.slane %v7320_v35, 6  ;;  %v2124_v55 = vrot.slane %v7335_v9, 6 }
0x13d0   :  { %2108 = vperm.xlu2 %4664, %v2089_v21   ;;  %v2093_v41 = vmul.f32 %v4788_v7, %v2092_v61  ;;  %v6328_v21 = vld [vmem:[%s7166_s11 + $0x38] sm:$0xff] }
0x13d2   :  { %v2094_v15 = vadd.f32 %v4788_v7, %v2093_v41 }
0x13d4   :  { %v2200_v6 = vpop.f32.mrf.mxu0  ;;  %v2098_v18 = vsel %vm2097_vm10, %v4788_v7, %v2094_v15  ;;  %v2122_v15 = vsel %vm562_vm1, %v2120_v47, %v2121_v29 }
0x13d5   :  { %v2103_v45 = vsel %vm2100_vm6, %v2102_v23, %v2098_v18  ;;  %v6382_v23 = vld [vmem:[%s7166_s11] sm:$0xff] }
0x13d6   :  { %v2104_v20 = vmul.f32 %v4782_v42, %v2103_v45  ;;  %v2125_v42 = vsel %vm562_vm1, %v2123_v1, %v2124_v55 }
0x13d8   :  { %2113 = vperm.xlu1 %4663, %v2104_v20  }
0x13e0   :  { %2266 = vrot.lane.b32.xlu1 %v2264_v12, %s5068_s29  ;;  %v2204_v12 = vrot.slane %v6275_v39, 2 }
0x142a   :  { %v6301_v0 = vpop.permute.xlu2 %2108 }
0x142b   :  { %7336 = vst [vmem:[#allocation31_spill] sm:$0xff] %v6301_v0  ;;  %v2130_v58 = vmul.f32 %v2122_v15, %v6301_v0  ;;  %v2131_v45 = vmul.f32 %v2125_v42, %v6301_v0 }
0x144a   :  { %v6305_v20 = vpop.permute.xlu1 %2113 }
0x144b   :  { %v2132_v35 = vmul.f32 %v2121_v29, %v6305_v20  ;;  %v2133_v8 = vmul.f32 %v2124_v55, %v6305_v20 }
0x144d   :  { %v2134_v7 = vpack.c.bf16 %v2132_v35, %v2130_v58  ;;  %v2135_v25 = vpack.c.bf16 %v2133_v8, %v2131_v45 }
0x144f   :  { %v2137_v32 = vsel %vm711_vm12, %v2134_v7, 0  ;;  %v2140_v61 = vsel %vm711_vm12, %v2135_v25, 0  ;;  %v2205_v7 = vrot.slane %v6292_v44, 2  ;;  %v2252_v44 = vrot.slane %v6222_v38, 6 }
0x1450   :  { %2149 = vmatpush.bf16.msra.mxu1 %v2137_v32  ;;  %2162 = vmatpush.bf16.msrb.mxu2 %v2140_v61 }
0x1452   :  { %v6339_v41 = vpop.permute.xlu1 %2266 }
0x1453   :  { %4492 = vmatmul.msk.bf16.vlgmr.msra.gmra.mxu1 %vm626_vm15, %v6156_v2  ;;  %4493 = vmatmul.msk.bf16.vlgmr.msrb.gmra.mxu2 %vm626_vm15, %v6156_v2  ;;  %v6335_v2 = vld [vmem:[%s7166_s11 + $0x30] sm:$0xff]  ;;  %7337 = vst [vmem:[#allocation41_spill] sm:$0xff] %v6339_v41 }
0x1454   :  { %2275 = vmatpush.bf16.msrb.mxu1 %v5751_v53  ;;  %2288 = vmatpush.bf16.msra.mxu2 %v5762_v56 }
0x1458   :  { %2276 = vmatpush.bf16.msrb.mxu1 %v5771_v63  ;;  %2289 = vmatpush.bf16.msra.mxu2 %v5774_v17 }
0x145c   :  { %2277 = vmatpush.bf16.msrb.mxu1 %v5799_v54  ;;  %2290 = vmatpush.bf16.msra.mxu2 %v5812_v48 }
0x1460   :  { %2278 = vmatpush.bf16.msrb.mxu1 %v5827_v59  ;;  %2291 = vmatpush.bf16.msra.mxu2 %v5830_v60 }
0x1463   :  { %4498 = vmatmul.msk.bf16.vlgmr.msrb.gmra.mxu1 %vm144_vm0, %v6339_v41  ;;  %4499 = vmatmul.msk.bf16.vlgmr.msra.gmra.mxu2 %vm144_vm0, %v6339_v41 }
0x1464   :  { %2393 = vmatpush.msra.mxu1 %v6328_v21  ;;  %2451 = vmatpush.msrb.mxu2 %v6172_v33  ;;  %v6355_v33 = vld [vmem:[%s7166_s11 + $0x20] sm:$0xff] }
0x1466   :  { %2394 = vmatpush.msra.mxu1 %v6335_v2  ;;  %2452 = vmatpush.msrb.mxu2 %v6179_v3  ;;  %v6363_v3 = vld [vmem:[%s7166_s11 + $0x18] sm:$0xff] }
0x1468   :  { %2395 = vmatpush.msra.mxu1 %v6344_v27  ;;  %2453 = vmatpush.msrb.mxu2 %v6188_v36  ;;  %v6369_v36 = vld [vmem:[%s7166_s11 + $0x10] sm:$0xff] }
0x146a   :  { %2396 = vmatpush.msra.mxu1 %v6355_v33  ;;  %2454 = vmatpush.msrb.mxu2 %v6199_v13  ;;  %v6376_v13 = vld [vmem:[%s7166_s11 + $0x8] sm:$0xff] }
0x146c   :  { %2581 = vmatpush.bf16.msra.mxu2 %v5605_v37  ;;  %2397 = vmatpush.msra.mxu1 %v6363_v3 }
0x146e   :  { %2398 = vmatpush.msra.mxu1 %v6369_v36 }
0x1470   :  { %2582 = vmatpush.bf16.msra.mxu2 %v5614_v40  ;;  %2399 = vmatpush.msra.mxu1 %v6376_v13 }
0x1472   :  { %2400 = vmatpush.msra.mxu1 %v6382_v23 }
0x1474   :  { %2583 = vmatpush.bf16.msra.mxu2 %v5631_v24 }
0x1478   :  { %2584 = vmatpush.bf16.msra.mxu2 %v5649_v49 }
0x14d0   :  { %v2151_v6 = vpop.f32.mrf.mxu1 }
0x14d1   :  { %v2170_v18 = vrot.slane %v2151_v6, 2 }
0x14d3   :  { %v2174_v47 = vadd.f32 %v2170_v18, %v7324_v22 }
0x14d5   :  { %v2208_v1 = vadd.f32 %v2204_v12, %v2174_v47 }
0x14d6   :  { %v2164_v5 = vpop.f32.mrf.mxu2 }
0x14d7   :  { %v2210_v29 = vadd.f32 %v2208_v1, %v7325_v30  ;;  %v2171_v15 = vrot.slane %v2164_v5, 2 }
0x14d8   :  { %v2153_v9 = vpop.f32.mrf.mxu1 }
0x14d9   :  { %v4496_v55 = vmul.f32 -1.442695, %v2210_v29  ;;  %v2175_v8 = vadd.f32 %v2171_v15, %v7326_v34 }
0x14db   :  { %4789 = vpow2.f32 %v4496_v55  ;;  %v2209_v39 = vadd.f32 %v2205_v7, %v2175_v8 }
0x14dd   :  { %v2211_v61 = vadd.f32 %v2209_v39, %v7327_v50 }
0x14de   :  { %v2166_v42 = vpop.f32.mrf.mxu2 }
0x14df   :  { %v4497_v8 = vmul.f32 -1.442695, %v2211_v61 }
0x14e0   :  { %v6390_v58 = vpop.f32.mrf.mxu1 }
0x14e1   :  { %v4790_v45 = vpop.eup %4789 }
0x14e2   :  { %v2215_v35 = vadd.f32 1.0, %v4790_v45 }
0x14e4   :  { %4791 = vrcp.f32 %v2215_v35  ;;  %v2227_v47 = vand.u32 2147483648, %v2215_v35  ;;  %v2225_v5 = vand.u32 2147483647, %v2215_v35  ;;  %vm2221_vm10 = vweird.f32 %v2215_v35 }
0x14e5   :  { %4793 = vtanh.f32 %v2211_v61 }
0x14e6   :  { %v6394_v22 = vpop.f32.mrf.mxu2  ;;  %v2228_v34 = vor.u32 1.1754944e-38, %v2227_v47  ;;  %vm2226_vm8 = vcmp.eq.f32.partialorder %v2225_v5, 8.507059e+37  ;;  %4795 = vpow2.f32 %v4497_v8 }
0x14e8   :  { %v2282_v25 = vpop.f32.mrf.mxu1 }
0x14ea   :  { %v4792_v32 = vpop.eup %4791 }
0x14eb   :  { %v2217_v6 = vmul.f32 %v4792_v32, %v2215_v35  ;;  %vm2222_vm14 = vweird.f32 %v4792_v32  ;;  %v4794_v55 = vpop.eup %4793 }
0x14ec   :  { %vm2223_vm7 = vmor %vm2221_vm10, %vm2222_vm14  ;;  %v4796_v7 = vpop.eup %4795 }
0x14ed   :  { %v2218_v18 = vsub.f32 1.0, %v2217_v6  ;;  %v2235_v39 = vadd.f32 1.0, %v4796_v7 }
0x14ee   :  { %v2295_v12 = vpop.f32.mrf.mxu2 }
0x14ef   :  { %v2219_v1 = vmul.f32 %v4792_v32, %v2218_v18  ;;  %4797 = vrcp.f32 %v2235_v39  ;;  %vm2241_vm4 = vweird.f32 %v2235_v39 }
0x14f1   :  { %v2220_v29 = vadd.f32 %v4792_v32, %v2219_v1  ;;  %v2245_v1 = vand.u32 2147483647, %v2235_v39 }
0x14f3   :  { %v2224_v9 = vsel %vm2223_vm7, %v4792_v32, %v2220_v29  ;;  %v2247_v32 = vand.u32 2147483648, %v2235_v39  ;;  %vm2246_vm14 = vcmp.eq.f32.partialorder %v2245_v1, 8.507059e+37 }
0x14f4   :  { %v2229_v15 = vsel %vm2226_vm8, %v2228_v34, %v2224_v9 }
0x14f5   :  { %v2255_v42 = vmul.f32 %v4794_v55, %v2229_v15  ;;  %v2254_v45 = vmul.f32 %v2252_v44, %v2229_v15  ;;  %v4798_v25 = vpop.eup %4797  ;;  %v2248_v5 = vor.u32 1.1754944e-38, %v2247_v32 }
0x14f6   :  { %v2237_v6 = vmul.f32 %v4798_v25, %v2235_v39  ;;  %vm2242_vm9 = vweird.f32 %v4798_v25 }
0x14f7   :  { %2257 = vrot.lane.b32.xlu0 %v2255_v42, %s5068_s29  ;;  %vm2243_vm6 = vmor %vm2241_vm4, %vm2242_vm9 }
0x14f8   :  { %v2238_v35 = vsub.f32 1.0, %v2237_v6 }
0x14fa   :  { %v2239_v18 = vmul.f32 %v4798_v25, %v2238_v35 }
0x14fc   :  { %v2240_v38 = vadd.f32 %v4798_v25, %v2239_v18 }
0x14fe   :  { %v2244_v61 = vsel %vm2243_vm6, %v4798_v25, %v2240_v38 }
0x14ff   :  { %v2249_v34 = vsel %vm2246_vm14, %v2248_v5, %v2244_v61 }
0x1569   :  { %v2258_v12 = vpop.permute.xlu0 %2257 }
0x156a   :  { %v6399_v47 = vadd.f32 %v2258_v12, %v2254_v45 }
0x156c   :  { %4799 = vtanh.f32 %v6399_v47 }
0x1572   :  { %v4800_v29 = vpop.eup %4799 }
0x1573   :  { %v2262_v44 = vmul.f32 %v4800_v29, %v2249_v34 }
0x1575   :  { %v2263_v9 = vpack.c.bf16 %v2262_v44, %v2262_v44 }
0x1577   :  { %v2298_v55 = vrot.slane %v2263_v9, 3 }
0x1579   :  { %2299 = vrot.lane.b32.xlu2 %v2298_v55, %s5068_s29 }
0x15d3   :  { %v6403_v15 = vpop.permute.xlu2 %2299 }
0x15d4   :  { %4500 = vmatmul.msk.bf16.vlgmr.msrb.gmra.mxu3 %vm144_vm0, %v6403_v15  ;;  %4501 = vmatmul.msk.bf16.vlgmr.msrb.gmra.mxu0 %vm144_vm0, %v6403_v15 }
0x1651   :  { %v2326_v42 = vpop.f32.mrf.mxu0 }
0x1652   :  { %v2327_v12 = vadd.f32 %v2326_v42, %v6394_v22 }
0x1654   :  { %v2331_v32 = vadd.f32 %v2327_v12, %v5884_v4 }
0x1656   :  { %v4503_v22 = vmul.f32 -1.442695, %v2331_v32 }
0x1657   :  { %v2313_v45 = vpop.f32.mrf.mxu3 }
0x1658   :  { %v2314_v8 = vadd.f32 %v2313_v45, %v6390_v58 }
0x1659   :  { %v2328_v7 = vpop.f32.mrf.mxu0 }
0x165a   :  { %v2330_v39 = vadd.f32 %v2314_v8, %v5881_v51 }
0x165c   :  { %v4502_v25 = vmul.f32 -1.442695, %v2330_v39 }
0x165e   :  { %4801 = vpow2.f32 %v4502_v25 }
0x165f   :  { %v2315_v6 = vpop.f32.mrf.mxu3 }
0x1664   :  { %v4802_v35 = vpop.eup %4801 }
0x1665   :  { %v2335_v18 = vadd.f32 1.0, %v4802_v35 }
0x1667   :  { %4803 = vrcp.f32 %v2335_v18  ;;  %v2347_v5 = vand.u32 2147483648, %v2335_v18  ;;  %v2345_v58 = vand.u32 2147483647, %v2335_v18  ;;  %vm2341_vm7 = vweird.f32 %v2335_v18 }
0x1668   :  { %4805 = vtanh.f32 %v2331_v32 }
0x1669   :  { %v2348_v44 = vor.u32 1.1754944e-38, %v2347_v5  ;;  %vm2346_vm9 = vcmp.eq.f32.partialorder %v2345_v58, 8.507059e+37  ;;  %4807 = vpow2.f32 %v4503_v22 }
0x166d   :  { %v4804_v38 = vpop.eup %4803 }
0x166e   :  { %v2337_v1 = vmul.f32 %v4804_v38, %v2335_v18  ;;  %vm2342_vm10 = vweird.f32 %v4804_v38  ;;  %v4806_v55 = vpop.eup %4805 }
0x166f   :  { %vm2343_vm8 = vmor %vm2341_vm7, %vm2342_vm10  ;;  %v4808_v42 = vpop.eup %4807 }
0x1670   :  { %v2338_v61 = vsub.f32 1.0, %v2337_v1  ;;  %v2355_v7 = vadd.f32 1.0, %v4808_v42 }
0x1672   :  { %v2339_v29 = vmul.f32 %v4804_v38, %v2338_v61  ;;  %4809 = vrcp.f32 %v2355_v7  ;;  %v2367_v61 = vand.u32 2147483648, %v2355_v7  ;;  %vm2361_vm6 = vweird.f32 %v2355_v7 }
0x1673   :  { %v2365_v32 = vand.u32 2147483647, %v2355_v7 }
0x1674   :  { %v2340_v34 = vadd.f32 %v4804_v38, %v2339_v29  ;;  %v2368_v29 = vor.u32 1.1754944e-38, %v2367_v61 }
0x1675   :  { %vm2366_vm10 = vcmp.eq.f32.partialorder %v2365_v32, 8.507059e+37 }
0x1676   :  { %v2344_v9 = vsel %vm2343_vm8, %v4804_v38, %v2340_v34 }
0x1677   :  { %v2349_v45 = vsel %vm2346_vm9, %v2348_v44, %v2344_v9 }
0x1678   :  { %v2372_v8 = vmul.f32 %v4806_v55, %v2349_v45  ;;  %v4810_v39 = vpop.eup %4809  ;;  %v2371_v18 = vmul.f32 %v2349_v45, %v6238_v31  ;;  %v7338_v45 = vld [vmem:[#allocation16_spill] sm:$0xff] }
0x1679   :  { %v2357_v25 = vmul.f32 %v4810_v39, %v2355_v7  ;;  %vm2362_vm4 = vweird.f32 %v4810_v39  ;;  %v7339_v7 = vld [vmem:[#allocation19_spill] sm:$0xff] }
0x167a   :  { %2374 = vrot.lane.b32.xlu0 %v2372_v8, %s5068_s29  ;;  %vm2363_vm14 = vmor %vm2361_vm6, %vm2362_vm4 }
0x167b   :  { %v2358_v6 = vsub.f32 1.0, %v2357_v25 }
0x167d   :  { %v2359_v35 = vmul.f32 %v4810_v39, %v2358_v6 }
0x167f   :  { %v2360_v38 = vadd.f32 %v4810_v39, %v2359_v35 }
0x1681   :  { %v2364_v5 = vsel %vm2363_vm14, %v4810_v39, %v2360_v38 }
0x1682   :  { %v2369_v34 = vsel %vm2366_vm10, %v2368_v29, %v2364_v5 }
0x16ec   :  { %v2375_v12 = vpop.permute.xlu0 %2374 }
0x16ed   :  { %v6415_v1 = vadd.f32 %v2375_v12, %v2371_v18  ;;  %v7341_v18 = vld [vmem:[#allocation18_spill] sm:$0xff] }
0x16ef   :  { %4811 = vtanh.f32 %v6415_v1 }
0x16f5   :  { %v4812_v58 = vpop.eup %4811 }
0x16f6   :  { %v6418_v44 = vmul.f32 %v4812_v58, %v2369_v34  ;;  %v6446_v58 = vld [vmem:[%s7159_s4] sm:$0xff] }
0x16f8   :  { %2381 = vrot.lane.b32.xlu2 %v6418_v44, %s5068_s29 }
0x1752   :  { %v2382_v31 = vpop.permute.xlu2 %2381 }
0x1753   :  { %4504 = vmatmul.msk.f32.vlgmr.msra.gmra.mxu1 %vm144_vm0, %v2382_v31  ;;  %v6455_v31 = vld [vmem:[%s7159_s4 + $0x8] sm:$0x3] }
0x17d0   :  { %v2402_v9 = vpop.f32.mrf.mxu1 }
0x17d1   :  { %4505 = vmatpush.msk.msrb.mxu1 %vm562_vm1, %v2402_v9  ;;  %v7342_v9 = vld [vmem:[#allocation54_spill] sm:$0xff] }
0x17d2   :  { %4506 = vmatmul.msk.f32.vlgmr.msrb.gmra.mxu1 %vm555_vm2, %v6250_v46 }
0x17da   :  { %4507 = vmatmul.msk.f32.gmra.mxu1 %vm555_vm2, %v6257_v28  ;;  %v7340_v28 = vld [vmem:[#allocation14_spill] sm:$0xff] }
0x184f   :  { %v2425_v55 = vpop.f32.mrf.mxu1 }
0x1850   :  { %v2426_v8 = vadd.f32 %v2425_v55, %v7338_v45  ;;  %v7343_v55 = vld [vmem:[#allocation55_spill] sm:$0xff] }
0x1852   :  { %4813 = vtanh.f32 %v2426_v8 }
0x1857   :  { %v2428_v22 = vpop.f32.mrf.mxu1 }
0x1858   :  { %v4814_v42 = vpop.eup %4813  ;;  %v2429_v39 = vadd.f32 %v2428_v22, %v7339_v7 }
0x1859   :  { %4508 = vmatmul.msk.f32.vlgmr.msrb.gmra.mxu2 %vm358_vm5, %v4814_v42 }
0x185a   :  { %4815 = vtanh.f32 %v2429_v39  ;;  %2702 = vmatpush.bf16.msrb.mxu2 %v5776_v62 }
0x185e   :  { %2703 = vmatpush.bf16.msrb.mxu2 %v5796_v26 }
0x1860   :  { %v4816_v25 = vpop.eup %4815 }
0x1861   :  { %4509 = vmatmul.msk.f32.gmra.mxu2 %vm358_vm5, %v4816_v25 }
0x1862   :  { %2704 = vmatpush.bf16.msrb.mxu2 %v5822_v11 }
0x1866   :  { %2705 = vmatpush.bf16.msrb.mxu2 %v5834_v52 }
0x1869   :  { %4515 = vmatmul.msk.bf16.vlgmr.msra.gmra.mxu2 %vm144_vm0, %v6403_v15 }
0x18dc   :  { %v2456_v46 = vpop.f32.mrf.mxu2 }
0x18dd   :  { %v2462_v6 = vmul.f32 %v7340_v28, %v2456_v46 }
0x18df   :  { %v2464_v38 = vmul.f32 1.442695, %v2462_v6 }
0x18e4   :  { %v2459_v35 = vpop.f32.mrf.mxu2 }
0x18e5   :  { %v2463_v12 = vmul.f32 %v7341_v18, %v2459_v35 }
0x18e7   :  { %v2466_v61 = vmul.f32 1.442695, %v2463_v12 }
0x18e9   :  { %4817 = vpow2.f32 %v2466_v61 }
0x18ea   :  { %4819 = vpow2.f32 %v2464_v38 }
0x18ec   :  { %v6440_v32 = vpop.f32.mrf.mxu2 }
0x18ef   :  { %v4818_v5 = vpop.eup %4817 }
0x18f0   :  { %4510 = vmatpush.msk.msra.mxu3 %vm562_vm1, %v4818_v5  ;;  %v4820_v29 = vpop.eup %4819 }
0x18f2   :  { %2486 = vmatpush.msra.mxu3 %v4820_v29 }
0x18f3   :  { %4511 = vmatmul.msk.f32.vlgmr.msra.gmra.mxu3 %vm626_vm15, %v6446_v58 }
0x18f4   :  { %v2588_v34 = vpop.f32.mrf.mxu2  ;;  %2594 = vmatpush.bf16.msrb.mxu3 %v5626_v10 }
0x18f8   :  { %2595 = vmatpush.bf16.msrb.mxu3 %v5641_v16 }
0x18fb   :  { %4512 = vmatmul.msk.f32.gmra.mxu3 %vm626_vm15, %v6455_v31 }
0x18fc   :  { %2596 = vmatpush.bf16.msrb.mxu3 %v5659_v43 }
0x1900   :  { %2597 = vmatpush.bf16.msrb.mxu3 %v5668_v19 }
0x1903   :  { %4516 = vmatmul.msk.bf16.vlgmr.msrb.gmra.mxu3 %vm144_vm0, %v6403_v15 }
0x1904   :  { %2715 = vmatpush.bf16.msra.mxu3 %v5778_v57 }
0x1908   :  { %2716 = vmatpush.bf16.msra.mxu3 %v5801_v14 }
0x190c   :  { %2717 = vmatpush.bf16.msra.mxu3 %v7342_v9 }
0x1910   :  { %2718 = vmatpush.bf16.msra.mxu3 %v7343_v55 }
0x1976   :  { %v2488_v45 = vpop.f32.mrf.mxu3 }
0x1977   :  { %4821 = vrcp.f32 %v2488_v45  ;;  %v2505_v25 = vand.u32 2147483648, %v2488_v45  ;;  %v2503_v28 = vand.u32 2147483647, %v2488_v45  ;;  %vm2499_vm8 = vweird.f32 %v2488_v45 }
0x1979   :  { %v2506_v35 = vor.u32 1.1754944e-38, %v2505_v25  ;;  %vm2504_vm4 = vcmp.eq.f32.partialorder %v2503_v28, 8.507059e+37 }
0x197d   :  { %v4822_v8 = vpop.eup %4821 }
0x197e   :  { %v2495_v22 = vmul.f32 %v4822_v8, %v2488_v45  ;;  %v2491_v42 = vpop.f32.mrf.mxu3  ;;  %vm2500_vm7 = vweird.f32 %v4822_v8 }
0x197f   :  { %4823 = vrcp.f32 %v2491_v42  ;;  %vm2501_vm9 = vmor %vm2499_vm8, %vm2500_vm7  ;;  %v2520_v55 = vand.u32 2147483648, %v2491_v42  ;;  %vm2514_vm14 = vweird.f32 %v2491_v42 }
0x1980   :  { %v2496_v39 = vsub.f32 1.0, %v2495_v22  ;;  %v2518_v22 = vand.u32 2147483647, %v2491_v42 }
0x1982   :  { %v2497_v46 = vmul.f32 %v4822_v8, %v2496_v39  ;;  %vm2519_vm7 = vcmp.eq.f32.partialorder %v2518_v22, 8.507059e+37  ;;  %v7352_v22 = vld [vmem:[#allocation44_spill] sm:$0xff] }
0x1984   :  { %v2498_v6 = vadd.f32 %v4822_v8, %v2497_v46  ;;  %v2521_v46 = vor.u32 1.1754944e-38, %v2520_v55 }
0x1985   :  { %v4824_v15 = vpop.eup %4823 }
0x1986   :  { %v2510_v12 = vmul.f32 %v4824_v15, %v2491_v42  ;;  %v6467_v38 = vpop.f32.mrf.mxu3  ;;  %v2502_v61 = vsel %vm2501_vm9, %v4822_v8, %v2498_v6  ;;  %vm2515_vm6 = vweird.f32 %v4824_v15  ;;  %v2659_v8 = vpack.c.bf16 %v6418_v44, %v6418_v44  ;;  %v7347_v42 = vld [vmem:[#allocation11_spill] sm:$0xff]  ;;  %v7348_v44 = vld [vmem:[#allocation33_spill] sm:$0xff] }
0x1987   :  { %v2507_v34 = vsel %vm2504_vm4, %v2506_v35, %v2502_v61  ;;  %vm2516_vm10 = vmor %vm2514_vm14, %vm2515_vm6  ;;  %v7351_v61 = vld [vmem:[#allocation34_spill] sm:$0xff] }
0x1988   :  { %v2511_v41 = vsub.f32 1.0, %v2510_v12  ;;  %v2508_v0 = vmul.f32 %v4820_v29, %v2507_v34  ;;  %v7344_v29 = vld [vmem:[#allocation39_spill] sm:$0xff] }
0x198a   :  { %v2512_v9 = vmul.f32 %v4824_v15, %v2511_v41  ;;  %2527 = vperm.xlu1 %4663, %v2508_v0   ;;  %v7345_v41 = vld [vmem:[#allocation12_spill] sm:$0xff]  ;;  %v701_v0 = vsel %vm689_vm13, %v7344_v29, 0.0 }
0x198b   :  { %vm2105_vm8 = vcmp.eq.s32.totalorder %v7345_v41, 3  ;;  %vm2524_vm9 = vcmp.eq.s32.totalorder %v7345_v41, 4 }
0x198c   :  { %v2513_v39 = vadd.f32 %v4824_v15, %v2512_v9  ;;  %v7346_v9 = vld [vmem:[#allocation56_spill] sm:$0xff] }
0x198d   :  { %v1252_v55 = vsel %vm1240_vm11, %v7346_v9, %v701_v0 }
0x198e   :  { %v2601_v45 = vpop.f32.mrf.mxu3  ;;  %v2517_v14 = vsel %vm2516_vm10, %v4824_v15, %v2513_v39  ;;  %v7349_v15 = vld [vmem:[#allocation43_spill] sm:$0xff] }
0x198f   :  { %v2522_v25 = vsel %vm2519_vm7, %v2521_v46, %v2517_v14  ;;  %v1686_v14 = vsel %vm1674_vm3, %v7347_v42, %v1252_v55 }
0x1990   :  { %v2523_v57 = vmul.f32 %v4818_v5, %v2522_v25 }
0x1992   :  { %2532 = vperm.xlu0 %4665, %v2523_v57   ;;  %v2117_v57 = vsel %vm2105_vm8, %v6305_v20, %v1686_v14 }
0x199a   :  { %2661 = vrot.lane.b32.xlu0 %v2659_v8, %s5068_s29  ;;  %v6505_v8 = vld [vmem:[%s7291_s7] sm:$0x1] }
0x19fc   :  { %v6475_v28 = vpop.permute.xlu1 %2527 }
0x19fd   :  { %v2537_v5 = vmul.f32 %v6475_v28, %v7348_v44  ;;  %v2538_v35 = vmul.f32 %v6475_v28, %v7349_v15 }
0x1a04   :  { %v2533_v6 = vpop.permute.xlu0 %2532 }
0x1a05   :  { %v6494_v12 = vsel %vm2524_vm9, %v2533_v6, %v2117_v57  ;;  %v2539_v34 = vmul.f32 %v2533_v6, %v7351_v61  ;;  %v2540_v39 = vmul.f32 %v2533_v6, %v7352_v22 }
0x1a06   :  { %7350 = vst [vmem:[#allocation48_spill] sm:$0xff] %v6494_v12 }
0x1a07   :  { %v2541_v46 = vpack.c.bf16 %v2539_v34, %v2537_v5  ;;  %v2542_v45 = vpack.c.bf16 %v2540_v39, %v2538_v35  ;;  %v7357_v35 = vld [vmem:[#allocation10_spill] sm:$0xff] }
0x1a09   :  { %v2544_v20 = vsel %vm711_vm12, %v2541_v46, 0  ;;  %v2547_v25 = vsel %vm711_vm12, %v2542_v45, 0 }
0x1a0a   :  { %2556 = vmatpush.bf16.msra.mxu0 %v2544_v20  ;;  %2569 = vmatpush.bf16.msra.mxu1 %v2547_v25 }
0x1a0c   :  { %v6519_v29 = vpop.permute.xlu0 %2661 }
0x1a0d   :  { %4513 = vmatmul.msk.bf16.vlgmr.msra.gmra.mxu0 %vm626_vm15, %v6505_v8  ;;  %4514 = vmatmul.msk.bf16.vlgmr.msra.gmra.mxu1 %vm626_vm15, %v6505_v8  ;;  %7353 = vst [vmem:[#allocation49_spill] sm:$0xff] %v6519_v29 }
0x1a0e   :  { %2670 = vmatpush.bf16.msrb.mxu0 %v5751_v53  ;;  %2683 = vmatpush.bf16.msrb.mxu1 %v5762_v56 }
0x1a12   :  { %2671 = vmatpush.bf16.msrb.mxu0 %v5771_v63  ;;  %2684 = vmatpush.bf16.msrb.mxu1 %v5774_v17 }
0x1a16   :  { %2672 = vmatpush.bf16.msrb.mxu0 %v5799_v54  ;;  %2685 = vmatpush.bf16.msrb.mxu1 %v5812_v48 }
0x1a1a   :  { %2673 = vmatpush.bf16.msrb.mxu0 %v5827_v59  ;;  %2686 = vmatpush.bf16.msrb.mxu1 %v5830_v60 }
0x1a1d   :  { %4519 = vmatmul.msk.bf16.vlgmr.msrb.gmra.mxu0 %vm144_vm0, %v6519_v29  ;;  %4520 = vmatmul.msk.bf16.vlgmr.msrb.gmra.mxu1 %vm144_vm0, %v6519_v29 }
0x1a1e   :  { %2787 = vmatpush.msra.mxu1 %v6328_v21  ;;  %v6534_v21 = vld [vmem:[%s7167_s12 + $0x18] sm:$0xff] }
0x1a20   :  { %2788 = vmatpush.msra.mxu1 %v6335_v2  ;;  %v6540_v2 = vld [vmem:[%s7167_s12 + $0x10] sm:$0xff] }
0x1a22   :  { %2789 = vmatpush.msra.mxu1 %v6344_v27  ;;  %v6546_v27 = vld [vmem:[%s7167_s12 + $0x8] sm:$0xff] }
0x1a24   :  { %2790 = vmatpush.msra.mxu1 %v6355_v33  ;;  %v6552_v33 = vld [vmem:[%s7167_s12] sm:$0xff] }
0x1a26   :  { %2791 = vmatpush.msra.mxu1 %v6363_v3  ;;  %v7354_v3 = vld [vmem:[#allocation9_spill] sm:$0xff] }
0x1a28   :  { %2792 = vmatpush.msra.mxu1 %v6369_v36  ;;  %v7355_v36 = vperm.slane %v7354_v3, 0 }
0x1a2a   :  { %2793 = vmatpush.msra.mxu1 %v6376_v13  ;;  %v7356_v13 = vld [vmem:[#allocation8_spill] sm:$0xff] }
0x1a2c   :  { %2794 = vmatpush.msra.mxu1 %v6382_v23  ;;  %v6558_v23 = vadd.f32 %v7356_v13, %v7355_v36 }
0x1a2e   :  { %2852 = vmatpush.msrb.mxu1 %v6534_v21 }
0x1a30   :  { %2853 = vmatpush.msrb.mxu1 %v6540_v2 }
0x1a32   :  { %2854 = vmatpush.msrb.mxu1 %v6546_v27 }
0x1a34   :  { %2855 = vmatpush.msrb.mxu1 %v6552_v33 }
0x1a8a   :  { %v2558_v0 = vpop.f32.mrf.mxu0  ;;  %v2571_v9 = vpop.f32.mrf.mxu1 }
0x1a8b   :  { %v2575_v55 = vadd.f32 %v2558_v0, %v6558_v23  ;;  %v2576_v34 = vadd.f32 %v2571_v9, %v7357_v35 }
0x1a8d   :  { %v2603_v42 = vadd.f32 %v6440_v32, %v2575_v55  ;;  %v2604_v45 = vadd.f32 %v6467_v38, %v2576_v34 }
0x1a8f   :  { %v2605_v14 = vadd.f32 %v2603_v42, %v7325_v30  ;;  %v2606_v25 = vadd.f32 %v2604_v45, %v7327_v50 }
0x1a91   :  { %v4517_v57 = vmul.f32 -1.442695, %v2605_v14  ;;  %v4518_v45 = vmul.f32 -1.442695, %v2606_v25 }
0x1a92   :  { %v2560_v44 = vpop.f32.mrf.mxu0  ;;  %v2573_v5 = vpop.f32.mrf.mxu1 }
0x1a93   :  { %4825 = vpow2.f32 %v4517_v57  ;;  %v2647_v57 = vrot.slane %v6399_v47, 6 }
0x1a99   :  { %v4826_v6 = vpop.eup %4825 }
0x1a9a   :  { %v2610_v15 = vadd.f32 1.0, %v4826_v6  ;;  %v2675_v39 = vpop.f32.mrf.mxu0  ;;  %v6564_v46 = vpop.f32.mrf.mxu1 }
0x1a9c   :  { %4827 = vrcp.f32 %v2610_v15  ;;  %v2622_v0 = vand.u32 2147483648, %v2610_v15  ;;  %v2620_v42 = vand.u32 2147483647, %v2610_v15  ;;  %vm2616_vm13 = vweird.f32 %v2610_v15 }
0x1a9d   :  { %4829 = vtanh.f32 %v2606_v25 }
0x1a9e   :  { %v2623_v9 = vor.u32 1.1754944e-38, %v2622_v0  ;;  %vm2621_vm4 = vcmp.eq.f32.partialorder %v2620_v42, 8.507059e+37  ;;  %4831 = vpow2.f32 %v4518_v45 }
0x1aa2   :  { %v4828_v20 = vpop.eup %4827  ;;  %v2677_v32 = vpop.f32.mrf.mxu0 }
0x1aa3   :  { %v2690_v3 = vpop.f32.mrf.mxu1  ;;  %v2612_v36 = vmul.f32 %v4828_v20, %v2610_v15  ;;  %vm2617_vm11 = vweird.f32 %v4828_v20  ;;  %v4830_v38 = vpop.eup %4829 }
0x1aa4   :  { %vm2618_vm3 = vmor %vm2616_vm13, %vm2617_vm11  ;;  %v4832_v32 = vpop.eup %4831 }
0x1aa5   :  { %v2613_v13 = vsub.f32 1.0, %v2612_v36  ;;  %v2630_v3 = vadd.f32 1.0, %v4832_v32 }
0x1aa7   :  { %v2614_v55 = vmul.f32 %v4828_v20, %v2613_v13  ;;  %4833 = vrcp.f32 %v2630_v3  ;;  %vm2636_vm14 = vweird.f32 %v2630_v3  ;;  %v2640_v42 = vand.u32 2147483647, %v2630_v3 }
0x1aa9   :  { %v2615_v14 = vadd.f32 %v4828_v20, %v2614_v55  ;;  %vm2641_vm7 = vcmp.eq.f32.partialorder %v2640_v42, 8.507059e+37 }
0x1aab   :  { %v2619_v44 = vsel %vm2618_vm3, %v4828_v20, %v2615_v14  ;;  %v2642_v20 = vand.u32 2147483648, %v2630_v3 }
0x1aac   :  { %v2624_v5 = vsel %vm2621_vm4, %v2623_v9, %v2619_v44 }
0x1aad   :  { %v2650_v6 = vmul.f32 %v4830_v38, %v2624_v5  ;;  %v2649_v34 = vmul.f32 %v2647_v57, %v2624_v5  ;;  %v4834_v36 = vpop.eup %4833  ;;  %v2643_v14 = vor.u32 1.1754944e-38, %v2642_v20 }
0x1aae   :  { %v2632_v13 = vmul.f32 %v4834_v36, %v2630_v3  ;;  %vm2637_vm6 = vweird.f32 %v4834_v36 }
0x1aaf   :  { %2652 = vrot.lane.b32.xlu2 %v2650_v6, %s5068_s29  ;;  %vm2638_vm10 = vmor %vm2636_vm14, %vm2637_vm6 }
0x1ab0   :  { %v2633_v15 = vsub.f32 1.0, %v2632_v13 }
0x1ab2   :  { %v2634_v55 = vmul.f32 %v4834_v36, %v2633_v15 }
0x1ab4   :  { %v2635_v47 = vadd.f32 %v4834_v36, %v2634_v55 }
0x1ab6   :  { %v2639_v25 = vsel %vm2638_vm10, %v4834_v36, %v2635_v47 }
0x1ab7   :  { %v2644_v57 = vsel %vm2641_vm7, %v2643_v14, %v2639_v25 }
0x1b09   :  { %v2653_v0 = vpop.permute.xlu2 %2652 }
0x1b0a   :  { %v6570_v29 = vadd.f32 %v2653_v0, %v2649_v34 }
0x1b0c   :  { %4835 = vtanh.f32 %v6570_v29 }
0x1b12   :  { %v4836_v9 = vpop.eup %4835 }
0x1b13   :  { %v2657_v44 = vmul.f32 %v4836_v9, %v2644_v57 }
0x1b15   :  { %v2658_v38 = vpack.c.bf16 %v2657_v44, %v2657_v44 }
0x1b17   :  { %2693 = vrot.lane.b32.xlu1 %v2658_v38, %s5068_s29 }
0x1b89   :  { %v6574_v5 = vpop.permute.xlu1 %2693 }
0x1b8a   :  { %4521 = vmatmul.msk.bf16.vlgmr.msrb.gmra.mxu2 %vm144_vm0, %v6574_v5  ;;  %4522 = vmatmul.msk.bf16.vlgmr.msra.gmra.mxu3 %vm144_vm0, %v6574_v5 }
0x1c0d   :  { %v2707_v6 = vpop.f32.mrf.mxu2  ;;  %v2720_v34 = vpop.f32.mrf.mxu3 }
0x1c0e   :  { %v2708_v45 = vadd.f32 %v2707_v6, %v2675_v39  ;;  %v2721_v0 = vadd.f32 %v2720_v34, %v6564_v46 }
0x1c10   :  { %v2724_v32 = vadd.f32 %v2708_v45, %v5881_v51  ;;  %v2725_v20 = vadd.f32 %v2721_v0, %v5884_v4 }
0x1c12   :  { %v4523_v3 = vmul.f32 -1.442695, %v2724_v32  ;;  %v4524_v46 = vmul.f32 -1.442695, %v2725_v20 }
0x1c14   :  { %4837 = vpow2.f32 %v4523_v3 }
0x1c15   :  { %v2709_v36 = vpop.f32.mrf.mxu2  ;;  %v2722_v13 = vpop.f32.mrf.mxu3 }
0x1c1a   :  { %v4838_v15 = vpop.eup %4837 }
0x1c1b   :  { %v2729_v55 = vadd.f32 1.0, %v4838_v15 }
0x1c1d   :  { %4839 = vrcp.f32 %v2729_v55  ;;  %v2741_v14 = vand.u32 2147483648, %v2729_v55  ;;  %v2739_v39 = vand.u32 2147483647, %v2729_v55  ;;  %vm2735_vm13 = vweird.f32 %v2729_v55 }
0x1c1e   :  { %4841 = vtanh.f32 %v2725_v20 }
0x1c1f   :  { %v2742_v44 = vor.u32 1.1754944e-38, %v2741_v14  ;;  %vm2740_vm4 = vcmp.eq.f32.partialorder %v2739_v39, 8.507059e+37  ;;  %4843 = vpow2.f32 %v4524_v46  ;;  %v2801_v46 = vrot.slane %v7339_v7, 2 }
0x1c23   :  { %v4840_v47 = vpop.eup %4839 }
0x1c24   :  { %v2731_v42 = vmul.f32 %v4840_v47, %v2729_v55  ;;  %vm2736_vm11 = vweird.f32 %v4840_v47  ;;  %v4842_v6 = vpop.eup %4841 }
0x1c25   :  { %vm2737_vm3 = vmor %vm2735_vm13, %vm2736_vm11  ;;  %v4844_v34 = vpop.eup %4843  ;;  %vm7359_vm11 = vcmask 1045504  }
0x1c26   :  { %v2732_v25 = vsub.f32 1.0, %v2731_v42  ;;  %v2749_v3 = vadd.f32 1.0, %v4844_v34  ;;  %v7358_v34 = vld [vmem:[#allocation20_spill] sm:$0xff]  ;;  %vm7361_vm13 = vmmov %vm7359_vm11 }
0x1c28   :  { %v2733_v9 = vmul.f32 %v4840_v47, %v2732_v25  ;;  %4845 = vrcp.f32 %v2749_v3  ;;  %v2761_v14 = vand.u32 2147483648, %v2749_v3  ;;  %vm2755_vm14 = vweird.f32 %v2749_v3 }
0x1c29   :  { %v2759_v20 = vand.u32 2147483647, %v2749_v3 }
0x1c2a   :  { %v2734_v57 = vadd.f32 %v4840_v47, %v2733_v9  ;;  %v2762_v39 = vor.u32 1.1754944e-38, %v2761_v14  ;;  %v7360_v14 = vld [vmem:[#allocation17_spill] sm:$0xff] }
0x1c2b   :  { %vm2760_vm7 = vcmp.eq.f32.partialorder %v2759_v20, 8.507059e+37  ;;  %v2866_v20 = vrot.slane %v7360_v14, 2 }
0x1c2c   :  { %v2738_v38 = vsel %vm2737_vm3, %v4840_v47, %v2734_v57 }
0x1c2d   :  { %v2743_v45 = vsel %vm2740_vm4, %v2742_v44, %v2738_v38 }
0x1c2e   :  { %v2766_v32 = vmul.f32 %v4842_v6, %v2743_v45  ;;  %v4846_v36 = vpop.eup %4845  ;;  %v2765_v55 = vmul.f32 %v2743_v45, %v6415_v1  ;;  %v6601_v45 = vld [vmem:[%s7259_s22] sm:$0xff] }
0x1c2f   :  { %v2751_v13 = vmul.f32 %v4846_v36, %v2749_v3  ;;  %vm2756_vm6 = vweird.f32 %v4846_v36  ;;  %v2802_v3 = vrot.slane %v7358_v34, 2 }
0x1c30   :  { %2768 = vrot.lane.b32.xlu2 %v2766_v32, %s5068_s29  ;;  %vm2757_vm10 = vmor %vm2755_vm14, %vm2756_vm6  ;;  %v6608_v32 = vld [vmem:[%s7259_s22 + $0x8] sm:$0x3] }
0x1c31   :  { %v2752_v15 = vsub.f32 1.0, %v2751_v13 }
0x1c33   :  { %v2753_v0 = vmul.f32 %v4846_v36, %v2752_v15 }
0x1c35   :  { %v2754_v47 = vadd.f32 %v4846_v36, %v2753_v0 }
0x1c37   :  { %v2758_v9 = vsel %vm2757_vm10, %v4846_v36, %v2754_v47  ;;  %v2803_v36 = vsel %vm7359_vm11, %v2801_v46, %v2802_v3 }
0x1c38   :  { %v2763_v44 = vsel %vm2760_vm7, %v2762_v39, %v2758_v9  ;;  %v2865_v9 = vrot.slane %v7341_v18, 2 }
0x1c3a   :  { %v2867_v39 = vsel %vm7361_vm13, %v2865_v9, %v2866_v20 }
0x1c8a   :  { %v2769_v42 = vpop.permute.xlu2 %2768 }
0x1c8b   :  { %v6585_v25 = vadd.f32 %v2769_v42, %v2765_v55 }
0x1c8d   :  { %4847 = vtanh.f32 %v6585_v25 }
0x1c93   :  { %v4848_v57 = vpop.eup %4847 }
0x1c94   :  { %v6588_v38 = vmul.f32 %v4848_v57, %v2763_v44 }
0x1c96   :  { %2775 = vrot.lane.b32.xlu1 %v6588_v38, %s5068_s29 }
0x1d08   :  { %v2776_v1 = vpop.permute.xlu1 %2775 }
0x1d09   :  { %4525 = vmatmul.msk.f32.vlgmr.msra.gmra.mxu1 %vm144_vm0, %v2776_v1 }
0x1d0a   :  { %3009 = vmatpush.bf16.msra.mxu1 %v5605_v37 }
0x1d0e   :  { %3010 = vmatpush.bf16.msra.mxu1 %v5614_v40 }
0x1d12   :  { %3011 = vmatpush.bf16.msra.mxu1 %v5631_v24 }
0x1d16   :  { %3012 = vmatpush.bf16.msra.mxu1 %v5649_v49 }
0x1d86   :  { %v2796_v6 = vpop.f32.mrf.mxu1 }
0x1d87   :  { %4526 = vmatpush.msk.msra.mxu0 %vm562_vm1, %v2796_v6 }
0x1d88   :  { %4527 = vmatmul.msk.f32.vlgmr.msra.gmra.mxu0 %vm555_vm2, %v6601_v45 }
0x1d90   :  { %4528 = vmatmul.msk.f32.gmra.mxu0 %vm555_vm2, %v6608_v32 }
0x1e05   :  { %v2826_v13 = vpop.f32.mrf.mxu0 }
0x1e06   :  { %v2827_v15 = vadd.f32 %v2826_v13, %v2803_v36  ;;  %v7362_v13 = vld [vmem:[#allocation52_spill] sm:$0xff] }
0x1e08   :  { %4849 = vtanh.f32 %v2827_v15  ;;  %v7363_v15 = vld [vmem:[#allocation53_spill] sm:$0xff] }
0x1e0d   :  { %v2829_v0 = vpop.f32.mrf.mxu0 }
0x1e0e   :  { %v4850_v55 = vpop.eup %4849  ;;  %v2830_v42 = vadd.f32 %v2829_v0, %v2802_v3  ;;  %v7365_v0 = vld [vmem:[#allocation55_spill] sm:$0xff] }
0x1e0f   :  { %4529 = vmatmul.msk.f32.vlgmr.msrb.gmra.mxu1 %vm358_vm5, %v4850_v55 }
0x1e10   :  { %4851 = vtanh.f32 %v2830_v42  ;;  %3137 = vmatpush.bf16.msrb.mxu1 %v5776_v62 }
0x1e14   :  { %3138 = vmatpush.bf16.msrb.mxu1 %v5796_v26 }
0x1e16   :  { %v4852_v47 = vpop.eup %4851 }
0x1e17   :  { %4530 = vmatmul.msk.f32.gmra.mxu1 %vm358_vm5, %v4852_v47 }
0x1e18   :  { %3139 = vmatpush.bf16.msrb.mxu1 %v5822_v11 }
0x1e1c   :  { %3140 = vmatpush.bf16.msrb.mxu1 %v5834_v52 }
0x1e1f   :  { %4536 = vmatmul.msk.bf16.vlgmr.msra.gmra.mxu1 %vm144_vm0, %v6574_v5 }
0x1e8c   :  { %v2857_v7 = vpop.f32.mrf.mxu1 }
0x1e8d   :  { %v2870_v57 = vmul.f32 %v2867_v39, %v2857_v7 }
0x1e8f   :  { %v2872_v6 = vmul.f32 1.442695, %v2870_v57 }
0x1e94   :  { %v2860_v44 = vpop.f32.mrf.mxu1 }
0x1e95   :  { %v2871_v1 = vmul.f32 %v2866_v20, %v2860_v44 }
0x1e97   :  { %v2874_v46 = vmul.f32 1.442695, %v2871_v1 }
0x1e99   :  { %4853 = vpow2.f32 %v2874_v46 }
0x1e9a   :  { %4855 = vpow2.f32 %v2872_v6 }
0x1e9c   :  { %v6626_v34 = vpop.f32.mrf.mxu1 }
0x1e9f   :  { %v4854_v3 = vpop.eup %4853 }
0x1ea0   :  { %4531 = vmatpush.msk.msra.mxu2 %vm562_vm1, %v4854_v3  ;;  %v4856_v36 = vpop.eup %4855 }
0x1ea2   :  { %2894 = vmatpush.msra.mxu2 %v4856_v36 }
0x1ea3   :  { %4532 = vmatmul.msk.f32.vlgmr.msra.gmra.mxu2 %vm626_vm15, %v6446_v58  ;;  %v7364_v58 = vld [vmem:[#allocation54_spill] sm:$0xff] }
0x1ea4   :  { %v3016_v18 = vpop.f32.mrf.mxu1  ;;  %3022 = vmatpush.bf16.msrb.mxu2 %v5626_v10 }
0x1ea8   :  { %3023 = vmatpush.bf16.msrb.mxu2 %v5641_v16 }
0x1eab   :  { %4533 = vmatmul.msk.f32.gmra.mxu2 %vm626_vm15, %v6455_v31 }
0x1eac   :  { %3024 = vmatpush.bf16.msrb.mxu2 %v5659_v43 }
0x1eb0   :  { %3025 = vmatpush.bf16.msrb.mxu2 %v5668_v19 }
0x1eb3   :  { %4537 = vmatmul.msk.bf16.vlgmr.msrb.gmra.mxu2 %vm144_vm0, %v6574_v5 }
0x1eb4   :  { %3150 = vmatpush.bf16.msra.mxu2 %v7362_v13 }
0x1eb8   :  { %3151 = vmatpush.bf16.msra.mxu2 %v7363_v15 }
0x1ebc   :  { %3152 = vmatpush.bf16.msra.mxu2 %v7364_v58 }
0x1ec0   :  { %3153 = vmatpush.bf16.msra.mxu2 %v7365_v0 }
0x1f26   :  { %v2896_v55 = vpop.f32.mrf.mxu2 }
0x1f27   :  { %4857 = vrcp.f32 %v2896_v55  ;;  %v2913_v14 = vand.u32 2147483648, %v2896_v55  ;;  %v2911_v9 = vand.u32 2147483647, %v2896_v55  ;;  %vm2907_vm4 = vweird.f32 %v2896_v55 }
0x1f29   :  { %v2914_v57 = vor.u32 1.1754944e-38, %v2913_v14  ;;  %vm2912_vm14 = vcmp.eq.f32.partialorder %v2911_v9, 8.507059e+37 }
0x1f2d   :  { %v4858_v42 = vpop.eup %4857 }
0x1f2e   :  { %v2903_v47 = vmul.f32 %v4858_v42, %v2896_v55  ;;  %v2899_v31 = vpop.f32.mrf.mxu2  ;;  %vm2908_vm3 = vweird.f32 %v4858_v42 }
0x1f2f   :  { %4859 = vrcp.f32 %v2899_v31  ;;  %vm2909_vm6 = vmor %vm2907_vm4, %vm2908_vm3  ;;  %vm2922_vm10 = vweird.f32 %v2899_v31  ;;  %v2928_v46 = vand.u32 2147483648, %v2899_v31  ;;  %vm7371_vm3 = vcmask 1045504  }
0x1f30   :  { %v2904_v7 = vsub.f32 1.0, %v2903_v47  ;;  %v2926_v47 = vand.u32 2147483647, %v2899_v31  ;;  %vm2932_vm4 = vcmp.eq.s32.totalorder %v7345_v41, 5 }
0x1f31   :  { %v2929_v58 = vor.u32 1.1754944e-38, %v2928_v46 }
0x1f32   :  { %v2905_v20 = vmul.f32 %v4858_v42, %v2904_v7  ;;  %vm2927_vm13 = vcmp.eq.f32.partialorder %v2926_v47, 8.507059e+37 }
0x1f34   :  { %v2906_v39 = vadd.f32 %v4858_v42, %v2905_v20 }
0x1f35   :  { %v4860_v5 = vpop.eup %4859 }
0x1f36   :  { %v2918_v44 = vmul.f32 %v4860_v5, %v2899_v31  ;;  %v6643_v1 = vpop.f32.mrf.mxu2  ;;  %v2910_v6 = vsel %vm2909_vm6, %v4858_v42, %v2906_v39  ;;  %vm2923_vm7 = vweird.f32 %v4860_v5  ;;  %v3093_v42 = vpack.c.bf16 %v6588_v38, %v6588_v38  ;;  %v7366_v39 = vld [vmem:[#allocation35_spill] sm:$0xff]  ;;  %vm7372_vm6 = vmmov %vm7371_vm3 }
0x1f37   :  { %v2915_v18 = vsel %vm2912_vm14, %v2914_v57, %v2910_v6  ;;  %vm2924_vm11 = vmor %vm2922_vm10, %vm2923_vm7  ;;  %v2950_v31 = vrot.slane %v7366_v39, 2  ;;  %v7369_v6 = vld [vmem:[#allocation23_spill] sm:$0xff] }
0x1f38   :  { %v2919_v12 = vsub.f32 1.0, %v2918_v44  ;;  %v2916_v0 = vmul.f32 %v4856_v36, %v2915_v18  ;;  %v2949_v36 = vrot.slane %v7351_v61, 2 }
0x1f3a   :  { %v2920_v7 = vmul.f32 %v4860_v5, %v2919_v12  ;;  %2935 = vperm.xlu0 %4665, %v2916_v0   ;;  %v2952_v12 = vrot.slane %v7352_v22, 2  ;;  %v7367_v0 = vld [vmem:[#allocation45_spill] sm:$0xff]  ;;  %v2951_v38 = vsel %vm7371_vm3, %v2949_v36, %v2950_v31 }
0x1f3b   :  { %v2953_v57 = vrot.slane %v7367_v0, 2  ;;  %v6703_v36 = vld [vmem:[%s7166_s11 + $0x28] sm:$0xff] }
0x1f3c   :  { %v2921_v55 = vadd.f32 %v4860_v5, %v2920_v7 }
0x1f3d   :  { %v2954_v22 = vsel %vm7372_vm6, %v2952_v12, %v2953_v57 }
0x1f3e   :  { %v3029_v14 = vpop.f32.mrf.mxu2  ;;  %v2925_v20 = vsel %vm2924_vm11, %v4860_v5, %v2921_v55  ;;  %v7370_v5 = vld [vmem:[#allocation31_spill] sm:$0xff] }
0x1f3f   :  { %v2930_v15 = vsel %vm2927_vm13, %v2929_v58, %v2925_v20  ;;  %v2116_v58 = vsel %vm2105_vm8, %v7370_v5, %v7369_v6 }
0x1f40   :  { %v2931_v9 = vmul.f32 %v4854_v3, %v2930_v15  ;;  %v2535_v3 = vsel %vm2524_vm9, %v6475_v28, %v2116_v58  ;;  %v3033_v58 = vrot.slane %v6626_v34, 6 }
0x1f42   :  { %3095 = vrot.lane.b32.xlu0 %v3093_v42, %s5068_s29  ;;  %2940 = vperm.xlu2 %4664, %v2931_v9   ;;  %v6687_v42 = vld [vmem:[%s7166_s11 + $0x38] sm:$0xff] }
0x1f9c   :  { %v6652_v44 = vpop.permute.xlu2 %2940 }
0x1f9d   :  { %7368 = vst [vmem:[#allocation50_spill] sm:$0xff] %v6652_v44  ;;  %v2961_v61 = vmul.f32 %v2950_v31, %v6652_v44  ;;  %v2962_v46 = vmul.f32 %v2953_v57, %v6652_v44  ;;  %v6741_v31 = vld [vmem:[%s7166_s11] sm:$0xff] }
0x1fac   :  { %v2936_v15 = vpop.permute.xlu0 %2935 }
0x1fad   :  { %v6668_v18 = vsel %vm2932_vm4, %v2936_v15, %v2535_v3  ;;  %v2959_v47 = vmul.f32 %v2951_v38, %v2936_v15  ;;  %v2960_v7 = vmul.f32 %v2954_v22, %v2936_v15 }
0x1faf   :  { %v2963_v55 = vpack.c.bf16 %v2961_v61, %v2959_v47  ;;  %v2964_v14 = vpack.c.bf16 %v2962_v46, %v2960_v7 }
0x1fb1   :  { %v2966_v20 = vsel %vm711_vm12, %v2963_v55, 0  ;;  %v2969_v28 = vsel %vm711_vm12, %v2964_v14, 0 }
0x1fb2   :  { %2978 = vmatpush.bf16.msrb.mxu3 %v2966_v20  ;;  %2991 = vmatpush.bf16.msrb.mxu0 %v2969_v28 }
0x1fb4   :  { %v6698_v9 = vpop.permute.xlu0 %3095 }
0x1fb5   :  { %4534 = vmatmul.msk.bf16.vlgmr.msrb.gmra.mxu3 %vm626_vm15, %v6505_v8  ;;  %4535 = vmatmul.msk.bf16.vlgmr.msrb.gmra.mxu0 %vm626_vm15, %v6505_v8  ;;  %v6694_v8 = vld [vmem:[%s7166_s11 + $0x30] sm:$0xff]  ;;  %7373 = vst [vmem:[#allocation15_spill] sm:$0xff] %v6698_v9 }
0x1fb6   :  { %3104 = vmatpush.bf16.msra.mxu3 %v5751_v53  ;;  %3117 = vmatpush.bf16.msra.mxu0 %v5762_v56 }
0x1fba   :  { %3105 = vmatpush.bf16.msra.mxu3 %v5771_v63  ;;  %3118 = vmatpush.bf16.msra.mxu0 %v5774_v17 }
0x1fbe   :  { %3106 = vmatpush.bf16.msra.mxu3 %v5799_v54  ;;  %3119 = vmatpush.bf16.msra.mxu0 %v5812_v48 }
0x1fc2   :  { %3107 = vmatpush.bf16.msra.mxu3 %v5827_v59  ;;  %3120 = vmatpush.bf16.msra.mxu0 %v5830_v60 }
0x1fc5   :  { %4540 = vmatmul.msk.bf16.vlgmr.msra.gmra.mxu3 %vm144_vm0, %v6698_v9  ;;  %4541 = vmatmul.msk.bf16.vlgmr.msra.gmra.mxu0 %vm144_vm0, %v6698_v9 }
0x1fc6   :  { %3222 = vmatpush.msrb.mxu3 %v6687_v42  ;;  %3286 = vmatpush.msrb.mxu0 %v6534_v21  ;;  %v6714_v21 = vld [vmem:[%s7166_s11 + $0x20] sm:$0xff] }
0x1fc8   :  { %3223 = vmatpush.msrb.mxu3 %v6694_v8  ;;  %3287 = vmatpush.msrb.mxu0 %v6540_v2  ;;  %v6722_v2 = vld [vmem:[%s7166_s11 + $0x18] sm:$0xff] }
0x1fca   :  { %3224 = vmatpush.msrb.mxu3 %v6703_v36  ;;  %3288 = vmatpush.msrb.mxu0 %v6546_v27  ;;  %v6728_v27 = vld [vmem:[%s7166_s11 + $0x10] sm:$0xff] }
0x1fcc   :  { %3225 = vmatpush.msrb.mxu3 %v6714_v21  ;;  %3289 = vmatpush.msrb.mxu0 %v6552_v33  ;;  %v6735_v33 = vld [vmem:[%s7166_s11 + $0x8] sm:$0xff] }
0x1fce   :  { %3440 = vmatpush.bf16.msra.mxu0 %v5605_v37  ;;  %3226 = vmatpush.msrb.mxu3 %v6722_v2 }
0x1fd0   :  { %3227 = vmatpush.msrb.mxu3 %v6728_v27 }
0x1fd2   :  { %3441 = vmatpush.bf16.msra.mxu0 %v5614_v40  ;;  %3228 = vmatpush.msrb.mxu3 %v6735_v33 }
0x1fd4   :  { %3229 = vmatpush.msrb.mxu3 %v6741_v31 }
0x1fd6   :  { %3442 = vmatpush.bf16.msra.mxu0 %v5631_v24 }
0x1fda   :  { %3443 = vmatpush.bf16.msra.mxu0 %v5649_v49 }
0x2032   :  { %v2993_v12 = vpop.f32.mrf.mxu0 }
0x2033   :  { %v3000_v47 = vrot.slane %v2993_v12, 6 }
0x2035   :  { %v3004_v14 = vadd.f32 %v3000_v47, %v7357_v35 }
0x2038   :  { %v2980_v57 = vpop.f32.mrf.mxu3 }
0x2039   :  { %v2999_v6 = vrot.slane %v2980_v57, 6  ;;  %v3034_v57 = vrot.slane %v6643_v1, 6 }
0x203a   :  { %v2995_v5 = vpop.f32.mrf.mxu0 }
0x203b   :  { %v3003_v38 = vadd.f32 %v2999_v6, %v6558_v23  ;;  %v3038_v34 = vadd.f32 %v3034_v57, %v3004_v14 }
0x203d   :  { %v3037_v3 = vadd.f32 %v3033_v58, %v3003_v38  ;;  %v3040_v58 = vadd.f32 %v3038_v34, %v7327_v50 }
0x203f   :  { %v3039_v61 = vadd.f32 %v3037_v3, %v7325_v30  ;;  %v4539_v34 = vmul.f32 -1.442695, %v3040_v58 }
0x2040   :  { %v2982_v22 = vpop.f32.mrf.mxu3 }
0x2041   :  { %v4538_v15 = vmul.f32 -1.442695, %v3039_v61 }
0x2042   :  { %v6749_v46 = vpop.f32.mrf.mxu0 }
0x2043   :  { %4861 = vpow2.f32 %v4538_v15 }
0x2048   :  { %v3109_v7 = vpop.f32.mrf.mxu3 }
0x2049   :  { %v4862_v55 = vpop.eup %4861 }
0x204a   :  { %v3044_v20 = vadd.f32 1.0, %v4862_v55  ;;  %v3124_v28 = vpop.f32.mrf.mxu0  ;;  %v3081_v55 = vrot.slane %v6570_v29, 6 }
0x204c   :  { %4863 = vrcp.f32 %v3044_v20  ;;  %v3056_v61 = vand.u32 2147483648, %v3044_v20  ;;  %v3054_v12 = vand.u32 2147483647, %v3044_v20  ;;  %vm3050_vm9 = vweird.f32 %v3044_v20 }
0x204d   :  { %4865 = vtanh.f32 %v3040_v58 }
0x204e   :  { %v3057_v47 = vor.u32 1.1754944e-38, %v3056_v61  ;;  %vm3055_vm10 = vcmp.eq.f32.partialorder %v3054_v12, 8.507059e+37  ;;  %4867 = vpow2.f32 %v4539_v34 }
0x2050   :  { %v3111_v6 = vpop.f32.mrf.mxu3 }
0x2052   :  { %v4864_v5 = vpop.eup %4863 }
0x2053   :  { %v3046_v38 = vmul.f32 %v4864_v5, %v3044_v20  ;;  %vm3051_vm8 = vweird.f32 %v4864_v5  ;;  %v4866_v14 = vpop.eup %4865 }
0x2054   :  { %vm3052_vm14 = vmor %vm3050_vm9, %vm3051_vm8 }
0x2055   :  { %v3047_v3 = vsub.f32 1.0, %v3046_v38  ;;  %v4868_v38 = vpop.eup %4867 }
0x2057   :  { %v3048_v22 = vmul.f32 %v4864_v5, %v3047_v3  ;;  %v3064_v3 = vadd.f32 1.0, %v4868_v38 }
0x2059   :  { %v3049_v15 = vadd.f32 %v4864_v5, %v3048_v22  ;;  %4869 = vrcp.f32 %v3064_v3  ;;  %vm3070_vm11 = vweird.f32 %v3064_v3  ;;  %v3074_v12 = vand.u32 2147483647, %v3064_v3 }
0x205b   :  { %v3053_v1 = vsel %vm3052_vm14, %v4864_v5, %v3049_v15  ;;  %v3076_v5 = vand.u32 2147483648, %v3064_v3  ;;  %vm3075_vm3 = vcmp.eq.f32.partialorder %v3074_v12, 8.507059e+37 }
0x205c   :  { %v3058_v28 = vsel %vm3055_vm10, %v3057_v47, %v3053_v1 }
0x205d   :  { %v3084_v57 = vmul.f32 %v4866_v14, %v3058_v28  ;;  %v3083_v6 = vmul.f32 %v3081_v55, %v3058_v28  ;;  %v3077_v15 = vor.u32 1.1754944e-38, %v3076_v5 }
0x205f   :  { %3086 = vrot.lane.b32.xlu1 %v3084_v57, %s5068_s29  ;;  %v4870_v9 = vpop.eup %4869 }
0x2060   :  { %v3066_v22 = vmul.f32 %v4870_v9, %v3064_v3  ;;  %vm3071_vm7 = vweird.f32 %v4870_v9 }
0x2061   :  { %vm3072_vm13 = vmor %vm3070_vm11, %vm3071_vm7 }
0x2062   :  { %v3067_v20 = vsub.f32 1.0, %v3066_v22 }
0x2064   :  { %v3068_v44 = vmul.f32 %v4870_v9, %v3067_v20 }
0x2066   :  { %v3069_v29 = vadd.f32 %v4870_v9, %v3068_v44 }
0x2068   :  { %v3073_v58 = vsel %vm3072_vm13, %v4870_v9, %v3069_v29 }
0x2069   :  { %v3078_v55 = vsel %vm3075_vm3, %v3077_v15, %v3073_v58 }
0x20d1   :  { %v3087_v61 = vpop.permute.xlu1 %3086 }
0x20d2   :  { %v6756_v50 = vadd.f32 %v3087_v61, %v3083_v6 }
0x20d4   :  { %4871 = vtanh.f32 %v6756_v50 }
0x20da   :  { %v4872_v47 = vpop.eup %4871 }
0x20db   :  { %v3091_v1 = vmul.f32 %v4872_v47, %v3078_v55 }
0x20dd   :  { %v3092_v14 = vpack.c.bf16 %v3091_v1, %v3091_v1 }
0x20df   :  { %v3127_v28 = vrot.slane %v3092_v14, 1 }
0x20e1   :  { %3128 = vrot.lane.b32.xlu2 %v3127_v28, %s5068_s29 }
0x213b   :  { %v6760_v57 = vpop.permute.xlu2 %3128 }
0x213c   :  { %4542 = vmatmul.msk.bf16.vlgmr.msrb.gmra.mxu1 %vm144_vm0, %v6760_v57  ;;  %4543 = vmatmul.msk.bf16.vlgmr.msra.gmra.mxu2 %vm144_vm0, %v6760_v57 }
0x21b9   :  { %v3142_v44 = vpop.f32.mrf.mxu1 }
0x21ba   :  { %v3143_v6 = vadd.f32 %v3142_v44, %v3109_v7 }
0x21bc   :  { %v3159_v9 = vadd.f32 %v3143_v6, %v5881_v51 }
0x21be   :  { %v4544_v34 = vmul.f32 -1.442695, %v3159_v9 }
0x21bf   :  { %v3155_v38 = vpop.f32.mrf.mxu2 }
0x21c0   :  { %4873 = vpow2.f32 %v4544_v34  ;;  %v3156_v29 = vadd.f32 %v3155_v38, %v6749_v46 }
0x21c1   :  { %v3144_v3 = vpop.f32.mrf.mxu1 }
0x21c2   :  { %v3160_v12 = vadd.f32 %v3156_v29, %v5884_v4 }
0x21c4   :  { %v4545_v46 = vmul.f32 -1.442695, %v3160_v12 }
0x21c6   :  { %v4874_v22 = vpop.eup %4873 }
0x21c7   :  { %v3164_v20 = vadd.f32 1.0, %v4874_v22  ;;  %v3157_v61 = vpop.f32.mrf.mxu2 }
0x21c9   :  { %4875 = vrcp.f32 %v3164_v20  ;;  %v3176_v47 = vand.u32 2147483648, %v3164_v20  ;;  %v3174_v55 = vand.u32 2147483647, %v3164_v20  ;;  %vm3170_vm8 = vweird.f32 %v3164_v20 }
0x21ca   :  { %4877 = vtanh.f32 %v3160_v12 }
0x21cb   :  { %v3177_v14 = vor.u32 1.1754944e-38, %v3176_v47  ;;  %vm3175_vm14 = vcmp.eq.f32.partialorder %v3174_v55, 8.507059e+37  ;;  %4879 = vpow2.f32 %v4545_v46 }
0x21cf   :  { %v4876_v5 = vpop.eup %4875 }
0x21d0   :  { %v3166_v58 = vmul.f32 %v4876_v5, %v3164_v20  ;;  %vm3171_vm6 = vweird.f32 %v4876_v5  ;;  %v4878_v44 = vpop.eup %4877 }
0x21d1   :  { %vm3172_vm9 = vmor %vm3170_vm8, %vm3171_vm6  ;;  %v4880_v34 = vpop.eup %4879 }
0x21d2   :  { %v3167_v15 = vsub.f32 1.0, %v3166_v58  ;;  %v3184_v38 = vadd.f32 1.0, %v4880_v34 }
0x21d4   :  { %v3168_v7 = vmul.f32 %v4876_v5, %v3167_v15  ;;  %4881 = vrcp.f32 %v3184_v38  ;;  %v3196_v47 = vand.u32 2147483648, %v3184_v38  ;;  %vm3190_vm7 = vweird.f32 %v3184_v38 }
0x21d5   :  { %v3194_v12 = vand.u32 2147483647, %v3184_v38 }
0x21d6   :  { %v3169_v1 = vadd.f32 %v4876_v5, %v3168_v7  ;;  %v3197_v55 = vor.u32 1.1754944e-38, %v3196_v47 }
0x21d7   :  { %vm3195_vm13 = vcmp.eq.f32.partialorder %v3194_v12, 8.507059e+37 }
0x21d8   :  { %v3173_v28 = vsel %vm3172_vm9, %v4876_v5, %v3169_v1 }
0x21d9   :  { %v3178_v6 = vsel %vm3175_vm14, %v3177_v14, %v3173_v28 }
0x21da   :  { %v3201_v9 = vmul.f32 %v4878_v44, %v3178_v6  ;;  %v4882_v3 = vpop.eup %4881  ;;  %v3200_v20 = vmul.f32 %v3178_v6, %v6585_v25 }
0x21db   :  { %v3186_v22 = vmul.f32 %v4882_v3, %v3184_v38  ;;  %vm3191_vm10 = vweird.f32 %v4882_v3 }
0x21dc   :  { %3203 = vrot.lane.b32.xlu1 %v3201_v9, %s5068_s29  ;;  %vm3192_vm11 = vmor %vm3190_vm7, %vm3191_vm10  ;;  %v7374_v9 = vld [vmem:[#allocation27_spill] sm:$0xff] }
0x21dd   :  { %v3187_v61 = vsub.f32 1.0, %v3186_v22 }
0x21df   :  { %v3188_v29 = vmul.f32 %v4882_v3, %v3187_v61 }
0x21e1   :  { %v3189_v5 = vadd.f32 %v4882_v3, %v3188_v29  ;;  %v7377_v29 = vld [vmem:[#allocation28_spill] sm:$0xff] }
0x21e3   :  { %v3193_v7 = vsel %vm3192_vm11, %v4882_v3, %v3189_v5  ;;  %v7375_v3 = vld [vmem:[#allocation24_spill] sm:$0xff]  ;;  %v7378_v5 = vld [vmem:[#allocation21_spill] sm:$0xff] }
0x21e4   :  { %v3198_v14 = vsel %vm3195_vm13, %v3197_v55, %v3193_v7  ;;  %v7376_v22 = vrot.slane %v7375_v3, 4  ;;  %v7379_v47 = vrot.slane %v7378_v5, 4  ;;  %vm3365_vm13 = vcmp.eq.s32.totalorder %v7345_v41, 6 }
0x224e   :  { %v3204_v58 = vpop.permute.xlu1 %3203 }
0x224f   :  { %v6771_v15 = vadd.f32 %v3204_v58, %v3200_v20 }
0x2251   :  { %4883 = vtanh.f32 %v6771_v15 }
0x2257   :  { %v4884_v1 = vpop.eup %4883 }
0x2258   :  { %v6774_v28 = vmul.f32 %v4884_v1, %v3198_v14 }
0x225a   :  { %3210 = vrot.lane.b32.xlu0 %v6774_v28, %s5068_s29 }
0x22cc   :  { %v3211_v25 = vpop.permute.xlu0 %3210 }
0x22cd   :  { %4546 = vmatmul.msk.f32.vlgmr.msrb.gmra.mxu3 %vm144_vm0, %v3211_v25 }
0x2350   :  { %v3231_v44 = vpop.f32.mrf.mxu3 }
0x2351   :  { %4547 = vmatpush.msk.msra.mxu3 %vm562_vm1, %v3231_v44  ;;  %v6804_v44 = vld [vmem:[%s7159_s4] sm:$0xff] }
0x2352   :  { %4548 = vmatmul.msk.f32.vlgmr.msra.gmra.mxu3 %vm555_vm2, %v6601_v45 }
0x235a   :  { %4549 = vmatmul.msk.f32.gmra.mxu3 %vm555_vm2, %v6608_v32 }
0x23d5   :  { %v3260_v6 = vpop.f32.mrf.mxu3 }
0x23d6   :  { %v3261_v46 = vadd.f32 %v3260_v6, %v7374_v9  ;;  %v6813_v9 = vld [vmem:[%s7159_s4 + $0x8] sm:$0x3] }
0x23d8   :  { %4885 = vtanh.f32 %v3261_v46  ;;  %v7380_v46 = vld [vmem:[#allocation53_spill] sm:$0xff] }
0x23dd   :  { %v3263_v34 = vpop.f32.mrf.mxu3 }
0x23de   :  { %v4886_v38 = vpop.eup %4885  ;;  %v3264_v61 = vadd.f32 %v3263_v34, %v7376_v22  ;;  %v7381_v34 = vld [vmem:[#allocation54_spill] sm:$0xff] }
0x23df   :  { %4550 = vmatmul.msk.f32.vlgmr.msrb.gmra.mxu0 %vm358_vm5, %v4886_v38  ;;  %v7382_v38 = vld [vmem:[#allocation55_spill] sm:$0xff] }
0x23e0   :  { %4887 = vtanh.f32 %v3264_v61  ;;  %3568 = vmatpush.bf16.msrb.mxu0 %v5776_v62 }
0x23e4   :  { %3569 = vmatpush.bf16.msrb.mxu0 %v5796_v26 }
0x23e6   :  { %v4888_v45 = vpop.eup %4887 }
0x23e7   :  { %4551 = vmatmul.msk.f32.gmra.mxu0 %vm358_vm5, %v4888_v45 }
0x23e8   :  { %3570 = vmatpush.bf16.msrb.mxu0 %v5822_v11 }
0x23ec   :  { %3571 = vmatpush.bf16.msrb.mxu0 %v5834_v52 }
0x23ef   :  { %4557 = vmatmul.msk.bf16.vlgmr.msra.gmra.mxu0 %vm144_vm0, %v6760_v57 }
0x245c   :  { %v3291_v32 = vpop.f32.mrf.mxu0 }
0x245d   :  { %v3303_v20 = vmul.f32 %v7377_v29, %v3291_v32 }
0x245f   :  { %v3305_v7 = vmul.f32 1.442695, %v3303_v20 }
0x2464   :  { %v3294_v58 = vpop.f32.mrf.mxu0 }
0x2465   :  { %v3304_v12 = vmul.f32 %v7379_v47, %v3294_v58 }
0x2467   :  { %v3307_v55 = vmul.f32 1.442695, %v3304_v12 }
0x2469   :  { %4889 = vpow2.f32 %v3307_v55 }
0x246a   :  { %4891 = vpow2.f32 %v3305_v7 }
0x246c   :  { %v6798_v1 = vpop.f32.mrf.mxu0 }
0x246f   :  { %v4890_v14 = vpop.eup %4889 }
0x2470   :  { %4552 = vmatpush.msk.msra.mxu1 %vm562_vm1, %v4890_v14  ;;  %v4892_v25 = vpop.eup %4891 }
0x2472   :  { %3327 = vmatpush.msra.mxu1 %v4892_v25 }
0x2473   :  { %4553 = vmatmul.msk.f32.vlgmr.msra.gmra.mxu1 %vm626_vm15, %v6804_v44 }
0x2474   :  { %v3447_v6 = vpop.f32.mrf.mxu0  ;;  %3453 = vmatpush.bf16.msrb.mxu1 %v5626_v10 }
0x2478   :  { %3454 = vmatpush.bf16.msrb.mxu1 %v5641_v16 }
0x247b   :  { %4554 = vmatmul.msk.f32.gmra.mxu1 %vm626_vm15, %v6813_v9 }
0x247c   :  { %3455 = vmatpush.bf16.msrb.mxu1 %v5659_v43 }
0x2480   :  { %3456 = vmatpush.bf16.msrb.mxu1 %v5668_v19 }
0x2483   :  { %4558 = vmatmul.msk.bf16.vlgmr.msrb.gmra.mxu1 %vm144_vm0, %v6760_v57 }
0x2484   :  { %3581 = vmatpush.bf16.msra.mxu1 %v7362_v13 }
0x2488   :  { %3582 = vmatpush.bf16.msra.mxu1 %v7380_v46 }
0x248c   :  { %3583 = vmatpush.bf16.msra.mxu1 %v7381_v34 }
0x2490   :  { %3584 = vmatpush.bf16.msra.mxu1 %v7382_v38 }
0x24f0   :  { %v3329_v3 = vpop.f32.mrf.mxu1 }
0x24f1   :  { %4893 = vrcp.f32 %v3329_v3  ;;  %v3346_v29 = vand.u32 2147483648, %v3329_v3  ;;  %v3344_v58 = vand.u32 2147483647, %v3329_v3  ;;  %vm3340_vm6 = vweird.f32 %v3329_v3 }
0x24f3   :  { %v3347_v47 = vor.u32 1.1754944e-38, %v3346_v29  ;;  %vm3345_vm9 = vcmp.eq.f32.partialorder %v3344_v58, 8.507059e+37 }
0x24f7   :  { %v4894_v22 = vpop.eup %4893 }
0x24f8   :  { %v3336_v61 = vmul.f32 %v4894_v22, %v3329_v3  ;;  %v3332_v45 = vpop.f32.mrf.mxu1  ;;  %vm3341_vm3 = vweird.f32 %v4894_v22 }
0x24f9   :  { %4895 = vrcp.f32 %v3332_v45  ;;  %vm3342_vm8 = vmor %vm3340_vm6, %vm3341_vm3  ;;  %v3361_v46 = vand.u32 2147483648, %v3332_v45  ;;  %vm3355_vm10 = vweird.f32 %v3332_v45  ;;  %vm7385_vm3 = vcmask 1043456  }
0x24fa   :  { %v3337_v32 = vsub.f32 1.0, %v3336_v61  ;;  %v3359_v61 = vand.u32 2147483647, %v3332_v45  ;;  %vm7386_vm6 = vmmov %vm7385_vm3 }
0x24fb   :  { %v3362_v3 = vor.u32 1.1754944e-38, %v3361_v46  ;;  %v3380_v46 = vrot.slane %v7366_v39, 4 }
0x24fc   :  { %v3338_v20 = vmul.f32 %v4894_v22, %v3337_v32  ;;  %vm3360_vm11 = vcmp.eq.f32.partialorder %v3359_v61, 8.507059e+37 }
0x24fe   :  { %v3339_v5 = vadd.f32 %v4894_v22, %v3338_v20 }
0x24ff   :  { %v4896_v57 = vpop.eup %4895 }
0x2500   :  { %v3351_v12 = vmul.f32 %v4896_v57, %v3332_v45  ;;  %v6825_v7 = vpop.f32.mrf.mxu1  ;;  %v3343_v55 = vsel %vm3342_vm8, %v4894_v22, %v3339_v5  ;;  %vm3356_vm14 = vweird.f32 %v4896_v57  ;;  %v3524_v22 = vpack.c.bf16 %v6774_v28, %v6774_v28  ;;  %v7384_v5 = vld [vmem:[#allocation46_spill] sm:$0xff] }
0x2501   :  { %v3348_v6 = vsel %vm3345_vm9, %v3347_v47, %v3343_v55  ;;  %vm3357_vm7 = vmor %vm3355_vm10, %vm3356_vm14  ;;  %v3384_v28 = vrot.slane %v7384_v5, 4 }
0x2502   :  { %v3352_v38 = vsub.f32 1.0, %v3351_v12  ;;  %v3349_v34 = vmul.f32 %v4892_v25, %v3348_v6 }
0x2504   :  { %v3353_v13 = vmul.f32 %v4896_v57, %v3352_v38  ;;  %3368 = vperm.xlu2 %4664, %v3349_v34   ;;  %v3383_v34 = vrot.slane %v7367_v0, 4  ;;  %v7383_v38 = vld [vmem:[#allocation36_spill] sm:$0xff] }
0x2505   :  { %v3381_v45 = vrot.slane %v7383_v38, 4 }
0x2506   :  { %v3354_v32 = vadd.f32 %v4896_v57, %v3353_v13 }
0x2508   :  { %v3460_v20 = vpop.f32.mrf.mxu1  ;;  %v3358_v29 = vsel %vm3357_vm7, %v4896_v57, %v3354_v32  ;;  %v6853_v32 = vld [vmem:[%s7291_s7] sm:$0x1] }
0x2509   :  { %v3363_v19 = vsel %vm3360_vm11, %v3362_v3, %v3358_v29  ;;  %v5004_v3 = vld [vmem:[%s7167_s12 + $0x18] sm:$0xff]  ;;  %v5005_v20 = vld [vmem:[%s7167_s12 + $0x10] sm:$0xff] }
0x250a   :  { %v3364_v58 = vmul.f32 %v4890_v14, %v3363_v19  ;;  %v3382_v19 = vsel %vm7385_vm3, %v3380_v46, %v3381_v45  ;;  %v3385_v14 = vsel %vm7386_vm6, %v3383_v34, %v3384_v28 }
0x250c   :  { %3526 = vrot.lane.b32.xlu2 %v3524_v22, %s5068_s29  ;;  %3373 = vperm.xlu1 %4663, %v3364_v58   ;;  %v3464_v58 = vrot.slane %v6798_v1, 4  ;;  %v3465_v1 = vrot.slane %v6825_v7, 4  ;;  %v3512_v7 = vrot.slane %v6756_v50, 6 }
0x255e   :  { %v3369_v25 = vpop.permute.xlu2 %3368 }
0x255f   :  { %v6834_v13 = vsel %vm3365_vm13, %v3369_v25, %v6668_v18  ;;  %v3390_v47 = vmul.f32 %v3382_v19, %v3369_v25  ;;  %v3391_v12 = vmul.f32 %v3385_v14, %v3369_v25 }
0x2566   :  { %v6873_v29 = vpop.permute.xlu2 %3526 }
0x257e   :  { %v6842_v57 = vpop.permute.xlu1 %3373 }
0x257f   :  { %v3392_v55 = vmul.f32 %v3381_v45, %v6842_v57  ;;  %v3393_v18 = vmul.f32 %v3384_v28, %v6842_v57 }
0x2581   :  { %v3394_v6 = vpack.c.bf16 %v3392_v55, %v3390_v47  ;;  %v3395_v39 = vpack.c.bf16 %v3393_v18, %v3391_v12  ;;  %v7387_v12 = vld [vmem:[#allocation51_spill] sm:$0xff] }
0x2583   :  { %v3397_v0 = vsel %vm711_vm12, %v3394_v6, 0  ;;  %v3400_v61 = vsel %vm711_vm12, %v3395_v39, 0 }
0x2584   :  { %3409 = vmatpush.bf16.msrb.mxu2 %v3397_v0  ;;  %3422 = vmatpush.bf16.msrb.mxu3 %v3400_v61 }
0x2587   :  { %4555 = vmatmul.msk.bf16.vlgmr.msrb.gmra.mxu2 %vm626_vm15, %v6853_v32  ;;  %4556 = vmatmul.msk.bf16.vlgmr.msrb.gmra.mxu3 %vm626_vm15, %v6853_v32 }
0x2588   :  { %3535 = vmatpush.bf16.msra.mxu2 %v5751_v53  ;;  %3548 = vmatpush.bf16.msra.mxu3 %v5762_v56 }
0x258c   :  { %3536 = vmatpush.bf16.msra.mxu2 %v5771_v63  ;;  %3549 = vmatpush.bf16.msra.mxu3 %v5774_v17 }
0x2590   :  { %3537 = vmatpush.bf16.msra.mxu2 %v5799_v54  ;;  %3550 = vmatpush.bf16.msra.mxu3 %v5812_v48 }
0x2594   :  { %3538 = vmatpush.bf16.msra.mxu2 %v5827_v59  ;;  %3551 = vmatpush.bf16.msra.mxu3 %v5830_v60 }
0x2597   :  { %4561 = vmatmul.msk.bf16.vlgmr.msra.gmra.mxu2 %vm144_vm0, %v6873_v29  ;;  %4562 = vmatmul.msk.bf16.vlgmr.msra.gmra.mxu3 %vm144_vm0, %v6873_v29 }
0x2598   :  { %3653 = vmatpush.msrb.mxu2 %v6687_v42  ;;  %3717 = vmatpush.msrb.mxu3 %v5004_v3  ;;  %v5006_v42 = vld [vmem:[%s7167_s12 + $0x8] sm:$0xff] }
0x259a   :  { %3654 = vmatpush.msrb.mxu2 %v6694_v8  ;;  %3718 = vmatpush.msrb.mxu3 %v5005_v20  ;;  %v5007_v8 = vld [vmem:[%s7167_s12] sm:$0xff] }
0x259c   :  { %3655 = vmatpush.msrb.mxu2 %v6703_v36  ;;  %3719 = vmatpush.msrb.mxu3 %v5006_v42 }
0x259e   :  { %3656 = vmatpush.msrb.mxu2 %v6714_v21  ;;  %3720 = vmatpush.msrb.mxu3 %v5007_v8 }
0x25a0   :  { %3871 = vmatpush.bf16.msra.mxu3 %v5605_v37  ;;  %3657 = vmatpush.msrb.mxu2 %v6722_v2 }
0x25a2   :  { %3658 = vmatpush.msrb.mxu2 %v6728_v27 }
0x25a4   :  { %3872 = vmatpush.bf16.msra.mxu3 %v5614_v40  ;;  %3659 = vmatpush.msrb.mxu2 %v6735_v33 }
0x25a6   :  { %3660 = vmatpush.msrb.mxu2 %v6741_v31 }
0x25a8   :  { %3873 = vmatpush.bf16.msra.mxu3 %v5631_v24 }
0x25ac   :  { %3874 = vmatpush.bf16.msra.mxu3 %v5649_v49 }
0x260a   :  { %v3411_v36 = vpop.f32.mrf.mxu2  ;;  %v3424_v21 = vpop.f32.mrf.mxu3 }
0x260b   :  { %v3430_v22 = vrot.slane %v3411_v36, 4  ;;  %v3431_v33 = vrot.slane %v3424_v21, 4 }
0x260d   :  { %v3434_v37 = vadd.f32 %v3430_v22, %v6558_v23  ;;  %v3435_v45 = vadd.f32 %v3431_v33, %v7357_v35 }
0x260f   :  { %v3468_v2 = vadd.f32 %v3464_v58, %v3434_v37  ;;  %v3469_v28 = vadd.f32 %v3465_v1, %v3435_v45 }
0x2611   :  { %v3470_v27 = vadd.f32 %v3468_v2, %v7325_v30  ;;  %v3471_v55 = vadd.f32 %v3469_v28, %v7387_v12 }
0x2612   :  { %v3413_v25 = vpop.f32.mrf.mxu2  ;;  %v3426_v40 = vpop.f32.mrf.mxu3 }
0x2613   :  { %v4559_v46 = vmul.f32 -1.442695, %v3470_v27  ;;  %v4560_v58 = vmul.f32 -1.442695, %v3471_v55 }
0x2615   :  { %4897 = vpow2.f32 %v4559_v46 }
0x261a   :  { %v6898_v31 = vpop.f32.mrf.mxu2  ;;  %v6900_v24 = vpop.f32.mrf.mxu3 }
0x261b   :  { %v4898_v49 = vpop.eup %4897 }
0x261c   :  { %v3475_v34 = vadd.f32 1.0, %v4898_v49 }
0x261e   :  { %4899 = vrcp.f32 %v3475_v34  ;;  %v3487_v39 = vand.u32 2147483648, %v3475_v34  ;;  %v3485_v61 = vand.u32 2147483647, %v3475_v34  ;;  %vm3481_vm9 = vweird.f32 %v3475_v34 }
0x261f   :  { %4901 = vtanh.f32 %v3471_v55 }
0x2620   :  { %v3488_v20 = vor.u32 1.1754944e-38, %v3487_v39  ;;  %vm3486_vm10 = vcmp.eq.f32.partialorder %v3485_v61, 8.507059e+37  ;;  %4903 = vpow2.f32 %v4560_v58 }
0x2622   :  { %v3542_v19 = vpop.f32.mrf.mxu2  ;;  %v3555_v14 = vpop.f32.mrf.mxu3 }
0x2624   :  { %v4900_v47 = vpop.eup %4899 }
0x2625   :  { %v3477_v18 = vmul.f32 %v4900_v47, %v3475_v34  ;;  %vm3482_vm8 = vweird.f32 %v4900_v47  ;;  %v4902_v8 = vpop.eup %4901 }
0x2626   :  { %vm3483_vm14 = vmor %vm3481_vm9, %vm3482_vm8  ;;  %v4904_v37 = vpop.eup %4903 }
0x2627   :  { %v3478_v6 = vsub.f32 1.0, %v3477_v18  ;;  %v3495_v2 = vadd.f32 1.0, %v4904_v37 }
0x2629   :  { %v3479_v0 = vmul.f32 %v4900_v47, %v3478_v6  ;;  %4905 = vrcp.f32 %v3495_v2  ;;  %v3507_v34 = vand.u32 2147483648, %v3495_v2  ;;  %vm3501_vm11 = vweird.f32 %v3495_v2 }
0x262a   :  { %v3505_v45 = vand.u32 2147483647, %v3495_v2 }
0x262b   :  { %v3480_v3 = vadd.f32 %v4900_v47, %v3479_v0  ;;  %v3508_v28 = vor.u32 1.1754944e-38, %v3507_v34 }
0x262c   :  { %vm3506_vm6 = vcmp.eq.f32.partialorder %v3505_v45, 8.507059e+37 }
0x262d   :  { %v3484_v42 = vsel %vm3483_vm14, %v4900_v47, %v3480_v3 }
0x262e   :  { %v3489_v36 = vsel %vm3486_vm10, %v3488_v20, %v3484_v42 }
0x262f   :  { %v3515_v21 = vmul.f32 %v4902_v8, %v3489_v36  ;;  %v3514_v22 = vmul.f32 %v3512_v7, %v3489_v36  ;;  %v4906_v27 = vpop.eup %4905 }
0x2630   :  { %v3497_v25 = vmul.f32 %v4906_v27, %v3495_v2  ;;  %vm3502_vm7 = vweird.f32 %v4906_v27 }
0x2631   :  { %3517 = vrot.lane.b32.xlu0 %v3515_v21, %s5068_s29  ;;  %vm3503_vm3 = vmor %vm3501_vm11, %vm3502_vm7 }
0x2632   :  { %v3498_v40 = vsub.f32 1.0, %v3497_v25 }
0x2634   :  { %v3499_v46 = vmul.f32 %v4906_v27, %v3498_v40 }
0x2636   :  { %v3500_v50 = vadd.f32 %v4906_v27, %v3499_v46 }
0x2638   :  { %v3504_v1 = vsel %vm3503_vm3, %v4906_v27, %v3500_v50 }
0x2639   :  { %v3509_v14 = vsel %vm3506_vm6, %v3508_v28, %v3504_v1 }
0x26a3   :  { %v3518_v33 = vpop.permute.xlu0 %3517 }
0x26a4   :  { %v6907_v49 = vadd.f32 %v3518_v33, %v3514_v22 }
0x26a6   :  { %4907 = vtanh.f32 %v6907_v49 }
0x26ac   :  { %v4908_v19 = vpop.eup %4907 }
0x26ad   :  { %v3522_v47 = vmul.f32 %v4908_v19, %v3509_v14 }
0x26af   :  { %v3523_v55 = vpack.c.bf16 %v3522_v47, %v3522_v47 }
0x26b1   :  { %v3558_v18 = vrot.slane %v3523_v55, 2 }
0x26b3   :  { %3559 = vrot.lane.b32.xlu1 %v3558_v18, %s5068_s29 }
0x2725   :  { %v6911_v6 = vpop.permute.xlu1 %3559 }
0x2726   :  { %4563 = vmatmul.msk.bf16.vlgmr.msrb.gmra.mxu0 %vm144_vm0, %v6911_v6  ;;  %4564 = vmatmul.msk.bf16.vlgmr.msra.gmra.mxu1 %vm144_vm0, %v6911_v6 }
0x27a3   :  { %v3573_v39 = vpop.f32.mrf.mxu0  ;;  %v3586_v0 = vpop.f32.mrf.mxu1 }
0x27a4   :  { %v3574_v61 = vadd.f32 %v3573_v39, %v6898_v31  ;;  %v3587_v21 = vadd.f32 %v3586_v0, %v6900_v24 }
0x27a6   :  { %v3590_v3 = vadd.f32 %v3574_v61, %v5881_v51  ;;  %v3591_v58 = vadd.f32 %v3587_v21, %v5884_v4 }
0x27a8   :  { %v4565_v20 = vmul.f32 -1.442695, %v3590_v3  ;;  %v4566_v24 = vmul.f32 -1.442695, %v3591_v58 }
0x27aa   :  { %4909 = vpow2.f32 %v4565_v20 }
0x27ab   :  { %v3575_v7 = vpop.f32.mrf.mxu0  ;;  %v3588_v42 = vpop.f32.mrf.mxu1 }
0x27b0   :  { %v4910_v8 = vpop.eup %4909 }
0x27b1   :  { %v3595_v36 = vadd.f32 1.0, %v4910_v8 }
0x27b3   :  { %4911 = vrcp.f32 %v3595_v36  ;;  %v3607_v27 = vand.u32 2147483648, %v3595_v36  ;;  %v3605_v31 = vand.u32 2147483647, %v3595_v36  ;;  %vm3601_vm9 = vweird.f32 %v3595_v36 }
0x27b4   :  { %4913 = vtanh.f32 %v3591_v58  ;;  %v5008_v58 = vld [vmem:[%s7259_s22] sm:$0xff] }
0x27b5   :  { %v3608_v46 = vor.u32 1.1754944e-38, %v3607_v27  ;;  %vm3606_vm10 = vcmp.eq.f32.partialorder %v3605_v31, 8.507059e+37  ;;  %4915 = vpow2.f32 %v4566_v24  ;;  %v7388_v27 = vld [vmem:[#allocation29_spill] sm:$0xff]  ;;  %v7391_v24 = vld [vmem:[#allocation30_spill] sm:$0xff] }
0x27b9   :  { %v4912_v22 = vpop.eup %4911 }
0x27ba   :  { %v3597_v37 = vmul.f32 %v4912_v22, %v3595_v36  ;;  %vm3602_vm8 = vweird.f32 %v4912_v22  ;;  %v4914_v50 = vpop.eup %4913 }
0x27bb   :  { %vm3603_vm14 = vmor %vm3601_vm9, %vm3602_vm8  ;;  %v4916_v1 = vpop.eup %4915 }
0x27bc   :  { %v3598_v2 = vsub.f32 1.0, %v3597_v37  ;;  %v3615_v28 = vadd.f32 1.0, %v4916_v1  ;;  %v5009_v37 = vld [vmem:[%s7259_s22 + $0x8] sm:$0x3] }
0x27be   :  { %v3599_v25 = vmul.f32 %v4912_v22, %v3598_v2  ;;  %4917 = vrcp.f32 %v3615_v28  ;;  %v3627_v3 = vand.u32 2147483648, %v3615_v28  ;;  %vm3621_vm11 = vweird.f32 %v3615_v28 }
0x27bf   :  { %v3625_v20 = vand.u32 2147483647, %v3615_v28 }
0x27c0   :  { %v3600_v40 = vadd.f32 %v4912_v22, %v3599_v25  ;;  %v3628_v42 = vor.u32 1.1754944e-38, %v3627_v3  ;;  %v7396_v3 = vld [vmem:[#allocation53_spill] sm:$0xff] }
0x27c1   :  { %vm3626_vm6 = vcmp.eq.f32.partialorder %v3625_v20, 8.507059e+37  ;;  %v7398_v20 = vld [vmem:[#allocation55_spill] sm:$0xff] }
0x27c2   :  { %v3604_v33 = vsel %vm3603_vm14, %v4912_v22, %v3600_v40 }
0x27c3   :  { %v3609_v34 = vsel %vm3606_vm10, %v3608_v46, %v3604_v33  ;;  %v7389_v46 = vld [vmem:[#allocation25_spill] sm:$0xff] }
0x27c4   :  { %v3632_v45 = vmul.f32 %v4914_v50, %v3609_v34  ;;  %v4918_v19 = vpop.eup %4917  ;;  %v3631_v18 = vmul.f32 %v3609_v34, %v6771_v15  ;;  %v7390_v33 = vrot.slane %v7389_v46, 6 }
0x27c5   :  { %v3617_v14 = vmul.f32 %v4918_v19, %v3615_v28  ;;  %vm3622_vm7 = vweird.f32 %v4918_v19 }
0x27c6   :  { %3634 = vrot.lane.b32.xlu0 %v3632_v45, %s5068_s29  ;;  %vm3623_vm3 = vmor %vm3621_vm11, %vm3622_vm7 }
0x27c7   :  { %v3618_v47 = vsub.f32 1.0, %v3617_v14 }
0x27c9   :  { %v3619_v55 = vmul.f32 %v4918_v19, %v3618_v47 }
0x27cb   :  { %v3620_v61 = vadd.f32 %v4918_v19, %v3619_v55 }
0x27cd   :  { %v3624_v7 = vsel %vm3623_vm3, %v4918_v19, %v3620_v61  ;;  %v7392_v19 = vld [vmem:[#allocation22_spill] sm:$0xff]  ;;  %v7395_v61 = vld [vmem:[#allocation52_spill] sm:$0xff]  ;;  %vm3796_vm3 = vcmp.eq.s32.totalorder %v7345_v41, 7 }
0x27ce   :  { %v3629_v36 = vsel %vm3626_vm6, %v3628_v42, %v3624_v7  ;;  %v7393_v14 = vrot.slane %v7392_v19, 6  ;;  %vm4071_vm6 = vcmask 64512  }
0x2838   :  { %v3635_v39 = vpop.permute.xlu0 %3634 }
0x2839   :  { %v6923_v0 = vadd.f32 %v3635_v39, %v3631_v18  ;;  %v7394_v39 = vld [vmem:[#allocation38_spill] sm:$0xff] }
0x283b   :  { %4919 = vtanh.f32 %v6923_v0 }
0x2841   :  { %v4920_v8 = vpop.eup %4919 }
0x2842   :  { %v6926_v21 = vmul.f32 %v4920_v8, %v3629_v36 }
0x2844   :  { %3641 = vrot.lane.b32.xlu2 %v6926_v21, %s5068_s29  ;;  %v3955_v19 = vpack.c.bf16 %v6926_v21, %v6926_v21  ;;  %v3811_v21 = vrot.slane %v7383_v38, 6 }
0x289e   :  { %v3642_v15 = vpop.permute.xlu2 %3641 }
0x289f   :  { %4567 = vmatmul.msk.f32.vlgmr.msrb.gmra.mxu2 %vm144_vm0, %v3642_v15 }
0x2922   :  { %v3662_v22 = vpop.f32.mrf.mxu2 }
0x2923   :  { %4568 = vmatpush.msk.msra.mxu2 %vm562_vm1, %v3662_v22 }
0x2924   :  { %4569 = vmatmul.msk.f32.vlgmr.msra.gmra.mxu2 %vm555_vm2, %v5008_v58 }
0x292c   :  { %4570 = vmatmul.msk.f32.gmra.mxu2 %vm555_vm2, %v5009_v37 }
0x29a7   :  { %v3691_v2 = vpop.f32.mrf.mxu2 }
0x29a8   :  { %v3692_v25 = vadd.f32 %v3691_v2, %v7388_v27 }
0x29aa   :  { %4921 = vtanh.f32 %v3692_v25 }
0x29af   :  { %v3694_v31 = vpop.f32.mrf.mxu2 }
0x29b0   :  { %v4922_v40 = vpop.eup %4921  ;;  %v3695_v50 = vadd.f32 %v3694_v31, %v7390_v33 }
0x29b1   :  { %4571 = vmatmul.msk.f32.vlgmr.msrb.gmra.mxu3 %vm358_vm5, %v4922_v40 }
0x29b2   :  { %4923 = vtanh.f32 %v3695_v50  ;;  %3999 = vmatpush.bf16.msrb.mxu3 %v5776_v62 }
0x29b6   :  { %4000 = vmatpush.bf16.msrb.mxu3 %v5796_v26 }
0x29b8   :  { %v4924_v34 = vpop.eup %4923 }
0x29b9   :  { %4572 = vmatmul.msk.f32.gmra.mxu3 %vm358_vm5, %v4924_v34 }
0x29ba   :  { %4001 = vmatpush.bf16.msrb.mxu3 %v5822_v11 }
0x29be   :  { %4002 = vmatpush.bf16.msrb.mxu3 %v5834_v52 }
0x29c1   :  { %4578 = vmatmul.msk.bf16.vlgmr.msra.gmra.mxu3 %vm144_vm0, %v6911_v6 }
0x2a34   :  { %v3722_v45 = vpop.f32.mrf.mxu3 }
0x2a35   :  { %v3734_v1 = vmul.f32 %v7391_v24, %v3722_v45 }
0x2a37   :  { %v3736_v62 = vmul.f32 1.442695, %v3734_v1 }
0x2a3c   :  { %v3725_v28 = vpop.f32.mrf.mxu3 }
0x2a3d   :  { %v3735_v47 = vmul.f32 %v7393_v14, %v3725_v28 }
0x2a3f   :  { %v3738_v55 = vmul.f32 1.442695, %v3735_v47 }
0x2a41   :  { %4925 = vpow2.f32 %v3738_v55  ;;  %v7399_v55 = vld [vmem:[#allocation37_spill] sm:$0xff] }
0x2a42   :  { %4927 = vpow2.f32 %v3736_v62  ;;  %v6983_v62 = vld [vmem:[%s7171_s16 + $0x18] sm:$0xff] }
0x2a43   :  { %4129 = vmatpush.bf16.msra.mxu3 %v6983_v62 }
0x2a44   :  { %v6954_v26 = vpop.f32.mrf.mxu3 }
0x2a47   :  { %v4926_v18 = vpop.eup %4925 }
0x2a48   :  { %4573 = vmatpush.msk.msra.mxu0 %vm562_vm1, %v4926_v18  ;;  %v4928_v11 = vpop.eup %4927 }
0x2a4a   :  { %3758 = vmatpush.msra.mxu0 %v4928_v11 }
0x2a4b   :  { %4574 = vmatmul.msk.f32.vlgmr.msra.gmra.mxu0 %vm626_vm15, %v6804_v44  ;;  %v7397_v44 = vld [vmem:[#allocation54_spill] sm:$0xff] }
0x2a4c   :  { %v3878_v52 = vpop.f32.mrf.mxu3  ;;  %3884 = vmatpush.bf16.msrb.mxu0 %v5626_v10 }
0x2a50   :  { %3885 = vmatpush.bf16.msrb.mxu0 %v5641_v16 }
0x2a53   :  { %4575 = vmatmul.msk.f32.gmra.mxu0 %vm626_vm15, %v6813_v9 }
0x2a54   :  { %3886 = vmatpush.bf16.msrb.mxu0 %v5659_v43 }
0x2a58   :  { %3887 = vmatpush.bf16.msrb.mxu0 %v7394_v39  ;;  %v6997_v39 = vld [vmem:[%s7171_s16 + $0x10] sm:$0xff] }
0x2a59   :  { %4130 = vmatpush.bf16.msra.mxu3 %v6997_v39 }
0x2a5b   :  { %4579 = vmatmul.msk.bf16.vlgmr.msrb.gmra.mxu0 %vm144_vm0, %v6911_v6 }
0x2a5c   :  { %4012 = vmatpush.bf16.msra.mxu0 %v7395_v61  ;;  %v7401_v61 = vld [vmem:[#allocation48_spill] sm:$0xff] }
0x2a60   :  { %4013 = vmatpush.bf16.msra.mxu0 %v7396_v3  ;;  %v7402_v3 = vld [vmem:[#allocation50_spill] sm:$0xff] }
0x2a61   :  { %v2944_v38 = vsel %vm2932_vm4, %v7402_v3, %v7401_v61 }
0x2a64   :  { %4014 = vmatpush.bf16.msra.mxu0 %v7397_v44 }
0x2a68   :  { %4015 = vmatpush.bf16.msra.mxu0 %v7398_v20 }
0x2a6c   :  { %4142 = vmatpush.bf16.msrb.mxu0 %v6983_v62 }
0x2a70   :  { %4143 = vmatpush.bf16.msrb.mxu0 %v6997_v39 }
0x2ac8   :  { %v3760_v10 = vpop.f32.mrf.mxu0 }
0x2ac9   :  { %4929 = vrcp.f32 %v3760_v10  ;;  %v3777_v42 = vand.u32 2147483648, %v3760_v10  ;;  %v3775_v36 = vand.u32 2147483647, %v3760_v10  ;;  %vm3771_vm5 = vweird.f32 %v3760_v10 }
0x2acb   :  { %v3778_v22 = vor.u32 1.1754944e-38, %v3777_v42  ;;  %vm3776_vm9 = vcmp.eq.f32.partialorder %v3775_v36, 8.507059e+37 }
0x2acf   :  { %v4930_v16 = vpop.eup %4929 }
0x2ad0   :  { %v3767_v7 = vmul.f32 %v4930_v16, %v3760_v10  ;;  %v3763_v9 = vpop.f32.mrf.mxu0  ;;  %vm3772_vm2 = vweird.f32 %v4930_v16 }
0x2ad1   :  { %4931 = vrcp.f32 %v3763_v9  ;;  %vm3773_vm8 = vmor %vm3771_vm5, %vm3772_vm2  ;;  %v3792_v40 = vand.u32 2147483648, %v3763_v9  ;;  %v3790_v33 = vand.u32 2147483647, %v3763_v9  ;;  %vm3786_vm10 = vweird.f32 %v3763_v9 }
0x2ad2   :  { %v3768_v43 = vsub.f32 1.0, %v3767_v7  ;;  %vm4073_vm2 = vcmask 58368  }
0x2ad3   :  { %v3793_v34 = vor.u32 1.1754944e-38, %v3792_v40  ;;  %vm3791_vm11 = vcmp.eq.f32.partialorder %v3790_v33, 8.507059e+37 }
0x2ad4   :  { %v3769_v8 = vmul.f32 %v4930_v16, %v3768_v43 }
0x2ad6   :  { %v3770_v15 = vadd.f32 %v4930_v16, %v3769_v8  ;;  %v7015_v8 = vld [vmem:[%s7171_s16 + $0x8] sm:$0xff] }
0x2ad7   :  { %v4932_v6 = vpop.eup %4931  ;;  %4131 = vmatpush.bf16.msra.mxu3 %v7015_v8  ;;  %4144 = vmatpush.bf16.msrb.mxu0 %v7015_v8 }
0x2ad8   :  { %v3782_v58 = vmul.f32 %v4932_v6, %v3763_v9  ;;  %v6971_v37 = vpop.f32.mrf.mxu0  ;;  %v3774_v2 = vsel %vm3773_vm8, %v4930_v16, %v3770_v15  ;;  %vm3787_vm14 = vweird.f32 %v4932_v6 }
0x2ad9   :  { %v3779_v27 = vsel %vm3776_vm9, %v3778_v22, %v3774_v2  ;;  %vm3788_vm7 = vmor %vm3786_vm10, %vm3787_vm14 }
0x2ada   :  { %v3783_v25 = vsub.f32 1.0, %v3782_v58  ;;  %v3780_v31 = vmul.f32 %v4928_v11, %v3779_v27  ;;  %v3814_v11 = vrot.slane %v7384_v5, 6  ;;  %v3377_v5 = vsel %vm3365_vm13, %v6842_v57, %v2944_v38 }
0x2adc   :  { %v3784_v46 = vmul.f32 %v4932_v6, %v3783_v25  ;;  %3799 = vperm.xlu1 %4663, %v3780_v31  }
0x2ade   :  { %v3785_v50 = vadd.f32 %v4932_v6, %v3784_v46 }
0x2ae0   :  { %v3891_v45 = vpop.f32.mrf.mxu0  ;;  %v3789_v24 = vsel %vm3788_vm7, %v4932_v6, %v3785_v50  ;;  %v7027_v6 = vld [vmem:[%s7171_s16] sm:$0xff]  ;;  %v3896_v50 = vrot.slane %v6971_v37, 2 }
0x2ae1   :  { %v3794_v1 = vsel %vm3791_vm11, %v3793_v34, %v3789_v24  ;;  %4132 = vmatpush.bf16.msra.mxu3 %v7027_v6  ;;  %4145 = vmatpush.bf16.msrb.mxu0 %v7027_v6 }
0x2ae2   :  { %v3795_v28 = vmul.f32 %v4926_v18, %v3794_v1  ;;  %v3812_v18 = vrot.slane %v7399_v55, 6  ;;  %v7086_v1 = vld [vmem:[%s7172_s17] ss:$0 sm:$0xff] }
0x2ae4   :  { %3804 = vperm.xlu0 %4665, %v3795_v28   ;;  %v3813_v44 = vsel %vm562_vm1, %v3811_v21, %v3812_v18 }
0x2aec   :  { %3957 = vrot.lane.b32.xlu0 %v3955_v19, %s5068_s29 }
0x2b4e   :  { %v3800_v14 = vpop.permute.xlu1 %3799 }
0x2b4f   :  { %v3807_v47 = vsel %vm3796_vm3, %v3800_v14, %v6834_v13  ;;  %v7400_v13 = vld [vmem:[#allocation47_spill] sm:$0xff]  ;;  %v3821_v10 = vmul.f32 %v3813_v44, %v3800_v14 }
0x2b50   :  { %4072 = vst.msk [vmem:[%s7173_s18] sm:$0xff] %vm4071_vm6, %v3807_v47  ;;  %v3815_v52 = vrot.slane %v7400_v13, 6 }
0x2b52   :  { %v3816_v20 = vsel %vm562_vm1, %v3814_v11, %v3815_v52 }
0x2b53   :  { %v3822_v7 = vmul.f32 %v3816_v20, %v3800_v14 }
0x2b56   :  { %v3805_v16 = vpop.permute.xlu0 %3804 }
0x2b57   :  { %v3808_v9 = vsel %vm3796_vm3, %v3805_v16, %v3377_v5  ;;  %v3823_v43 = vmul.f32 %v3812_v18, %v3805_v16  ;;  %v3824_v42 = vmul.f32 %v3815_v52, %v3805_v16  ;;  %v3943_v18 = vrot.slane %v6907_v49, 6 }
0x2b58   :  { %4074 = vst.msk [vmem:[%s7173_s18 + $0x8] sm:$0x3] %vm4073_vm2, %v3808_v9 }
0x2b59   :  { %v3825_v57 = vpack.c.bf16 %v3823_v43, %v3821_v10  ;;  %v3826_v36 = vpack.c.bf16 %v3824_v42, %v3822_v7 }
0x2b5b   :  { %v3828_v41 = vsel %vm711_vm12, %v3825_v57, 0  ;;  %v3831_v15 = vsel %vm711_vm12, %v3826_v36, 0 }
0x2b5c   :  { %3840 = vmatpush.bf16.msrb.mxu1 %v3828_v41  ;;  %3853 = vmatpush.bf16.msrb.mxu2 %v3831_v15 }
0x2b5f   :  { %4576 = vmatmul.msk.bf16.vlgmr.msrb.gmra.mxu1 %vm626_vm15, %v6853_v32  ;;  %4577 = vmatmul.msk.bf16.vlgmr.msrb.gmra.mxu2 %vm626_vm15, %v6853_v32  ;;  %vm4210_vm15 = vcmask 9216  }
0x2b60   :  { %3966 = vmatpush.bf16.msra.mxu1 %v5751_v53  ;;  %3979 = vmatpush.bf16.msra.mxu2 %v5762_v56  ;;  %v7045_v53 = vpop.permute.xlu0 %3957  ;;  %v7405_v56 = vld [vmem:[#allocation15_spill] sm:$0xff] }
0x2b64   :  { %3967 = vmatpush.bf16.msra.mxu1 %v5771_v63  ;;  %3980 = vmatpush.bf16.msra.mxu2 %v5774_v17 }
0x2b68   :  { %3968 = vmatpush.bf16.msra.mxu1 %v5799_v54  ;;  %3981 = vmatpush.bf16.msra.mxu2 %v5812_v48  ;;  %v7403_v54 = vld [vmem:[#allocation57_spill] sm:$0xff]  ;;  %v3895_v48 = vrot.slane %v6954_v26, 2 }
0x2b6c   :  { %3969 = vmatpush.bf16.msra.mxu1 %v5827_v59  ;;  %3982 = vmatpush.bf16.msra.mxu2 %v5830_v60  ;;  %v7404_v60 = vld [vmem:[#allocation40_spill] sm:$0xff] }
0x2b6f   :  { %4582 = vmatmul.msk.bf16.vlgmr.msra.gmra.mxu1 %vm144_vm0, %v7045_v53  ;;  %4583 = vmatmul.msk.bf16.vlgmr.msra.gmra.mxu2 %vm144_vm0, %v7045_v53 }
0x2b70   :  { %4103 = vmatpush.bf16.msrb.mxu1 %v6983_v62  ;;  %4116 = vmatpush.bf16.msrb.mxu2 %v6983_v62 }
0x2b74   :  { %4104 = vmatpush.bf16.msrb.mxu1 %v6997_v39  ;;  %4117 = vmatpush.bf16.msrb.mxu2 %v6997_v39 }
0x2b78   :  { %4105 = vmatpush.bf16.msrb.mxu1 %v7015_v8  ;;  %4118 = vmatpush.bf16.msrb.mxu2 %v7015_v8 }
0x2b7c   :  { %4106 = vmatpush.bf16.msrb.mxu1 %v7027_v6  ;;  %4119 = vmatpush.bf16.msrb.mxu2 %v7027_v6 }
0x2b7f   :  { %4604 = vmatmul.msk.bf16.vlgmr.msrb.gmra.mxu1 %vm144_vm0, %v7403_v54  ;;  %4605 = vmatmul.msk.bf16.vlgmr.msrb.gmra.mxu2 %vm144_vm0, %v7404_v60 }
0x2b80   :  { %4155 = vmatpush.bf16.msra.mxu1 %v6983_v62  ;;  %4168 = vmatpush.bf16.msra.mxu2 %v6983_v62 }
0x2b84   :  { %4156 = vmatpush.bf16.msra.mxu1 %v6997_v39  ;;  %4169 = vmatpush.bf16.msra.mxu2 %v6997_v39 }
0x2b88   :  { %4157 = vmatpush.bf16.msra.mxu1 %v7015_v8  ;;  %4170 = vmatpush.bf16.msra.mxu2 %v7015_v8 }
0x2b8c   :  { %4158 = vmatpush.bf16.msra.mxu1 %v7027_v6  ;;  %4171 = vmatpush.bf16.msra.mxu2 %v7027_v6 }
0x2b8f   :  { %4608 = vmatmul.msk.bf16.vlgmr.msra.gmra.mxu1 %vm144_vm0, %v7405_v56  ;;  %4609 = vmatmul.msk.bf16.vlgmr.msra.gmra.mxu2 %vm144_vm0, %v6873_v29 }
0x2bdc   :  { %v3842_v63 = vpop.f32.mrf.mxu1 }
0x2bdd   :  { %v3861_v17 = vrot.slane %v3842_v63, 2 }
0x2bdf   :  { %v3865_v59 = vadd.f32 %v3861_v17, %v6558_v23 }
0x2be1   :  { %v3899_v32 = vadd.f32 %v3895_v48, %v3865_v59 }
0x2be2   :  { %v3855_v22 = vpop.f32.mrf.mxu2 }
0x2be3   :  { %v3901_v58 = vadd.f32 %v3899_v32, %v7325_v30  ;;  %v3862_v25 = vrot.slane %v3855_v22, 2 }
0x2be4   :  { %v3844_v2 = vpop.f32.mrf.mxu1 }
0x2be5   :  { %v4580_v27 = vmul.f32 -1.442695, %v3901_v58  ;;  %v3866_v29 = vadd.f32 %v3862_v25, %v7357_v35 }
0x2be7   :  { %4933 = vpow2.f32 %v4580_v27  ;;  %v3900_v26 = vadd.f32 %v3896_v50, %v3866_v29  ;;  %v7407_v29 = vld [vmem:[#allocation49_spill] sm:$0xff] }
0x2be9   :  { %v3902_v30 = vadd.f32 %v3900_v26, %v7387_v12 }
0x2bea   :  { %v3857_v31 = vpop.f32.mrf.mxu2 }
0x2beb   :  { %v4581_v42 = vmul.f32 -1.442695, %v3902_v30 }
0x2bec   :  { %v7076_v40 = vpop.f32.mrf.mxu1 }
0x2bed   :  { %v4934_v46 = vpop.eup %4933 }
0x2bee   :  { %v3906_v33 = vadd.f32 1.0, %v4934_v46 }
0x2bf0   :  { %4935 = vrcp.f32 %v3906_v33  ;;  %v3918_v35 = vand.u32 2147483648, %v3906_v33  ;;  %v3916_v37 = vand.u32 2147483647, %v3906_v33  ;;  %vm3912_vm12 = vweird.f32 %v3906_v33 }
0x2bf1   :  { %4937 = vtanh.f32 %v3902_v30 }
0x2bf2   :  { %v7080_v23 = vpop.f32.mrf.mxu2  ;;  %v3919_v12 = vor.u32 1.1754944e-38, %v3918_v35  ;;  %vm3917_vm13 = vcmp.eq.f32.partialorder %v3916_v37, 8.507059e+37  ;;  %4939 = vpow2.f32 %v4581_v42 }
0x2bf4   :  { %v3973_v34 = vpop.f32.mrf.mxu1 }
0x2bf6   :  { %v4936_v45 = vpop.eup %4935 }
0x2bf7   :  { %v3908_v24 = vmul.f32 %v4936_v45, %v3906_v33  ;;  %vm3913_vm1 = vweird.f32 %v4936_v45  ;;  %v4938_v13 = vpop.eup %4937  ;;  %v7406_v33 = vld [vmem:[#allocation41_spill] sm:$0xff] }
0x2bf8   :  { %vm3914_vm4 = vmor %vm3912_vm12, %vm3913_vm1  ;;  %v4940_v57 = vpop.eup %4939 }
0x2bf9   :  { %v3909_v28 = vsub.f32 1.0, %v3908_v24  ;;  %v3926_v36 = vadd.f32 1.0, %v4940_v57 }
0x2bfa   :  { %v3986_v19 = vpop.f32.mrf.mxu2 }
0x2bfb   :  { %v3910_v14 = vmul.f32 %v4936_v45, %v3909_v28  ;;  %4941 = vrcp.f32 %v3926_v36  ;;  %v3938_v48 = vand.u32 2147483648, %v3926_v36  ;;  %vm3932_vm8 = vweird.f32 %v3926_v36 }
0x2bfc   :  { %v4108_v47 = vpop.f32.mrf.mxu1  ;;  %v3936_v59 = vand.u32 2147483647, %v3926_v36 }
0x2bfd   :  { %v4109_v21 = vadd.f32 %v7086_v1, %v4108_v47  ;;  %v3911_v55 = vadd.f32 %v4936_v45, %v3910_v14  ;;  %v3939_v22 = vor.u32 1.1754944e-38, %v3938_v48 }
0x2bfe   :  { %vm3937_vm14 = vcmp.eq.f32.partialorder %v3936_v59, 8.507059e+37 }
0x2bff   :  { %4211 = vst.msk [vmem:[%s7174_s19] sm:$0x3] %vm4210_vm15, %v4109_v21  ;;  %v3915_v11 = vsel %vm3914_vm4, %v4936_v45, %v3911_v55 }
0x2c00   :  { %v3920_v52 = vsel %vm3917_vm13, %v3919_v12, %v3915_v11 }
0x2c01   :  { %v3946_v61 = vmul.f32 %v4938_v13, %v3920_v52  ;;  %v3945_v3 = vmul.f32 %v3943_v18, %v3920_v52  ;;  %v4942_v41 = vpop.eup %4941 }
0x2c02   :  { %v4121_v38 = vpop.f32.mrf.mxu2  ;;  %v3928_v15 = vmul.f32 %v4942_v41, %v3926_v36  ;;  %vm3933_vm5 = vweird.f32 %v4942_v41 }
0x2c03   :  { %v4122_v44 = vadd.f32 %v7086_v1, %v4121_v38  ;;  %3948 = vrot.lane.b32.xlu2 %v3946_v61, %s5068_s29  ;;  %vm3934_vm9 = vmor %vm3932_vm8, %vm3933_vm5 }
0x2c04   :  { %v4110_v5 = vpop.f32.mrf.mxu1  ;;  %v3929_v54 = vsub.f32 1.0, %v3928_v15 }
0x2c05   :  { %4212 = vst.msk [vmem:[%s7174_s19 + $0x2] sm:$0x3] %vm4210_vm15, %v4122_v44 }
0x2c06   :  { %v3930_v60 = vmul.f32 %v4942_v41, %v3929_v54 }
0x2c08   :  { %v3931_v17 = vadd.f32 %v4942_v41, %v3930_v60 }
0x2c0a   :  { %v4123_v49 = vpop.f32.mrf.mxu2  ;;  %v3935_v32 = vsel %vm3934_vm9, %v4942_v41, %v3931_v17 }
0x2c0b   :  { %v3940_v2 = vsel %vm3937_vm14, %v3939_v22, %v3935_v32 }
0x2c0c   :  { %v4160_v20 = vpop.f32.mrf.mxu1 }
0x2c0d   :  { %v4161_v10 = vadd.f32 %v7086_v1, %v4160_v20 }
0x2c0f   :  { %4215 = vst.msk [vmem:[%s7174_s19 + $0x8] sm:$0x3] %vm4210_vm15, %v4161_v10 }
0x2c12   :  { %v4173_v16 = vpop.f32.mrf.mxu2 }
0x2c13   :  { %v4174_v7 = vadd.f32 %v7086_v1, %v4173_v16 }
0x2c14   :  { %v4162_v9 = vpop.f32.mrf.mxu1 }
0x2c15   :  { %4216 = vst.msk [vmem:[%s7174_s19 + $0xa] sm:$0x3] %vm4210_vm15, %v4174_v7 }
0x2c1a   :  { %v4175_v43 = vpop.f32.mrf.mxu2 }
0x2c5d   :  { %v3949_v56 = vpop.permute.xlu2 %3948 }
0x2c5e   :  { %v3951_v63 = vadd.f32 %v3949_v56, %v3945_v3 }
0x2c60   :  { %4943 = vtanh.f32 %v3951_v63 }
0x2c66   :  { %v4944_v58 = vpop.eup %4943 }
0x2c67   :  { %v3953_v27 = vmul.f32 %v4944_v58, %v3940_v2 }
0x2c69   :  { %v3954_v25 = vpack.c.bf16 %v3953_v27, %v3953_v27 }
0x2c6b   :  { %v3989_v31 = vrot.slane %v3954_v25, 3 }
0x2c6d   :  { %3990 = vrot.lane.b32.xlu1 %v3989_v31, %s5068_s29 }
0x2cdf   :  { %v3991_v46 = vpop.permute.xlu1 %3990 }
0x2ce0   :  { %4584 = vmatmul.msk.bf16.vlgmr.msrb.gmra.mxu3 %vm144_vm0, %v3991_v46  ;;  %4585 = vmatmul.msk.bf16.vlgmr.msra.gmra.mxu0 %vm144_vm0, %v3991_v46 }
0x2ce1   :  { %4181 = vmatpush.bf16.msrb.mxu3 %v6983_v62  ;;  %4201 = vmatpush.bf16.msra.mxu0 %v6983_v62 }
0x2ce5   :  { %4182 = vmatpush.bf16.msrb.mxu3 %v6997_v39  ;;  %4202 = vmatpush.bf16.msra.mxu0 %v6997_v39 }
0x2ce9   :  { %4183 = vmatpush.bf16.msrb.mxu3 %v7015_v8  ;;  %4203 = vmatpush.bf16.msra.mxu0 %v7015_v8 }
0x2ced   :  { %4184 = vmatpush.bf16.msrb.mxu3 %v7027_v6  ;;  %4204 = vmatpush.bf16.msra.mxu0 %v7027_v6 }
0x2cf0   :  { %4606 = vmatmul.msk.bf16.vlgmr.msra.gmra.mxu3 %vm144_vm0, %v7406_v33  ;;  %4607 = vmatmul.msk.bf16.vlgmr.msrb.gmra.mxu0 %vm144_vm0, %v7407_v29 }
0x2d00   :  { %4610 = vmatmul.msk.bf16.vlgmr.msrb.gmra.mxu3 %vm144_vm0, %v7045_v53 }
0x2d5d   :  { %v4017_v62 = vpop.f32.mrf.mxu0 }
0x2d5e   :  { %v4018_v19 = vadd.f32 %v4017_v62, %v7080_v23 }
0x2d60   :  { %v4022_v14 = vadd.f32 %v4018_v19, %v5884_v4 }
0x2d62   :  { %v4587_v5 = vmul.f32 -1.442695, %v4022_v14 }
0x2d63   :  { %v4004_v50 = vpop.f32.mrf.mxu3 }
0x2d64   :  { %v4005_v39 = vadd.f32 %v4004_v50, %v7076_v40 }
0x2d65   :  { %v4019_v26 = vpop.f32.mrf.mxu0 }
0x2d66   :  { %v4021_v8 = vadd.f32 %v4005_v39, %v5881_v51 }
0x2d68   :  { %v4586_v34 = vmul.f32 -1.442695, %v4021_v8 }
0x2d6a   :  { %4945 = vpow2.f32 %v4586_v34 }
0x2d6b   :  { %v4006_v45 = vpop.f32.mrf.mxu3 }
0x2d6d   :  { %v4147_v6 = vpop.f32.mrf.mxu0 }
0x2d6e   :  { %v4148_v30 = vadd.f32 %v7086_v1, %v4147_v6 }
0x2d70   :  { %v4946_v24 = vpop.eup %4945  ;;  %4214 = vst.msk [vmem:[%s7174_s19 + $0x6] sm:$0x3] %vm4210_vm15, %v4148_v30 }
0x2d71   :  { %v4026_v53 = vadd.f32 1.0, %v4946_v24 }
0x2d73   :  { %4947 = vrcp.f32 %v4026_v53  ;;  %v4134_v28 = vpop.f32.mrf.mxu3  ;;  %v4038_v55 = vand.u32 2147483648, %v4026_v53  ;;  %v4036_v18 = vand.u32 2147483647, %v4026_v53  ;;  %vm4032_vm7 = vweird.f32 %v4026_v53 }
0x2d74   :  { %v4135_v40 = vadd.f32 %v7086_v1, %v4134_v28  ;;  %4949 = vtanh.f32 %v4022_v14 }
0x2d75   :  { %v4149_v51 = vpop.f32.mrf.mxu0  ;;  %v4039_v23 = vor.u32 1.1754944e-38, %v4038_v55  ;;  %vm4037_vm3 = vcmp.eq.f32.partialorder %v4036_v18, 8.507059e+37  ;;  %4951 = vpow2.f32 %v4587_v5 }
0x2d76   :  { %4213 = vst.msk [vmem:[%s7174_s19 + $0x4] sm:$0x3] %vm4210_vm15, %v4135_v40 }
0x2d79   :  { %v4948_v35 = vpop.eup %4947 }
0x2d7a   :  { %v4028_v37 = vmul.f32 %v4948_v35, %v4026_v53  ;;  %vm4033_vm10 = vweird.f32 %v4948_v35  ;;  %v4950_v52 = vpop.eup %4949 }
0x2d7b   :  { %v4136_v47 = vpop.f32.mrf.mxu3  ;;  %vm4034_vm11 = vmor %vm4032_vm7, %vm4033_vm10  ;;  %v4952_v49 = vpop.eup %4951 }
0x2d7c   :  { %v4029_v21 = vsub.f32 1.0, %v4028_v37  ;;  %v4046_v20 = vadd.f32 1.0, %v4952_v49 }
0x2d7e   :  { %v4030_v12 = vmul.f32 %v4948_v35, %v4029_v21  ;;  %4953 = vrcp.f32 %v4046_v20  ;;  %v4058_v41 = vand.u32 2147483648, %v4046_v20  ;;  %vm4052_vm2 = vweird.f32 %v4046_v20 }
0x2d7f   :  { %v4056_v15 = vand.u32 2147483647, %v4046_v20 }
0x2d80   :  { %v4031_v11 = vadd.f32 %v4948_v35, %v4030_v12  ;;  %v4059_v60 = vor.u32 1.1754944e-38, %v4058_v41 }
0x2d81   :  { %vm4057_vm12 = vcmp.eq.f32.partialorder %v4056_v15, 8.507059e+37 }
0x2d82   :  { %v4035_v13 = vsel %vm4034_vm11, %v4948_v35, %v4031_v11 }
0x2d83   :  { %v4186_v61 = vpop.f32.mrf.mxu3  ;;  %v4040_v3 = vsel %vm4037_vm3, %v4039_v23, %v4035_v13 }
0x2d84   :  { %v4187_v38 = vadd.f32 %v7086_v1, %v4186_v61  ;;  %v4063_v4 = vmul.f32 %v4950_v52, %v4040_v3  ;;  %v4954_v10 = vpop.eup %4953  ;;  %v4062_v43 = vmul.f32 %v4040_v3, %v6923_v0 }
0x2d85   :  { %v4048_v16 = vmul.f32 %v4954_v10, %v4046_v20  ;;  %vm4053_vm6 = vweird.f32 %v4954_v10 }
0x2d86   :  { %4217 = vst.msk [vmem:[%s7174_s19 + $0xc] sm:$0x3] %vm4210_vm15, %v4187_v38  ;;  %4065 = vrot.lane.b32.xlu2 %v4063_v4, %s5068_s29  ;;  %vm4054_vm1 = vmor %vm4052_vm2, %vm4053_vm6 }
0x2d87   :  { %v4049_v7 = vsub.f32 1.0, %v4048_v16 }
0x2d89   :  { %v4050_v9 = vmul.f32 %v4954_v10, %v4049_v7 }
0x2d8b   :  { %v4188_v44 = vpop.f32.mrf.mxu3  ;;  %v4051_v36 = vadd.f32 %v4954_v10, %v4050_v9 }
0x2d8d   :  { %v4055_v54 = vsel %vm4054_vm1, %v4954_v10, %v4051_v36 }
0x2d8e   :  { %v4060_v63 = vsel %vm4057_vm12, %v4059_v60, %v4055_v54 }
0x2de0   :  { %v4066_v42 = vpop.permute.xlu2 %4065 }
0x2de1   :  { %v4068_v57 = vadd.f32 %v4066_v42, %v4062_v43 }
0x2de3   :  { %4955 = vtanh.f32 %v4068_v57 }
0x2de9   :  { %v4956_v56 = vpop.eup %4955 }
0x2dea   :  { %v4070_v17 = vmul.f32 %v4956_v56, %v4060_v63 }
0x2dec   :  { %v4190_v48 = vpack.c.bf16 %v4070_v17, %v4070_v17 }
0x2dee   :  { %4192 = vrot.lane.b32.xlu1 %v4190_v48, %s5068_s29 }
0x2e60   :  { %v4193_v59 = vpop.permute.xlu1 %4192 }
0x2e61   :  { %4611 = vmatmul.msk.bf16.vlgmr.msra.gmra.mxu0 %vm144_vm0, %v4193_v59 }
0x2ede   :  { %v4206_v0 = vpop.f32.mrf.mxu0 }
0x2edf   :  { %v4207_v32 = vadd.f32 %v7086_v1, %v4206_v0 }
0x2ee1   :  { %4218 = vst.msk [vmem:[%s7174_s19 + $0xe] sm:$0x3] %vm4210_vm15, %v4207_v32 }
0x2ee6   :  { %v4208_v22 = vpop.f32.mrf.mxu0 }
0x2ee7   :  { %4227 = vsyncpa [#allocation3], 1 }
0x2ee8   :  { %4228 = vsyncpa [#allocation5], 1 }

</bundles_post_ra>
